<compile_context>
chip_gen: v7x
topology: tpu7x:2x2x1
jax: 0.10.0
libtpu: 0.0.40
codegen_flags: <defaults>
</compile_context>

<pallas_src>
import functools

import numpy as np
import jax
import jax.numpy as jnp
from jax.experimental import pallas as pl
from jax.experimental.pallas import tpu as pltpu


# ---------------------------------------------------------------------------
# Kernels
# ---------------------------------------------------------------------------
def cnn_kernel(x_ref, m1_ref, b1_ref, m2_ref, b2_ref, pool_ref, feat_ref, *, inv_f):
    """CNN feature extractor as three lane-dense MXU matmuls per row tile.

    Conv1d(1->16,k3,p1)+ReLU  : x[TM,F]    @ M1[F,16F]   + b1_tiled
    Conv1d(16->32,k3,p1)+ReLU : z1[TM,16F] @ M2[16F,32F] + b2_tiled
    AdaptiveAvgPool1d(1)      : z2[TM,32F] @ P[32F,32]   * (1/F)
    M1/M2/P are tiny position-folded conv weights built once on the host.
    """
    x = x_ref[...]
    z1 = jnp.dot(x, m1_ref[...], preferred_element_type=jnp.float32) + b1_ref[...]
    z1 = jnp.maximum(z1, 0.0)
    z2 = jnp.dot(z1.astype(m2_ref.dtype), m2_ref[...],
                 preferred_element_type=jnp.float32) + b2_ref[...]
    z2 = jnp.maximum(z2, 0.0)
    feat = jnp.dot(z2.astype(pool_ref.dtype), pool_ref[...],
                   preferred_element_type=jnp.float32) * inv_f
    feat_ref[...] = feat.astype(feat_ref.dtype)


def sage1_kernel(adj_ref, feat_ref, invdeg_ref, w_ref, b_ref, s1_ref, acc_ref,
                 *, tm, tk, compute_dtype):
    """s1 = relu([inv_deg * (A_cnt @ feat) | feat] @ [wl1; wr1] + bl1).

    feat is VMEM-resident (constant block); adj columns are reduced over the
    k grid axis into an f32 accumulator, 1/deg applied exactly in the finalize.
    """
    i = pl.program_id(0)
    k = pl.program_id(1)

    @pl.when(k == 0)
    def _():
        acc_ref[...] = jnp.zeros_like(acc_ref)

    a = adj_ref[...].astype(compute_dtype)                     # int8 counts -> compute
    koff = pl.multiple_of(k * tk, tk)
    fk = feat_ref[pl.ds(koff, tk), :]                          # resident slice [TK,32]
    acc_ref[...] += jnp.dot(a, fk, preferred_element_type=jnp.float32)

    @pl.when(k == pl.num_programs(1) - 1)
    def _():
        agg = acc_ref[...] * invdeg_ref[...]                   # exact mean agg (f32)
        ioff = pl.multiple_of(i * tm, tm)
        self_f = feat_ref[pl.ds(ioff, tm), :]                  # self rows [TM,32]
        cat = jnp.concatenate([agg.astype(compute_dtype), self_f], axis=1)
        s1 = jnp.dot(cat, w_ref[...], preferred_element_type=jnp.float32) + b_ref[...]
        s1_ref[...] = jnp.maximum(s1, 0.0).astype(s1_ref.dtype)


def sage2_head_kernel(adj_ref, s1_ref, invdeg_ref, w_ref, c_ref, out_ref, acc_ref,
                      *, tm, tk, compute_dtype):
    """out_row = w_folded @ [inv_deg*(A_cnt @ s1) | s1]^T + c   (lane-dense [1,TM])."""
    i = pl.program_id(0)
    k = pl.program_id(1)

    @pl.when(k == 0)
    def _():
        acc_ref[...] = jnp.zeros_like(acc_ref)

    a = adj_ref[...].astype(compute_dtype)
    koff = pl.multiple_of(k * tk, tk)
    sk = s1_ref[pl.ds(koff, tk), :]                            # resident slice [TK,H]
    acc_ref[...] += jnp.dot(a, sk, preferred_element_type=jnp.float32)

    @pl.when(k == pl.num_programs(1) - 1)
    def _():
        agg = acc_ref[...] * invdeg_ref[...]                   # [TM,H] f32
        ioff = pl.multiple_of(i * tm, tm)
        self_s = s1_ref[pl.ds(ioff, tm), :].astype(jnp.float32)
        cat = jnp.concatenate([agg, self_s], axis=1)           # [TM,2H] f32
        # Lane-dense [1,TM] result instead of a 1-lane-wide [TM,1] column store.
        row = jnp.dot(w_ref[...], cat.T, preferred_element_type=jnp.float32)
        out_ref[...] = row + c_ref[...]


# ---------------------------------------------------------------------------
# Host-side tiling / resource helpers
# ---------------------------------------------------------------------------
def _sage_tiles(n, max_tk=2048):
    """Row tile (TM), padded node count and adjacency column tile (TK)."""
    npad = pl.cdiv(n, 128) * 128
    if npad <= 256:
        tm = 128                     # keep >=2 row tiles for tiny graphs (v7x 2 TCs)
    else:
        tm = 256                     # fills the v6e/v7x 256-row MXU
        npad = pl.cdiv(n, 256) * 256
    tk = 128
    for cand in (2048, 1024, 512, 256, 128):
        if cand <= max_tk and npad % cand == 0:
            tk = cand                # widest column tile dividing npad -> big bursts
            break
    return npad, tm, tk


def _vmem_limit_bytes(working_set_bytes):
    try:
        cap = pltpu.get_tpu_info().vmem_capacity_bytes
    except Exception:
        cap = 64 << 20               # assume the smallest budget (v7x per-TC)
    return int(min(max(32 << 20, 2 * working_set_bytes), (3 * cap) // 4))


# ---------------------------------------------------------------------------
# Graph / weight preparation (build once, reuse across forward calls)
# ---------------------------------------------------------------------------
def build_graph(edge_index, num_nodes, npad):
    """Unnormalized int8 edge-count adjacency + f32 inverse degree (padded).

    int8 counts are exact (< 128 parallel edges per pair) and halve/quarter the
    dominant N^2 HBM stream vs bf16/f32; 1/deg is applied in an f32 epilogue.
    """
    src, dst = edge_index[0], edge_index[1]
    cnt = jnp.zeros((num_nodes, num_nodes), jnp.float32).at[dst, src].add(1.0)
    deg = jnp.sum(cnt, axis=1, keepdims=True)
    inv_deg = 1.0 / jnp.maximum(deg, 1.0)          # isolated nodes -> zero agg
    adj = jnp.pad(cnt, ((0, npad - num_nodes), (0, npad - num_nodes)))
    inv_deg = jnp.pad(inv_deg, ((0, npad - num_nodes), (0, 0)), constant_values=1.0)
    return adj.astype(jnp.int8), inv_deg


def make_params(key, hidden_dim=64, scale=0.3):
    ks = jax.random.split(key, 12)

    def rnd(k, shape):
        return jax.random.normal(k, shape, jnp.float32) * scale

    return dict(
        w1=rnd(ks[0], (16, 1, 3)), b1=rnd(ks[1], (16,)),
        w2=rnd(ks[2], (32, 16, 3)), b2=rnd(ks[3], (32,)),
        wl1=rnd(ks[4], (32, hidden_dim)), bl1=rnd(ks[5], (hidden_dim,)),
        wr1=rnd(ks[6], (32, hidden_dim)),
        wl2=rnd(ks[7], (hidden_dim, 64)), bl2=rnd(ks[8], (64,)),
        wr2=rnd(ks[9], (hidden_dim, 64)),
        wh=rnd(ks[10], (64, 1)), bh=rnd(ks[11], (1,)),
    )


def prepare_weights(params, feature_dim, compute_dtype):
    """Fold conv taps / SAGE pairs / the Linear head into MXU-friendly matrices."""
    f = feature_dim
    w1 = np.asarray(params["w1"], np.float32)       # [16, 1, 3]
    b1 = np.asarray(params["b1"], np.float32)       # [16]
    w2 = np.asarray(params["w2"], np.float32)       # [32, 16, 3]
    b2 = np.asarray(params["b2"], np.float32)       # [32]

    # Position-folded conv weights:
    #   M1[q, p*16+c]        = w1[c, 0, q-p+1]
    #   M2[q*16+c, p*32+c']  = w2[c', c, q-p+1]
    m1 = np.zeros((f, 16 * f), np.float32)
    m2 = np.zeros((16 * f, 32 * f), np.float32)
    for p in range(f):
        for t in range(3):
            q = p + t - 1
            if 0 <= q < f:
                m1[q, p * 16:(p + 1) * 16] += w1[:, 0, t]
                m2[q * 16:(q + 1) * 16, p * 32:(p + 1) * 32] += w2[:, :, t].T
    pool = np.zeros((32 * f, 32), np.float32)       # binary sum-pool; 1/F in-kernel
    for p in range(f):
        pool[p * 32:(p + 1) * 32, :] = np.eye(32, dtype=np.float32)

    hp = jax.lax.Precision.HIGHEST
    # SAGE1 fused weight: [agg | x] @ [wl1; wr1] + bl1.
    w1s = jnp.concatenate([params["wl1"], params["wr1"]], axis=0)
    # SAGE2 with the head folded in (no nonlinearity between them):
    #   out = [agg | s1] @ [wl2@wh ; wr2@wh] + (bl2@wh + bh)
    wl2h = jnp.dot(params["wl2"], params["wh"], precision=hp)
    wr2h = jnp.dot(params["wr2"], params["wh"], precision=hp)
    w2h_row = jnp.concatenate([wl2h, wr2h], axis=0)[:, 0][None, :]
    c2h = jnp.dot(params["bl2"][None, :], params["wh"], precision=hp) + params["bh"][None, :]

    return dict(
        m1=jnp.asarray(m1, compute_dtype),
        b1t=jnp.asarray(np.tile(b1, f)[None, :], jnp.float32),
        m2=jnp.asarray(m2, compute_dtype),
        b2t=jnp.asarray(np.tile(b2, f)[None, :], jnp.float32),
        pool=jnp.asarray(pool, compute_dtype),
        w1s=w1s.astype(compute_dtype),
        bs1=params["bl1"][None, :].astype(jnp.float32),
        w2h_row=w2h_row.astype(jnp.float32),
        c2h=c2h.astype(jnp.float32),
    )


# ---------------------------------------------------------------------------
# Forward builder (cached per static configuration)
# ---------------------------------------------------------------------------
@functools.lru_cache(maxsize=None)
def _build_forward(npad, f, hidden_dim, tm, tk, compute_dtype):
    grid_rows = npad // tm
    grid_k = npad // tk
    itemsize = np.dtype(compute_dtype).itemsize

    # Actual double-buffered SAGE working set (adj tiles + resident feat/s1 +
    # output tiles + f32 accumulator + slack), clamped to 3/4 of chip VMEM.
    ws = (2 * tm * tk                                   # int8 adj, double-buffered
          + 2 * npad * 32 * itemsize                    # resident CNN features
          + 2 * npad * hidden_dim * itemsize            # resident s1
          + 2 * tm * hidden_dim * itemsize              # per-tile outputs
          + tm * hidden_dim * 4                         # f32 accumulator
          + (4 << 20))                                  # weights/bias/slack
    vmem_limit = _vmem_limit_bytes(ws)

    cp_rows = pltpu.CompilerParams(dimension_semantics=("parallel",),
                                   vmem_limit_bytes=vmem_limit)
    cp_rk = pltpu.CompilerParams(dimension_semantics=("parallel", "arbitrary"),
                                 vmem_limit_bytes=vmem_limit)

    # --- phase 1: CNN feature extractor ------------------------------------
    cnn = pl.pallas_call(
        functools.partial(cnn_kernel, inv_f=1.0 / f),
        out_shape=jax.ShapeDtypeStruct((npad, 32), compute_dtype),
        grid=(grid_rows,),
        in_specs=[
            pl.BlockSpec((tm, f), lambda i: (i, 0)),
            pl.BlockSpec((f, 16 * f), lambda i: (0, 0)),
            pl.BlockSpec((1, 16 * f), lambda i: (0, 0)),
            pl.BlockSpec((16 * f, 32 * f), lambda i: (0, 0)),
            pl.BlockSpec((1, 32 * f), lambda i: (0, 0)),
            pl.BlockSpec((32 * f, 32), lambda i: (0, 0)),
        ],
        out_specs=pl.BlockSpec((tm, 32), lambda i: (i, 0)),
        compiler_params=cp_rows,
    )

    # --- phase 2: SAGE1 (rows parallel x adj-column reduction) --------------
    sage1 = pl.pallas_call(
        functools.partial(sage1_kernel, tm=tm, tk=tk, compute_dtype=compute_dtype),
        out_shape=jax.ShapeDtypeStruct((npad, hidden_dim), compute_dtype),
        grid=(grid_rows, grid_k),
        in_specs=[
            pl.BlockSpec((tm, tk), lambda i, k: (i, k)),            # int8 adj counts
            pl.BlockSpec((npad, 32), lambda i, k: (0, 0)),          # feat, VMEM-resident
            pl.BlockSpec((tm, 1), lambda i, k: (i, 0)),             # 1/deg (f32)
            pl.BlockSpec((64, hidden_dim), lambda i, k: (0, 0)),    # [wl1; wr1]
            pl.BlockSpec((1, hidden_dim), lambda i, k: (0, 0)),     # bl1
        ],
        out_specs=pl.BlockSpec((tm, hidden_dim), lambda i, k: (i, 0)),
        scratch_shapes=[pltpu.VMEM((tm, 32), jnp.float32)],
        compiler_params=cp_rk,
    )

    # --- phase 3: SAGE2 + folded head, lane-dense [1, npad] output ----------
    sage2 = pl.pallas_call(
        functools.partial(sage2_head_kernel, tm=tm, tk=tk, compute_dtype=compute_dtype),
        out_shape=jax.ShapeDtypeStruct((1, npad), jnp.float32),
        grid=(grid_rows, grid_k),
        in_specs=[
            pl.BlockSpec((tm, tk), lambda i, k: (i, k)),            # int8 adj counts
            pl.BlockSpec((npad, hidden_dim), lambda i, k: (0, 0)),  # s1, VMEM-resident
            pl.BlockSpec((tm, 1), lambda i, k: (i, 0)),             # 1/deg (f32)
            pl.BlockSpec((1, 2 * hidden_dim), lambda i, k: (0, 0)), # folded head W
            pl.BlockSpec((1, 1), lambda i, k: (0, 0)),              # folded head bias
        ],
        out_specs=pl.BlockSpec((1, tm), lambda i, k: (0, i)),
        scratch_shapes=[pltpu.VMEM((tm, hidden_dim), jnp.float32)],
        compiler_params=cp_rk,
    )

    def fwd(x_pad, adj, inv_deg, w):
        feat = cnn(x_pad, w["m1"], w["b1t"], w["m2"], w["b2t"], w["pool"])
        s1 = sage1(adj, feat, inv_deg, w["w1s"], w["bs1"])
        return sage2(adj, s1, inv_deg, w["w2h_row"], w["c2h"])

    return jax.jit(fwd)


def hybrid_forward(x, edge_index, params, hidden_dim=64,
                   compute_dtype=jnp.bfloat16, max_tk=2048,
                   graph=None, prepped=None):
    n, f = x.shape
    npad, tm, tk = _sage_tiles(n, max_tk)
    if graph is None:                       # hoistable: build once per graph
        graph = build_graph(edge_index, n, npad)
    adj, inv_deg = graph
    if prepped is None:                     # hoistable: prep once per params/dtype
        prepped = prepare_weights(params, f, compute_dtype)
    x_pad = jnp.pad(x.astype(jnp.float32),
                    ((0, npad - n), (0, 0))).astype(compute_dtype)
    fwd = _build_forward(npad, f, hidden_dim, tm, tk, compute_dtype)
    out = fwd(x_pad, adj, inv_deg, prepped)
    return out[0, :n]


# ---------------------------------------------------------------------------
# Pure-JAX reference (independent formulation: lax.conv + unfused SAGE math)
# ---------------------------------------------------------------------------
def hybrid_reference(x, edge_index, p):
    hp = jax.lax.Precision.HIGHEST
    n = x.shape[0]
    dn = ("NCH", "OIH", "NCH")
    h = x[:, None, :].astype(jnp.float32)
    h = jax.lax.conv_general_dilated(h, p["w1"], (1,), ((1, 1),),
                                     dimension_numbers=dn, precision=hp)
    h = jnp.maximum(h + p["b1"][None, :, None], 0.0)
    h = jax.lax.conv_general_dilated(h, p["w2"], (1,), ((1, 1),),
                                     dimension_numbers=dn, precision=hp)
    h = jnp.maximum(h + p["b2"][None, :, None], 0.0)
    feat = jnp.mean(h, axis=2)                                   # [n, 32]

    src, dst = edge_index[0], edge_index[1]
    a = jnp.zeros((n, n), jnp.float32).at[dst, src].add(1.0)
    a = a / jnp.maximum(jnp.sum(a, axis=1, keepdims=True), 1.0)

    dot = lambda u, v: jnp.dot(u, v, precision=hp)
    s1 = jnp.maximum(dot(dot(a, feat), p["wl1"]) + p["bl1"][None, :]
                     + dot(feat, p["wr1"]), 0.0)
    s2 = dot(dot(a, s1), p["wl2"]) + p["bl2"][None, :] + dot(s1, p["wr2"])
    return (dot(s2, p["wh"]) + p["bh"][None, :])[:, 0]


if __name__ == "__main__":
    num_nodes = 200          # pads to 256 -> 2 row tiles on the parallel axis
    num_edges = 600
    feature_dim = 8
    hidden_dim = 64

    key = jax.random.PRNGKey(0)
    k_x, k_e, k_p = jax.random.split(key, 3)
    x = jax.random.normal(k_x, (num_nodes, feature_dim), jnp.float32)
    edge_index = jax.random.randint(k_e, (2, num_edges), 0, num_nodes,
                                    dtype=jnp.int32)
    params = make_params(k_p, hidden_dim=hidden_dim)

    ref = np.asarray(hybrid_reference(x, edge_index, params))

    # Graph prep done once and reused across all forward calls below.
    npad, _, _ = _sage_tiles(num_nodes)
    graph = build_graph(edge_index, num_nodes, npad)

    # Strict logic check in f32 with the widest adjacency tile (grid_k == 1).
    out_f32 = hybrid_forward(x, edge_index, params, hidden_dim=hidden_dim,
                             compute_dtype=jnp.float32, graph=graph)
    out_f32 = np.asarray(jax.block_until_ready(out_f32))
    assert out_f32.shape == (num_nodes,)
    assert np.allclose(out_f32, ref, rtol=1e-2, atol=1e-2)

    # Strict logic check with a narrow adjacency tile so the multi-step
    # k-reduction accumulator path (grid_k > 1) is exercised on hardware.
    out_f32_k = hybrid_forward(x, edge_index, params, hidden_dim=hidden_dim,
                               compute_dtype=jnp.float32, max_tk=128, graph=graph)
    out_f32_k = np.asarray(jax.block_until_ready(out_f32_k))
    assert np.allclose(out_f32_k, ref, rtol=1e-2, atol=1e-2)

    # bf16 MXU perf path (int8 adj + f32 inv-deg epilogue): relative-L2 check.
    prepped_bf16 = prepare_weights(params, feature_dim, jnp.bfloat16)
    out_bf16 = hybrid_forward(x, edge_index, params, hidden_dim=hidden_dim,
                              compute_dtype=jnp.bfloat16, graph=graph,
                              prepped=prepped_bf16)
    out_bf16 = np.asarray(jax.block_until_ready(out_bf16))
    rel = np.linalg.norm(out_bf16 - ref) / (np.linalg.norm(ref) + 1e-6)
    assert np.isfinite(out_bf16).all() and rel < 0.1

    print("KERNEL_OK")
</pallas_src>

<mosaic_0001>
module attributes {stable_mosaic.version = 11 : i64} {
  func.func @cnn_kernel(%arg0: i32, %arg1: memref<128x8xf32, #tpu.memory_space<vmem>>, %arg2: memref<8x128xf32, #tpu.memory_space<vmem>>, %arg3: memref<1x128xf32, #tpu.memory_space<vmem>>, %arg4: memref<128x256xf32, #tpu.memory_space<vmem>>, %arg5: memref<1x256xf32, #tpu.memory_space<vmem>>, %arg6: memref<256x32xf32, #tpu.memory_space<vmem>>, %arg7: memref<128x32xf32, #tpu.memory_space<vmem>>) attributes {dimension_semantics = [#tpu.dimension_semantics<parallel>], iteration_bounds = array<i64: 2>, scalar_prefetch = 0 : i64, scratch_operands = 0 : i64, tpu.core_type = #tpu.core_type<tc>, window_params = [{transform_indices = @transform_0, window_bounds = array<i64: 128, 8>}, {pipeline_mode = #tpu.pipeline_mode<synchronous>, transform_indices = @transform_1, window_bounds = array<i64: 8, 128>}, {pipeline_mode = #tpu.pipeline_mode<synchronous>, transform_indices = @transform_2, window_bounds = array<i64: 1, 128>}, {pipeline_mode = #tpu.pipeline_mode<synchronous>, transform_indices = @transform_3, window_bounds = array<i64: 128, 256>}, {pipeline_mode = #tpu.pipeline_mode<synchronous>, transform_indices = @transform_4, window_bounds = array<i64: 1, 256>}, {pipeline_mode = #tpu.pipeline_mode<synchronous>, transform_indices = @transform_5, window_bounds = array<i64: 256, 32>}, {transform_indices = @transform_6, window_bounds = array<i64: 128, 32>}]} {
    %c0 = arith.constant 0 : index
    %c0_0 = arith.constant 0 : index
    %0 = vector.load %arg1[%c0, %c0_0] : memref<128x8xf32, #tpu.memory_space<vmem>>, vector<128x8xf32>
    %c0_1 = arith.constant 0 : index
    %c0_2 = arith.constant 0 : index
    %1 = vector.load %arg2[%c0_1, %c0_2] : memref<8x128xf32, #tpu.memory_space<vmem>>, vector<8x128xf32>
    %cst = arith.constant dense<0.000000e+00> : vector<128x128xf32>
    %2 = tpu.matmul %0, %1, %cst {dimension_numbers = #tpu.dot_dimension_numbers<[1], [0], [0], [1], [0, 0, 1, 1], [], []>} : vector<128x8xf32>, vector<8x128xf32>, vector<128x128xf32> -> vector<128x128xf32>
    %c0_3 = arith.constant 0 : index
    %c0_4 = arith.constant 0 : index
    %3 = vector.load %arg3[%c0_3, %c0_4] : memref<1x128xf32, #tpu.memory_space<vmem>>, vector<1x128xf32>
    %4 = vector.broadcast %3 : vector<1x128xf32> to vector<128x128xf32>
    %5 = arith.addf %2, %4 : vector<128x128xf32>
    %cst_5 = arith.constant 0.000000e+00 : f32
    %6 = vector.broadcast %cst_5 : f32 to vector<128x128xf32>
    %7 = arith.maximumf %5, %6 : vector<128x128xf32>
    %c0_6 = arith.constant 0 : index
    %c0_7 = arith.constant 0 : index
    %8 = vector.load %arg4[%c0_6, %c0_7] : memref<128x256xf32, #tpu.memory_space<vmem>>, vector<128x256xf32>
    %cst_8 = arith.constant dense<0.000000e+00> : vector<128x256xf32>
    %9 = tpu.matmul %7, %8, %cst_8 {dimension_numbers = #tpu.dot_dimension_numbers<[1], [0], [0], [1], [0, 0, 1, 1], [], []>} : vector<128x128xf32>, vector<128x256xf32>, vector<128x256xf32> -> vector<128x256xf32>
    %c0_9 = arith.constant 0 : index
    %c0_10 = arith.constant 0 : index
    %10 = vector.load %arg5[%c0_9, %c0_10] : memref<1x256xf32, #tpu.memory_space<vmem>>, vector<1x256xf32>
    %11 = vector.broadcast %10 : vector<1x256xf32> to vector<128x256xf32>
    %12 = arith.addf %9, %11 : vector<128x256xf32>
    %cst_11 = arith.constant 0.000000e+00 : f32
    %13 = vector.broadcast %cst_11 : f32 to vector<128x256xf32>
    %14 = arith.maximumf %12, %13 : vector<128x256xf32>
    %c0_12 = arith.constant 0 : index
    %c0_13 = arith.constant 0 : index
    %15 = vector.load %arg6[%c0_12, %c0_13] : memref<256x32xf32, #tpu.memory_space<vmem>>, vector<256x32xf32>
    %cst_14 = arith.constant dense<0.000000e+00> : vector<128x32xf32>
    %16 = tpu.matmul %14, %15, %cst_14 {dimension_numbers = #tpu.dot_dimension_numbers<[1], [0], [0], [1], [0, 0, 1, 1], [], []>} : vector<128x256xf32>, vector<256x32xf32>, vector<128x32xf32> -> vector<128x32xf32>
    %cst_15 = arith.constant 1.250000e-01 : f32
    %17 = vector.broadcast %cst_15 : f32 to vector<128x32xf32>
    %18 = arith.mulf %16, %17 : vector<128x32xf32>
    %c0_16 = arith.constant 0 : index
    %c0_17 = arith.constant 0 : index
    %19 = vector.load %arg7[%c0_16, %c0_17] : memref<128x32xf32, #tpu.memory_space<vmem>>, vector<128x32xf32>
    tpu.vector_store %arg7[%c0_16, %c0_17], %18 {strides = array<i32>} : memref<128x32xf32, #tpu.memory_space<vmem>>, vector<128x32xf32>,
    return
  }
  func.func @transform_0(%arg0: i32) -> (i32, i32) {
    %c0_i32 = arith.constant 0 : i32
    %c0_i32_0 = arith.constant 0 : i32
    return %arg0, %c0_i32 : i32, i32
  }
  func.func @transform_1(%arg0: i32) -> (i32, i32) {
    %c0_i32 = arith.constant 0 : i32
    %c0_i32_0 = arith.constant 0 : i32
    %c0_i32_1 = arith.constant 0 : i32
    return %c0_i32, %c0_i32_0 : i32, i32
  }
  func.func @transform_2(%arg0: i32) -> (i32, i32) {
    %c0_i32 = arith.constant 0 : i32
    %c0_i32_0 = arith.constant 0 : i32
    %c0_i32_1 = arith.constant 0 : i32
    return %c0_i32, %c0_i32_0 : i32, i32
  }
  func.func @transform_3(%arg0: i32) -> (i32, i32) {
    %c0_i32 = arith.constant 0 : i32
    %c0_i32_0 = arith.constant 0 : i32
    %c0_i32_1 = arith.constant 0 : i32
    return %c0_i32, %c0_i32_0 : i32, i32
  }
  func.func @transform_4(%arg0: i32) -> (i32, i32) {
    %c0_i32 = arith.constant 0 : i32
    %c0_i32_0 = arith.constant 0 : i32
    %c0_i32_1 = arith.constant 0 : i32
    return %c0_i32, %c0_i32_0 : i32, i32
  }
  func.func @transform_5(%arg0: i32) -> (i32, i32) {
    %c0_i32 = arith.constant 0 : i32
    %c0_i32_0 = arith.constant 0 : i32
    %c0_i32_1 = arith.constant 0 : i32
    return %c0_i32, %c0_i32_0 : i32, i32
  }
  func.func @transform_6(%arg0: i32) -> (i32, i32) {
    %c0_i32 = arith.constant 0 : i32
    %c0_i32_0 = arith.constant 0 : i32
    return %arg0, %c0_i32 : i32, i32
  }
}

module attributes {stable_mosaic.version = 11 : i64} {
  func.func @sage1_kernel(%arg0: i32, %arg1: i32, %arg2: memref<128x256xi8, #tpu.memory_space<vmem>>, %arg3: memref<256x32xf32, #tpu.memory_space<vmem>>, %arg4: memref<128x1xf32, #tpu.memory_space<vmem>>, %arg5: memref<64x64xf32, #tpu.memory_space<vmem>>, %arg6: memref<1x64xf32, #tpu.memory_space<vmem>>, %arg7: memref<128x64xf32, #tpu.memory_space<vmem>>, %arg8: memref<128x32xf32, #tpu.memory_space<vmem>>) attributes {dimension_semantics = [#tpu.dimension_semantics<parallel>, #tpu.dimension_semantics<arbitrary>], iteration_bounds = array<i64: 2, 1>, scalar_prefetch = 0 : i64, scratch_operands = 1 : i64, tpu.core_type = #tpu.core_type<tc>, window_params = [{transform_indices = @transform_0, window_bounds = array<i64: 128, 256>}, {pipeline_mode = #tpu.pipeline_mode<synchronous>, transform_indices = @transform_1, window_bounds = array<i64: 256, 32>}, {transform_indices = @transform_2, window_bounds = array<i64: 128, 1>}, {pipeline_mode = #tpu.pipeline_mode<synchronous>, transform_indices = @transform_3, window_bounds = array<i64: 64, 64>}, {pipeline_mode = #tpu.pipeline_mode<synchronous>, transform_indices = @transform_4, window_bounds = array<i64: 1, 64>}, {transform_indices = @transform_5, window_bounds = array<i64: 128, 64>}]} {
    %c0_i32 = arith.constant 0 : i32
    %0 = arith.cmpi eq, %arg1, %c0_i32 : i32
    %1 = arith.extui %0 : i1 to i32
    %c0_i32_0 = arith.constant 0 : i32
    %2 = arith.cmpi ne, %1, %c0_i32_0 : i32
    scf.if %2 {
      %cst_9 = arith.constant 0.000000e+00 : f32
      %16 = vector.broadcast %cst_9 : f32 to vector<128x32xf32>
      %c0_10 = arith.constant 0 : index
      %c0_11 = arith.constant 0 : index
      %17 = vector.load %arg8[%c0_10, %c0_11] : memref<128x32xf32, #tpu.memory_space<vmem>>, vector<128x32xf32>
      tpu.vector_store %arg8[%c0_10, %c0_11], %16 {strides = array<i32>} : memref<128x32xf32, #tpu.memory_space<vmem>>, vector<128x32xf32>,
    } else {
    }
    %c0 = arith.constant 0 : index
    %c0_1 = arith.constant 0 : index
    %3 = vector.load %arg2[%c0, %c0_1] : memref<128x256xi8, #tpu.memory_space<vmem>>, vector<128x256xi8>
    %4 = arith.sitofp %3 : vector<128x256xi8> to vector<128x256xf32>
    %c256_i32 = arith.constant 256 : i32
    %5 = arith.muli %arg1, %c256_i32 : i32
    %6 = tpu.assume_multiple %5, 256 : i32
    %7 = arith.index_cast %6 : i32 to index
    %c0_2 = arith.constant 0 : index
    %8 = vector.load %arg3[%7, %c0_2] : memref<256x32xf32, #tpu.memory_space<vmem>>, vector<256x32xf32>
    %c0_3 = arith.constant 0 : index
    %c0_4 = arith.constant 0 : index
    %9 = vector.load %arg8[%c0_3, %c0_4] : memref<128x32xf32, #tpu.memory_space<vmem>>, vector<128x32xf32>
    %cst = arith.constant dense<0.000000e+00> : vector<128x32xf32>
    %10 = tpu.matmul %4, %8, %cst {dimension_numbers = #tpu.dot_dimension_numbers<[1], [0], [0], [1], [0, 0, 1, 1], [], []>} : vector<128x256xf32>, vector<256x32xf32>, vector<128x32xf32> -> vector<128x32xf32>
    %11 = arith.addf %9, %10 : vector<128x32xf32>
    %c0_5 = arith.constant 0 : index
    %c0_6 = arith.constant 0 : index
    %12 = vector.load %arg8[%c0_5, %c0_6] : memref<128x32xf32, #tpu.memory_space<vmem>>, vector<128x32xf32>
    tpu.vector_store %arg8[%c0_5, %c0_6], %11 {strides = array<i32>} : memref<128x32xf32, #tpu.memory_space<vmem>>, vector<128x32xf32>,
    %c0_i32_7 = arith.constant 0 : i32
    %13 = arith.cmpi eq, %arg1, %c0_i32_7 : i32
    %14 = arith.extui %13 : i1 to i32
    %c0_i32_8 = arith.constant 0 : i32
    %15 = arith.cmpi ne, %14, %c0_i32_8 : i32
    scf.if %15 {
      %c0_9 = arith.constant 0 : index
      %c0_10 = arith.constant 0 : index
      %16 = vector.load %arg8[%c0_9, %c0_10] : memref<128x32xf32, #tpu.memory_space<vmem>>, vector<128x32xf32>
      %c0_11 = arith.constant 0 : index
      %c0_12 = arith.constant 0 : index
      %17 = vector.load %arg4[%c0_11, %c0_12] : memref<128x1xf32, #tpu.memory_space<vmem>>, vector<128x1xf32>
      %18 = vector.broadcast %17 : vector<128x1xf32> to vector<128x32xf32>
      %19 = arith.mulf %16, %18 : vector<128x32xf32>
      %c128_i32 = arith.constant 128 : i32
      %20 = arith.muli %arg0, %c128_i32 : i32
      %21 = tpu.assume_multiple %20, 128 : i32
      %22 = arith.index_cast %21 : i32 to index
      %c0_13 = arith.constant 0 : index
      %23 = vector.load %arg3[%22, %c0_13] : memref<256x32xf32, #tpu.memory_space<vmem>>, vector<128x32xf32>
      %24 = tpu.concatenate %19, %23 in 1 : vector<128x32xf32>, vector<128x32xf32> -> vector<128x64xf32>
      %c0_14 = arith.constant 0 : index
      %c0_15 = arith.constant 0 : index
      %25 = vector.load %arg5[%c0_14, %c0_15] : memref<64x64xf32, #tpu.memory_space<vmem>>, vector<64x64xf32>
      %cst_16 = arith.constant dense<0.000000e+00> : vector<128x64xf32>
      %26 = tpu.matmul %24, %25, %cst_16 {dimension_numbers = #tpu.dot_dimension_numbers<[1], [0], [0], [1], [0, 0, 1, 1], [], []>} : vector<128x64xf32>, vector<64x64xf32>, vector<128x64xf32> -> vector<128x64xf32>
      %c0_17 = arith.constant 0 : index
      %c0_18 = arith.constant 0 : index
      %27 = vector.load %arg6[%c0_17, %c0_18] : memref<1x64xf32, #tpu.memory_space<vmem>>, vector<1x64xf32>
      %28 = vector.broadcast %27 : vector<1x64xf32> to vector<128x64xf32>
      %29 = arith.addf %26, %28 : vector<128x64xf32>
      %cst_19 = arith.constant 0.000000e+00 : f32
      %30 = vector.broadcast %cst_19 : f32 to vector<128x64xf32>
      %31 = arith.maximumf %29, %30 : vector<128x64xf32>
      %c0_20 = arith.constant 0 : index
      %c0_21 = arith.constant 0 : index
      %32 = vector.load %arg7[%c0_20, %c0_21] : memref<128x64xf32, #tpu.memory_space<vmem>>, vector<128x64xf32>
      tpu.vector_store %arg7[%c0_20, %c0_21], %31 {strides = array<i32>} : memref<128x64xf32, #tpu.memory_space<vmem>>, vector<128x64xf32>,
    } else {
    }
    return
  }
  func.func @transform_0(%arg0: i32, %arg1: i32) -> (i32, i32) {
    %c0_i32 = arith.constant 0 : i32
    return %arg0, %arg1 : i32, i32
  }
  func.func @transform_1(%arg0: i32, %arg1: i32) -> (i32, i32) {
    %c0_i32 = arith.constant 0 : i32
    %c0_i32_0 = arith.constant 0 : i32
    %c0_i32_1 = arith.constant 0 : i32
    return %c0_i32, %c0_i32_0 : i32, i32
  }
  func.func @transform_2(%arg0: i32, %arg1: i32) -> (i32, i32) {
    %c0_i32 = arith.constant 0 : i32
    %c0_i32_0 = arith.constant 0 : i32
    return %arg0, %c0_i32 : i32, i32
  }
  func.func @transform_3(%arg0: i32, %arg1: i32) -> (i32, i32) {
    %c0_i32 = arith.constant 0 : i32
    %c0_i32_0 = arith.constant 0 : i32
    %c0_i32_1 = arith.constant 0 : i32
    return %c0_i32, %c0_i32_0 : i32, i32
  }
  func.func @transform_4(%arg0: i32, %arg1: i32) -> (i32, i32) {
    %c0_i32 = arith.constant 0 : i32
    %c0_i32_0 = arith.constant 0 : i32
    %c0_i32_1 = arith.constant 0 : i32
    return %c0_i32, %c0_i32_0 : i32, i32
  }
  func.func @transform_5(%arg0: i32, %arg1: i32) -> (i32, i32) {
    %c0_i32 = arith.constant 0 : i32
    %c0_i32_0 = arith.constant 0 : i32
    return %arg0, %c0_i32 : i32, i32
  }
}

module attributes {stable_mosaic.version = 11 : i64} {
  func.func @sage2_head_kernel(%arg0: i32, %arg1: i32, %arg2: memref<128x256xi8, #tpu.memory_space<vmem>>, %arg3: memref<256x64xf32, #tpu.memory_space<vmem>>, %arg4: memref<128x1xf32, #tpu.memory_space<vmem>>, %arg5: memref<1x128xf32, #tpu.memory_space<vmem>>, %arg6: memref<1x1xf32, #tpu.memory_space<vmem>>, %arg7: memref<1x128xf32, #tpu.memory_space<vmem>>, %arg8: memref<128x64xf32, #tpu.memory_space<vmem>>) attributes {dimension_semantics = [#tpu.dimension_semantics<parallel>, #tpu.dimension_semantics<arbitrary>], iteration_bounds = array<i64: 2, 1>, scalar_prefetch = 0 : i64, scratch_operands = 1 : i64, tpu.core_type = #tpu.core_type<tc>, window_params = [{transform_indices = @transform_0, window_bounds = array<i64: 128, 256>}, {pipeline_mode = #tpu.pipeline_mode<synchronous>, transform_indices = @transform_1, window_bounds = array<i64: 256, 64>}, {transform_indices = @transform_2, window_bounds = array<i64: 128, 1>}, {pipeline_mode = #tpu.pipeline_mode<synchronous>, transform_indices = @transform_3, window_bounds = array<i64: 1, 128>}, {pipeline_mode = #tpu.pipeline_mode<synchronous>, transform_indices = @transform_4, window_bounds = array<i64: 1, 1>}, {transform_indices = @transform_5, window_bounds = array<i64: 1, 128>}]} {
    %c0_i32 = arith.constant 0 : i32
    %0 = arith.cmpi eq, %arg1, %c0_i32 : i32
    %1 = arith.extui %0 : i1 to i32
    %c0_i32_0 = arith.constant 0 : i32
    %2 = arith.cmpi ne, %1, %c0_i32_0 : i32
    scf.if %2 {
      %cst_9 = arith.constant 0.000000e+00 : f32
      %16 = vector.broadcast %cst_9 : f32 to vector<128x64xf32>
      %c0_10 = arith.constant 0 : index
      %c0_11 = arith.constant 0 : index
      %17 = vector.load %arg8[%c0_10, %c0_11] : memref<128x64xf32, #tpu.memory_space<vmem>>, vector<128x64xf32>
      tpu.vector_store %arg8[%c0_10, %c0_11], %16 {strides = array<i32>} : memref<128x64xf32, #tpu.memory_space<vmem>>, vector<128x64xf32>,
    } else {
    }
    %c0 = arith.constant 0 : index
    %c0_1 = arith.constant 0 : index
    %3 = vector.load %arg2[%c0, %c0_1] : memref<128x256xi8, #tpu.memory_space<vmem>>, vector<128x256xi8>
    %4 = arith.sitofp %3 : vector<128x256xi8> to vector<128x256xf32>
    %c256_i32 = arith.constant 256 : i32
    %5 = arith.muli %arg1, %c256_i32 : i32
    %6 = tpu.assume_multiple %5, 256 : i32
    %7 = arith.index_cast %6 : i32 to index
    %c0_2 = arith.constant 0 : index
    %8 = vector.load %arg3[%7, %c0_2] : memref<256x64xf32, #tpu.memory_space<vmem>>, vector<256x64xf32>
    %c0_3 = arith.constant 0 : index
    %c0_4 = arith.constant 0 : index
    %9 = vector.load %arg8[%c0_3, %c0_4] : memref<128x64xf32, #tpu.memory_space<vmem>>, vector<128x64xf32>
    %cst = arith.constant dense<0.000000e+00> : vector<128x64xf32>
    %10 = tpu.matmul %4, %8, %cst {dimension_numbers = #tpu.dot_dimension_numbers<[1], [0], [0], [1], [0, 0, 1, 1], [], []>} : vector<128x256xf32>, vector<256x64xf32>, vector<128x64xf32> -> vector<128x64xf32>
    %11 = arith.addf %9, %10 : vector<128x64xf32>
    %c0_5 = arith.constant 0 : index
    %c0_6 = arith.constant 0 : index
    %12 = vector.load %arg8[%c0_5, %c0_6] : memref<128x64xf32, #tpu.memory_space<vmem>>, vector<128x64xf32>
    tpu.vector_store %arg8[%c0_5, %c0_6], %11 {strides = array<i32>} : memref<128x64xf32, #tpu.memory_space<vmem>>, vector<128x64xf32>,
    %c0_i32_7 = arith.constant 0 : i32
    %13 = arith.cmpi eq, %arg1, %c0_i32_7 : i32
    %14 = arith.extui %13 : i1 to i32
    %c0_i32_8 = arith.constant 0 : i32
    %15 = arith.cmpi ne, %14, %c0_i32_8 : i32
    scf.if %15 {
      %c0_9 = arith.constant 0 : index
      %c0_10 = arith.constant 0 : index
      %16 = vector.load %arg8[%c0_9, %c0_10] : memref<128x64xf32, #tpu.memory_space<vmem>>, vector<128x64xf32>
      %c0_11 = arith.constant 0 : index
      %c0_12 = arith.constant 0 : index
      %17 = vector.load %arg4[%c0_11, %c0_12] : memref<128x1xf32, #tpu.memory_space<vmem>>, vector<128x1xf32>
      %18 = vector.broadcast %17 : vector<128x1xf32> to vector<128x64xf32>
      %19 = arith.mulf %16, %18 : vector<128x64xf32>
      %c128_i32 = arith.constant 128 : i32
      %20 = arith.muli %arg0, %c128_i32 : i32
      %21 = tpu.assume_multiple %20, 128 : i32
      %22 = arith.index_cast %21 : i32 to index
      %c0_13 = arith.constant 0 : index
      %23 = vector.load %arg3[%22, %c0_13] : memref<256x64xf32, #tpu.memory_space<vmem>>, vector<128x64xf32>
      %24 = tpu.concatenate %19, %23 in 1 : vector<128x64xf32>, vector<128x64xf32> -> vector<128x128xf32>
      %c0_14 = arith.constant 0 : index
      %c0_15 = arith.constant 0 : index
      %25 = vector.load %arg5[%c0_14, %c0_15] : memref<1x128xf32, #tpu.memory_space<vmem>>, vector<1x128xf32>
      %26 = tpu.transpose %24, [1, 0] : vector<128x128xf32> -> vector<128x128xf32>
      %cst_16 = arith.constant dense<0.000000e+00> : vector<1x128xf32>
      %27 = tpu.matmul %25, %26, %cst_16 {dimension_numbers = #tpu.dot_dimension_numbers<[1], [0], [0], [1], [0, 0, 1, 1], [], []>} : vector<1x128xf32>, vector<128x128xf32>, vector<1x128xf32> -> vector<1x128xf32>
      %c0_17 = arith.constant 0 : index
      %c0_18 = arith.constant 0 : index
      %28 = vector.load %arg6[%c0_17, %c0_18] : memref<1x1xf32, #tpu.memory_space<vmem>>, vector<1x1xf32>
      %29 = vector.broadcast %28 : vector<1x1xf32> to vector<1x128xf32>
      %30 = arith.addf %27, %29 : vector<1x128xf32>
      %c0_19 = arith.constant 0 : index
      %c0_20 = arith.constant 0 : index
      %31 = vector.load %arg7[%c0_19, %c0_20] : memref<1x128xf32, #tpu.memory_space<vmem>>, vector<1x128xf32>
      tpu.vector_store %arg7[%c0_19, %c0_20], %30 {strides = array<i32>} : memref<1x128xf32, #tpu.memory_space<vmem>>, vector<1x128xf32>,
    } else {
    }
    return
  }
  func.func @transform_0(%arg0: i32, %arg1: i32) -> (i32, i32) {
    %c0_i32 = arith.constant 0 : i32
    return %arg0, %arg1 : i32, i32
  }
  func.func @transform_1(%arg0: i32, %arg1: i32) -> (i32, i32) {
    %c0_i32 = arith.constant 0 : i32
    %c0_i32_0 = arith.constant 0 : i32
    %c0_i32_1 = arith.constant 0 : i32
    return %c0_i32, %c0_i32_0 : i32, i32
  }
  func.func @transform_2(%arg0: i32, %arg1: i32) -> (i32, i32) {
    %c0_i32 = arith.constant 0 : i32
    %c0_i32_0 = arith.constant 0 : i32
    return %arg0, %c0_i32 : i32, i32
  }
  func.func @transform_3(%arg0: i32, %arg1: i32) -> (i32, i32) {
    %c0_i32 = arith.constant 0 : i32
    %c0_i32_0 = arith.constant 0 : i32
    %c0_i32_1 = arith.constant 0 : i32
    return %c0_i32, %c0_i32_0 : i32, i32
  }
  func.func @transform_4(%arg0: i32, %arg1: i32) -> (i32, i32) {
    %c0_i32 = arith.constant 0 : i32
    %c0_i32_0 = arith.constant 0 : i32
    %c0_i32_1 = arith.constant 0 : i32
    return %c0_i32, %c0_i32_0 : i32, i32
  }
  func.func @transform_5(%arg0: i32, %arg1: i32) -> (i32, i32) {
    %c0_i32 = arith.constant 0 : i32
    %c0_i32_0 = arith.constant 0 : i32
    return %c0_i32, %arg0 : i32, i32
  }
}

</mosaic_0001>

<bundles_post_ra>
// kernel: fwd.3
= control target key start
LH: loop header
LB: loop body
LE: loop exit
PB: predicated region body
PF: predicated region fallthrough
CT: control target
= control target key end

     0   :  { %s1260_s21 = smov 0   ;;  %s1623_s0 = inlined_call_operand.vmem [shape: f32[256,8], index: 0, kind: input, shape index: {}]   ;;  %s1624_s1 = inlined_call_operand.vmem [shape: f32[8,128], index: 1, kind: input, shape index: {}]   ;;  %s1625_s2 = inlined_call_operand.vmem [shape: f32[1,128], index: 2, kind: input, shape index: {}]   ;;  %s1626_s3 = inlined_call_operand.vmem [shape: f32[128,256], index: 3, kind: input, shape index: {}]   ;;  %s1627_s4 = inlined_call_operand.vmem [shape: f32[1,256], index: 4, kind: input, shape index: {}]   ;;  %s1628_s5 = inlined_call_operand.vmem [shape: f32[256,32], index: 5, kind: input, shape index: {}]   ;;  %s1629_s6 = inlined_call_operand.vmem [shape: f32[256,32], index: 6, kind: output, shape index: {}]  }
   0x1 LB: > { %s992_s22 = sadd.s32 4294967295, %s1222_s21   ;;  %p996_p0 = scmp.ge.s32.totalorder %s1222_s21, 1  ;;  %s1222_s21 = sphi %s1260_s21, %s16_s21  }
   0x2   : > { %p213_p1 = scmp.lt.s32.totalorder %s1222_s21, 3 }
   0x4   : > { %p214_p2 = pnand %p996_p0, %p213_p1 }
   0x5   : > { %v271_v0 = vld [vmem:[%s1624_s1] sm:$0xff] (!%p214_p2)  ;;  %s997_s25 = sshll.u32 (!%p214_p2), %s992_s22, 4  ;;  %v490_v1 = vld [vmem:[%s1626_s3 + $0x8] sm:$0xff] (!%p214_p2)  ;;  %v492_v2 = vld [vmem:[%s1626_s3 + $0x18] sm:$0xff] (!%p214_p2)  ;;  %vm279_vm0 = vcmask (!%p214_p2), 64512   ;;  %vm919_vm1 = vcmask (!%p214_p2), 261120  }
   0x6   : > { %217 = sbr.rel (%p214_p2) target bundleno = 731 (0x2db), region = 44  ;;  %1117 = vmatprep.subr.mxu0 (!%p214_p2), %v271_v0  ;;  %p244_p3 = scmp.lt.s32.totalorder (!%p214_p2), %s997_s25, 31  ;;  %v1143_v3 = vpack.c.bf16 (!%p214_p2), %v492_v2, %v490_v1  ;;  %v489_v4 = vld [vmem:[%s1626_s3] sm:$0xff] (!%p214_p2)  ;;  %v491_v5 = vld [vmem:[%s1626_s3 + $0x10] sm:$0xff] (!%p214_p2)  ;;  %v494_v6 = vld [vmem:[%s1626_s3 + $0x28] sm:$0xff] (!%p214_p2)  ;;  %v1224_v1 = vmov (!%p214_p2), 0.0  }
   0x7   : > { %1118 = vmatpush3.msra.mxu0 (!%p214_p2), %v271_v0  ;;  %v1145_v7 = vpack.c.bf16 (!%p214_p2), %v491_v5, %v489_v4  ;;  %v496_v8 = vld [vmem:[%s1626_s3 + $0x38] sm:$0xff] (!%p214_p2)  ;;  %v493_v9 = vld [vmem:[%s1626_s3 + $0x20] sm:$0xff] (!%p214_p2)  ;;  %v495_v10 = vld [vmem:[%s1626_s3 + $0x30] sm:$0xff] (!%p214_p2)  ;;  %597 = vmatprep.mubr.f32.mxu1 (!%p214_p2), %v1224_v1 }
   0x8   : > { %1144 = vmatprep.subr.bf16.mxu1 (!%p214_p2), %v1143_v3  ;;  %v1147_v11 = vpack.c.bf16 (!%p214_p2), %v496_v8, %v494_v6  ;;  %v498_v12 = vld [vmem:[%s1626_s3 + $0x48] sm:$0xff] (!%p214_p2)  ;;  %v500_v13 = vld [vmem:[%s1626_s3 + $0x58] sm:$0xff] (!%p214_p2)  ;;  %v1149_v14 = vpack.c.bf16 (!%p214_p2), %v495_v10, %v493_v9  ;;  %v497_v16 = vld [vmem:[%s1626_s3 + $0x40] sm:$0xff] (!%p214_p2) }
   0x9   : > { %1146 = vmatpush1.bf16.msra.mxu1 (!%p214_p2), %v1145_v7  ;;  %v1151_v15 = vpack.c.bf16 (!%p214_p2), %v500_v13, %v498_v12  ;;  %v499_v17 = vld [vmem:[%s1626_s3 + $0x50] sm:$0xff] (!%p214_p2)  ;;  %v502_v18 = vld [vmem:[%s1626_s3 + $0x68] sm:$0xff] (!%p214_p2)  ;;  %v504_v19 = vld [vmem:[%s1626_s3 + $0x78] sm:$0xff] (!%p214_p2) }
   0xa   : > { %1148 = vmatprep.subr.bf16.mxu1 (!%p214_p2), %v1147_v11  ;;  %v1153_v23 = vpack.c.bf16 (!%p214_p2), %v499_v17, %v497_v16  ;;  %v1155_v24 = vpack.c.bf16 (!%p214_p2), %v504_v19, %v502_v18  ;;  %v501_v25 = vld [vmem:[%s1626_s3 + $0x60] sm:$0xff] (!%p214_p2)  ;;  %v503_v26 = vld [vmem:[%s1626_s3 + $0x70] sm:$0xff] (!%p214_p2)  ;;  %v506_v28 = vld [vmem:[%s1626_s3 + $0x88] sm:$0xff] (!%p214_p2) }
   0xb   : > { %v508_v29 = vld [vmem:[%s1626_s3 + $0x98] sm:$0xff] (!%p214_p2)  ;;  %v1157_v31 = vpack.c.bf16 (!%p214_p2), %v503_v26, %v501_v25  ;;  %v505_v33 = vld [vmem:[%s1626_s3 + $0x80] sm:$0xff] (!%p214_p2)  ;;  %v507_v34 = vld [vmem:[%s1626_s3 + $0x90] sm:$0xff] (!%p214_p2) }
   0xc   : > { %v1159_v32 = vpack.c.bf16 (!%p214_p2), %v508_v29, %v506_v28  ;;  %v510_v36 = vld [vmem:[%s1626_s3 + $0xa8] sm:$0xff] (!%p214_p2)  ;;  %v512_v37 = vld [vmem:[%s1626_s3 + $0xb8] sm:$0xff] (!%p214_p2)  ;;  %v1161_v39 = vpack.c.bf16 (!%p214_p2), %v507_v34, %v505_v33  ;;  %v509_v41 = vld [vmem:[%s1626_s3 + $0xa0] sm:$0xff] (!%p214_p2) }
   0xd   : > { %s1631_s25 = smov (!%p244_p3, %s997_s25), 31  ;;  %1150 = vmatpush1.bf16.msra.mxu1 %v1149_v14  ;;  %v1163_v40 = vpack.c.bf16 %v512_v37, %v510_v36  ;;  %v511_v42 = vld [vmem:[%s1626_s3 + $0xb0] sm:$0xff]  ;;  %v514_v44 = vld [vmem:[%s1626_s3 + $0xc8] sm:$0xff]  ;;  %v516_v45 = vld [vmem:[%s1626_s3 + $0xd8] sm:$0xff] }
   0xe   : > { %s998_s23 = sshll.u32 %s1631_s25, 3  ;;  %1152 = vmatprep.subr.bf16.mxu1 %v1151_v15  ;;  %v1165_v47 = vpack.c.bf16 %v511_v42, %v509_v41  ;;  %v1167_v48 = vpack.c.bf16 %v516_v45, %v514_v44  ;;  %v513_v49 = vld [vmem:[%s1626_s3 + $0xc0] sm:$0xff]  ;;  %v515_v50 = vld [vmem:[%s1626_s3 + $0xd0] sm:$0xff]  ;;  %v518_v59 = vld [vmem:[%s1626_s3 + $0xe8] sm:$0xff] }
   0xf   : > { %s1315_s7 = scalar_lea.vmem %s1623_s0, %s998_s23  ;;  %v1169_v53 = vpack.c.bf16 %v515_v50, %v513_v49  ;;  %v520_v60 = vld [vmem:[%s1626_s3 + $0xf8] sm:$0xff]  ;;  %v517_v62 = vld [vmem:[%s1626_s3 + $0xe0] sm:$0xff]  ;;  %v519_v63 = vld [vmem:[%s1626_s3 + $0xf0] sm:$0xff]  ;;  %s1586_s14 = scalar_lea.vmem %s1629_s6, %s998_s23 }
  0x10   : > { %v255_v20 = vld [vmem:[%s1315_s7] sm:$0xff]  ;;  %v256_v21 = vld [vmem:[%s1315_s7 + $0x8] sm:$0xff]  ;;  %v257_v22 = vld [vmem:[%s1315_s7 + $0x10] sm:$0xff]  ;;  %v1171_v61 = vpack.c.bf16 %v520_v60, %v518_v59  ;;  %v1173_v0 = vpack.c.bf16 %v519_v63, %v517_v62 }
  0x11   : > { %1119 = vmatprep.mubr.msk.f32.mxu0 %vm279_vm0, %v255_v20  ;;  %v258_v27 = vld [vmem:[%s1315_s7 + $0x18] sm:$0xff]  ;;  %v259_v30 = vld [vmem:[%s1315_s7 + $0x20] sm:$0xff]  ;;  %1154 = vmatpush1.bf16.msra.mxu1 %v1153_v23  ;;  %v260_v35 = vld [vmem:[%s1315_s7 + $0x28] sm:$0xff] }
  0x12   : > { %1120 = vmatmul.mubr.msk.f32.vlgmr.msra.gmra.mrb[0].mxu0 %vm279_vm0, %v256_v21  ;;  %1156 = vmatprep.subr.bf16.mxu1 %v1155_v24  ;;  %v261_v38 = vld [vmem:[%s1315_s7 + $0x30] sm:$0xff]  ;;  %v262_v43 = vld [vmem:[%s1315_s7 + $0x38] sm:$0xff]  ;;  %v263_v46 = vld [vmem:[%s1315_s7 + $0x40] sm:$0xff] }
  0x13   : > { %1122 = vmatprep.mubr.msk.f32.mxu0 %vm279_vm0, %v257_v22  ;;  %v264_v51 = vld [vmem:[%s1315_s7 + $0x48] sm:$0xff]  ;;  %v265_v52 = vld [vmem:[%s1315_s7 + $0x50] sm:$0xff]  ;;  %v266_v54 = vld [vmem:[%s1315_s7 + $0x58] sm:$0xff] }
  0x14   : > { %v267_v55 = vld [vmem:[%s1315_s7 + $0x60] sm:$0xff]  ;;  %v268_v56 = vld [vmem:[%s1315_s7 + $0x68] sm:$0xff]  ;;  %v269_v57 = vld [vmem:[%s1315_s7 + $0x70] sm:$0xff] }
  0x15   : > { %1158 = vmatpush1.bf16.msra.mxu1 %v1157_v31  ;;  %v270_v58 = vld [vmem:[%s1315_s7 + $0x78] sm:$0xff]  ;;  %v742_v2 = vld [vmem:[%s1628_s5 + $0x80] sm:$0xff]  ;;  %v743_v3 = vld [vmem:[%s1628_s5 + $0x88] sm:$0xff] }
  0x16   : > { %1123 = vmatmul.mubr.msk.f32.gmra.mrb[2].mxu0 %vm279_vm0, %v258_v27  ;;  %1160 = vmatprep.subr.bf16.mxu1 %v1159_v32  ;;  %v726_v4 = vld [vmem:[%s1628_s5] sm:$0xff]  ;;  %v1175_v5 = vpack.c.bf16 %v743_v3, %v742_v2  ;;  %v727_v6 = vld [vmem:[%s1628_s5 + $0x8] sm:$0xff]  ;;  %v744_v7 = vld [vmem:[%s1628_s5 + $0x90] sm:$0xff] }
  0x17   : > { %1125 = vmatprep.mubr.msk.f32.mxu0 %vm279_vm0, %v259_v30  ;;  %v745_v8 = vld [vmem:[%s1628_s5 + $0x98] sm:$0xff]  ;;  %v1177_v9 = vpack.c.bf16 %v727_v6, %v726_v4  ;;  %v728_v11 = vld [vmem:[%s1628_s5 + $0x10] sm:$0xff]  ;;  %v746_v13 = vld [vmem:[%s1628_s5 + $0xa0] sm:$0xff] }
  0x18   : > { %v1179_v10 = vpack.c.bf16 %v745_v8, %v744_v7  ;;  %v729_v12 = vld [vmem:[%s1628_s5 + $0x18] sm:$0xff]  ;;  %1176 = vmatprep.subr.bf16.mxu0 %v1175_v5  ;;  %v747_v14 = vld [vmem:[%s1628_s5 + $0xa8] sm:$0xff]  ;;  %v730_v17 = vld [vmem:[%s1628_s5 + $0x20] sm:$0xff] }
  0x19   : > { %1162 = vmatpush1.bf16.msra.mxu1 %v1161_v39  ;;  %1178 = vmatpush3.bf16.msra.mxu0 %v1177_v9  ;;  %v1181_v15 = vpack.c.bf16 %v729_v12, %v728_v11  ;;  %v1183_v16 = vpack.c.bf16 %v747_v14, %v746_v13  ;;  %v731_v18 = vld [vmem:[%s1628_s5 + $0x28] sm:$0xff]  ;;  %v748_v19 = vld [vmem:[%s1628_s5 + $0xb0] sm:$0xff]  ;;  %v749_v20 = vld [vmem:[%s1628_s5 + $0xb8] sm:$0xff] }
  0x1a   : > { %1126 = vmatmul.mubr.msk.f32.gmra.mrb[4].mxu0 %vm279_vm0, %v260_v35  ;;  %1164 = vmatprep.subr.bf16.mxu1 %v1163_v40  ;;  %v1185_v21 = vpack.c.bf16 %v731_v18, %v730_v17  ;;  %v1187_v22 = vpack.c.bf16 %v749_v20, %v748_v19  ;;  %v732_v23 = vld [vmem:[%s1628_s5 + $0x30] sm:$0xff]  ;;  %v733_v24 = vld [vmem:[%s1628_s5 + $0x38] sm:$0xff]  ;;  %v750_v25 = vld [vmem:[%s1628_s5 + $0xc0] sm:$0xff] }
  0x1b   : > { %1128 = vmatprep.mubr.msk.f32.mxu0 %vm279_vm0, %v261_v38  ;;  %1180 = vmatprep.subr.bf16.mxu0 %v1179_v10  ;;  %v751_v26 = vld [vmem:[%s1628_s5 + $0xc8] sm:$0xff]  ;;  %v1189_v27 = vpack.c.bf16 %v733_v24, %v732_v23  ;;  %v734_v29 = vld [vmem:[%s1628_s5 + $0x40] sm:$0xff]  ;;  %v752_v31 = vld [vmem:[%s1628_s5 + $0xd0] sm:$0xff] }
  0x1c   : > { %v1191_v28 = vpack.c.bf16 %v751_v26, %v750_v25  ;;  %v735_v30 = vld [vmem:[%s1628_s5 + $0x48] sm:$0xff]  ;;  %v753_v32 = vld [vmem:[%s1628_s5 + $0xd8] sm:$0xff]  ;;  %v736_v35 = vld [vmem:[%s1628_s5 + $0x50] sm:$0xff] }
  0x1d   : > { %1166 = vmatpush1.bf16.msra.mxu1 %v1165_v47  ;;  %1182 = vmatpush3.bf16.msra.mxu0 %v1181_v15  ;;  %v1193_v33 = vpack.c.bf16 %v735_v30, %v734_v29  ;;  %v1195_v34 = vpack.c.bf16 %v753_v32, %v752_v31  ;;  %v737_v36 = vld [vmem:[%s1628_s5 + $0x58] sm:$0xff]  ;;  %v754_v37 = vld [vmem:[%s1628_s5 + $0xe0] sm:$0xff]  ;;  %v755_v38 = vld [vmem:[%s1628_s5 + $0xe8] sm:$0xff] }
  0x1e   : > { %1129 = vmatmul.mubr.msk.f32.gmra.mrb[6].mxu0 %vm279_vm0, %v262_v43  ;;  %1168 = vmatprep.subr.bf16.mxu1 %v1167_v48  ;;  %v1197_v39 = vpack.c.bf16 %v737_v36, %v736_v35  ;;  %v1199_v40 = vpack.c.bf16 %v755_v38, %v754_v37  ;;  %v738_v41 = vld [vmem:[%s1628_s5 + $0x60] sm:$0xff]  ;;  %v739_v42 = vld [vmem:[%s1628_s5 + $0x68] sm:$0xff]  ;;  %v756_v30 = vld [vmem:[%s1628_s5 + $0xf0] sm:$0xff]  ;;  %v523_v35 = vlaneseq }
  0x1f   : > { %1131 = vmatprep.mubr.msk.f32.mxu0 %vm279_vm0, %v263_v46  ;;  %1184 = vmatprep.subr.bf16.mxu0 %v1183_v16  ;;  %v1201_v43 = vpack.c.bf16 %v739_v42, %v738_v41  ;;  %v1497_v44 = vld [vmem:[%s1625_s2] ss:$0 sm:$0xff]  ;;  %v757_v31 = vld [vmem:[%s1628_s5 + $0xf8] sm:$0xff] }
  0x20   : > { %v1203_v32 = vpack.c.bf16 %v757_v31, %v756_v30  ;;  %v524_v36 = vshrl.u32 %v523_v35, 7  ;;  %v521_v38 = vld [vmem:[%s1627_s4] sm:$0x3] }
  0x21   : > { %1170 = vmatpush1.bf16.msra.mxu1 %v1169_v53  ;;  %1186 = vmatpush3.bf16.msra.mxu0 %v1185_v21 }
  0x22   : > { %1132 = vmatmul.mubr.msk.f32.gmra.mrb[8].mxu0 %vm279_vm0, %v264_v51  ;;  %1172 = vmatprep.subr.bf16.mxu1 %v1171_v61  ;;  %v525_v37 = vsub.s32 0, %v524_v36 }
  0x23   : > { %1134 = vmatprep.mubr.msk.f32.mxu0 %vm279_vm0, %v265_v52  ;;  %1188 = vmatprep.subr.bf16.mxu0 %v1187_v22 }
  0x25   : > { %1174 = vmatpush1.bf16.msra.mxu1 %v1173_v0  ;;  %1190 = vmatpush3.bf16.msra.mxu0 %v1189_v27 }
  0x26   : > { %1135 = vmatmul.mubr.msk.f32.gmra.mrb[10].mxu0 %vm279_vm0, %v266_v54  ;;  %1192 = vmatprep.subr.bf16.mxu0 %v1191_v28 }
  0x27   : > { %1137 = vmatprep.mubr.msk.f32.mxu0 %vm279_vm0, %v267_v55 }
  0x29   : > { %1194 = vmatpush3.bf16.msra.mxu0 %v1193_v33  ;;  %v740_v33 = vld [vmem:[%s1628_s5 + $0x70] sm:$0xff] }
  0x2a   : > { %1138 = vmatmul.mubr.msk.f32.gmra.mrb[12].mxu0 %vm279_vm0, %v268_v56  ;;  %1196 = vmatprep.subr.bf16.mxu0 %v1195_v34  ;;  %v741_v34 = vld [vmem:[%s1628_s5 + $0x78] sm:$0xff] }
  0x2b   : > { %1140 = vmatprep.mubr.msk.f32.mxu0 %vm279_vm0, %v269_v57 }
  0x2d   : > { %1198 = vmatpush3.bf16.msra.mxu0 %v1197_v39  ;;  %v529_v39 = vsub.s32 1, %v524_v36 }
  0x2e   : > { %1141 = vmatmul.mubr.msk.f32.gmra.mrb[14].mxu0 %vm279_vm0, %v270_v58  ;;  %1200 = vmatprep.subr.bf16.mxu0 %v1199_v40  ;;  %v1545_v40 = vrot.slane %v521_v38, %v525_v37 }
  0x2f   : > { %v1547_v41 = vrot.slane %v521_v38, %v529_v39 }
  0x31   : > { %1202 = vmatpush3.bf16.msra.mxu0 %v1201_v43 }
  0x32   : > { %1204 = vmatprep.subr.bf16.mxu0 %v1203_v32 }
  0xe5   : > { %v1121_v45 = vpop.f32.mrb[0].mxu0 }
  0xe6   : > { %v394_v46 = vpop.f32.mrb[1].mxu0  ;;  %v400_v48 = vadd.f32 %v1121_v45, %v1497_v44 }
  0xe7   : > { %v395_v47 = vadd.f32 %v1497_v44, %v394_v46 }
  0xe8   : > { %v474_v53 = vmax.f32 %v400_v48, 0.0 }
  0xe9   : > { %v473_v49 = vmax.f32 %v395_v47, 0.0  ;;  %v1124_v50 = vpop.f32.mrb[2].mxu0 }
  0xea   : > { %v404_v51 = vpop.f32.mrb[3].mxu0  ;;  %v410_v57 = vadd.f32 %v1124_v50, %v1497_v44 }
  0xeb   : > { %598 = vmatmul.mubr.f32.vlgmr.msra.gmra.mrb[0].mxu1 %v473_v49  ;;  %v405_v52 = vadd.f32 %v1497_v44, %v404_v51 }
  0xec   : > { %603 = vmatprep.mubr.f32.mxu1 %v1224_v1  ;;  %v476_v61 = vmax.f32 %v410_v57, 0.0 }
  0xed   : > { %v1127_v54 = vpop.f32.mrb[4].mxu0  ;;  %v475_v56 = vmax.f32 %v405_v52, 0.0 }
  0xee   : > { %v414_v55 = vpop.f32.mrb[5].mxu0  ;;  %v420_v2 = vadd.f32 %v1127_v54, %v1497_v44 }
  0xef   : > { %604 = vmatmul.mubr.f32.gmra.mrb[2].mxu1 %v474_v53  ;;  %v415_v60 = vadd.f32 %v1497_v44, %v414_v55 }
  0xf0   : > { %609 = vmatprep.mubr.f32.mxu1 %v1224_v1  ;;  %v478_v6 = vmax.f32 %v420_v2, 0.0 }
  0xf1   : > { %v1130_v58 = vpop.f32.mrb[6].mxu0  ;;  %v477_v0 = vmax.f32 %v415_v60, 0.0 }
  0xf2   : > { %v424_v59 = vpop.f32.mrb[7].mxu0  ;;  %v430_v10 = vadd.f32 %v1130_v58, %v1497_v44 }
  0xf3   : > { %610 = vmatmul.mubr.f32.gmra.mrb[4].mxu1 %v475_v56  ;;  %v425_v5 = vadd.f32 %v1497_v44, %v424_v59 }
  0xf4   : > { %615 = vmatprep.mubr.f32.mxu1 %v1224_v1  ;;  %v480_v14 = vmax.f32 %v430_v10, 0.0 }
  0xf5   : > { %v1133_v62 = vpop.f32.mrb[8].mxu0  ;;  %v479_v9 = vmax.f32 %v425_v5, 0.0 }
  0xf6   : > { %v434_v63 = vpop.f32.mrb[9].mxu0  ;;  %v440_v16 = vadd.f32 %v1133_v62, %v1497_v44 }
  0xf7   : > { %616 = vmatmul.mubr.f32.gmra.mrb[6].mxu1 %v476_v61  ;;  %v435_v13 = vadd.f32 %v1497_v44, %v434_v63 }
  0xf8   : > { %621 = vmatprep.mubr.f32.mxu1 %v1224_v1  ;;  %v482_v18 = vmax.f32 %v440_v16, 0.0 }
  0xf9   : > { %v1136_v3 = vpop.f32.mrb[10].mxu0  ;;  %v481_v15 = vmax.f32 %v435_v13, 0.0 }
  0xfa   : > { %v444_v4 = vpop.f32.mrb[11].mxu0  ;;  %v450_v20 = vadd.f32 %v1136_v3, %v1497_v44 }
  0xfb   : > { %622 = vmatmul.mubr.f32.gmra.mrb[8].mxu1 %v477_v0  ;;  %v445_v17 = vadd.f32 %v1497_v44, %v444_v4 }
  0xfc   : > { %627 = vmatprep.mubr.f32.mxu1 %v1224_v1  ;;  %v484_v22 = vmax.f32 %v450_v20, 0.0 }
  0xfd   : > { %v1139_v7 = vpop.f32.mrb[12].mxu0  ;;  %v483_v19 = vmax.f32 %v445_v17, 0.0 }
  0xfe   : > { %v454_v8 = vpop.f32.mrb[13].mxu0  ;;  %v460_v24 = vadd.f32 %v1139_v7, %v1497_v44 }
  0xff   : > { %628 = vmatmul.mubr.f32.gmra.mrb[10].mxu1 %v478_v6  ;;  %v455_v21 = vadd.f32 %v1497_v44, %v454_v8 }
 0x100   : > { %633 = vmatprep.mubr.f32.mxu1 %v1224_v1  ;;  %v486_v26 = vmax.f32 %v460_v24, 0.0 }
 0x101   : > { %v1142_v11 = vpop.f32.mrb[14].mxu0  ;;  %v485_v23 = vmax.f32 %v455_v21, 0.0 }
 0x102   : > { %v464_v12 = vpop.f32.mrb[15].mxu0  ;;  %v470_v28 = vadd.f32 %v1142_v11, %v1497_v44 }
 0x103   : > { %634 = vmatmul.mubr.f32.gmra.mrb[12].mxu1 %v479_v9  ;;  %v465_v25 = vadd.f32 %v1497_v44, %v464_v12 }
 0x104   : > { %639 = vmatprep.mubr.f32.mxu1 %v1224_v1  ;;  %v488_v29 = vmax.f32 %v470_v28, 0.0 }
 0x105   : > { %v487_v27 = vmax.f32 %v465_v25, 0.0 }
 0x107   : > { %640 = vmatmul.mubr.f32.gmra.mrb[14].mxu1 %v480_v14 }
 0x108   : > { %645 = vmatprep.mubr.f32.mxu1 %v1224_v1 }
 0x10b   : > { %646 = vmatmul.mubr.f32.gmra.mrb[16].mxu1 %v481_v15 }
 0x10c   : > { %651 = vmatprep.mubr.f32.mxu1 %v1224_v1 }
 0x10f   : > { %652 = vmatmul.mubr.f32.gmra.mrb[18].mxu1 %v482_v18 }
 0x110   : > { %657 = vmatprep.mubr.f32.mxu1 %v1224_v1 }
 0x113   : > { %658 = vmatmul.mubr.f32.gmra.mrb[20].mxu1 %v483_v19 }
 0x114   : > { %663 = vmatprep.mubr.f32.mxu1 %v1224_v1 }
 0x117   : > { %664 = vmatmul.mubr.f32.gmra.mrb[22].mxu1 %v484_v22 }
 0x118   : > { %669 = vmatprep.mubr.f32.mxu1 %v1224_v1 }
 0x11b   : > { %670 = vmatmul.mubr.f32.gmra.mrb[24].mxu1 %v485_v23 }
 0x11c   : > { %675 = vmatprep.mubr.f32.mxu1 %v1224_v1 }
 0x11f   : > { %676 = vmatmul.mubr.f32.gmra.mrb[26].mxu1 %v486_v26 }
 0x120   : > { %681 = vmatprep.mubr.f32.mxu1 %v1224_v1 }
 0x123   : > { %682 = vmatmul.mubr.f32.gmra.mrb[28].mxu1 %v487_v27 }
 0x124   : > { %687 = vmatprep.mubr.f32.mxu1 %v1224_v1  ;;  %v1205_v1 = vpack.c.bf16 %v741_v34, %v740_v33 }
 0x126   : > { %1206 = vmatpush3.bf16.msra.mxu0 %v1205_v1 }
 0x127   : > { %688 = vmatmul.mubr.f32.gmra.mrb[30].mxu1 %v488_v29 }
 0x1be   : > { %v599_v42 = vpop.f32.mrb[0].mxu1 }
 0x1bf   : > { %v600_v43 = vadd.f32 %v599_v42, %v1545_v40  ;;  %v601_v44 = vpop.f32.mrb[1].mxu1 }
 0x1c0   : > { %v602_v45 = vadd.f32 %v601_v44, %v1547_v41 }
 0x1c1   : > { %v694_v48 = vmax.f32 %v600_v43, 0.0 }
 0x1c2   : > { %v695_v46 = vmax.f32 %v602_v45, 0.0  ;;  %v605_v47 = vpop.f32.mrb[2].mxu1 }
 0x1c3   : > { %v606_v49 = vadd.f32 %v605_v47, %v1545_v40  ;;  %v607_v50 = vpop.f32.mrb[3].mxu1 }
 0x1c4   : > { %v608_v51 = vadd.f32 %v607_v50, %v1547_v41  ;;  %822 = vmatprep.mubr.f32.mxu0 %v695_v46 }
 0x1c5   : > { %823 = vmatmul.mubr.f32.vlgmr.msra.gmra.mrb[16].mxu0 %v694_v48  ;;  %v696_v54 = vmax.f32 %v606_v49, 0.0 }
 0x1c6   : > { %v697_v52 = vmax.f32 %v608_v51, 0.0  ;;  %v611_v53 = vpop.f32.mrb[4].mxu1 }
 0x1c7   : > { %v612_v55 = vadd.f32 %v611_v53, %v1545_v40  ;;  %v613_v56 = vpop.f32.mrb[5].mxu1 }
 0x1c8   : > { %v614_v57 = vadd.f32 %v613_v56, %v1547_v41  ;;  %827 = vmatprep.mubr.f32.mxu0 %v697_v52 }
 0x1c9   : > { %828 = vmatmul.mubr.f32.gmra.mrb[18].mxu0 %v696_v54  ;;  %v698_v60 = vmax.f32 %v612_v55, 0.0 }
 0x1ca   : > { %v699_v58 = vmax.f32 %v614_v57, 0.0  ;;  %v617_v59 = vpop.f32.mrb[6].mxu1 }
 0x1cb   : > { %v618_v61 = vadd.f32 %v617_v59, %v1545_v40  ;;  %v619_v62 = vpop.f32.mrb[7].mxu1 }
 0x1cc   : > { %v620_v63 = vadd.f32 %v619_v62, %v1547_v41  ;;  %832 = vmatprep.mubr.f32.mxu0 %v699_v58 }
 0x1cd   : > { %833 = vmatmul.mubr.f32.gmra.mrb[20].mxu0 %v698_v60  ;;  %v700_v3 = vmax.f32 %v618_v61, 0.0 }
 0x1ce   : > { %v701_v0 = vmax.f32 %v620_v63, 0.0  ;;  %v623_v2 = vpop.f32.mrb[8].mxu1 }
 0x1cf   : > { %v624_v4 = vadd.f32 %v623_v2, %v1545_v40  ;;  %v625_v5 = vpop.f32.mrb[9].mxu1 }
 0x1d0   : > { %v626_v6 = vadd.f32 %v625_v5, %v1547_v41  ;;  %837 = vmatprep.mubr.f32.mxu0 %v701_v0 }
 0x1d1   : > { %838 = vmatmul.mubr.f32.gmra.mrb[22].mxu0 %v700_v3  ;;  %v702_v9 = vmax.f32 %v624_v4, 0.0 }
 0x1d2   : > { %v703_v7 = vmax.f32 %v626_v6, 0.0  ;;  %v629_v8 = vpop.f32.mrb[10].mxu1 }
 0x1d3   : > { %v630_v10 = vadd.f32 %v629_v8, %v1545_v40  ;;  %v631_v11 = vpop.f32.mrb[11].mxu1 }
 0x1d4   : > { %v632_v12 = vadd.f32 %v631_v11, %v1547_v41  ;;  %842 = vmatprep.mubr.f32.mxu0 %v703_v7 }
 0x1d5   : > { %843 = vmatmul.mubr.f32.gmra.mrb[24].mxu0 %v702_v9  ;;  %v704_v15 = vmax.f32 %v630_v10, 0.0 }
 0x1d6   : > { %v705_v13 = vmax.f32 %v632_v12, 0.0  ;;  %v635_v14 = vpop.f32.mrb[12].mxu1 }
 0x1d7   : > { %v636_v16 = vadd.f32 %v635_v14, %v1545_v40  ;;  %v637_v17 = vpop.f32.mrb[13].mxu1 }
 0x1d8   : > { %v638_v18 = vadd.f32 %v637_v17, %v1547_v41  ;;  %847 = vmatprep.mubr.f32.mxu0 %v705_v13 }
 0x1d9   : > { %848 = vmatmul.mubr.f32.gmra.mrb[26].mxu0 %v704_v15  ;;  %v706_v21 = vmax.f32 %v636_v16, 0.0 }
 0x1da   : > { %v707_v19 = vmax.f32 %v638_v18, 0.0  ;;  %v641_v20 = vpop.f32.mrb[14].mxu1 }
 0x1db   : > { %v642_v22 = vadd.f32 %v641_v20, %v1545_v40  ;;  %v643_v23 = vpop.f32.mrb[15].mxu1 }
 0x1dc   : > { %v644_v24 = vadd.f32 %v643_v23, %v1547_v41  ;;  %852 = vmatprep.mubr.f32.mxu0 %v707_v19 }
 0x1dd   : > { %853 = vmatmul.mubr.f32.gmra.mrb[28].mxu0 %v706_v21  ;;  %v708_v27 = vmax.f32 %v642_v22, 0.0 }
 0x1de   : > { %v709_v25 = vmax.f32 %v644_v24, 0.0  ;;  %v647_v26 = vpop.f32.mrb[16].mxu1 }
 0x1df   : > { %v648_v28 = vadd.f32 %v647_v26, %v1545_v40  ;;  %v649_v29 = vpop.f32.mrb[17].mxu1 }
 0x1e0   : > { %v650_v30 = vadd.f32 %v649_v29, %v1547_v41  ;;  %857 = vmatprep.mubr.f32.mxu0 %v709_v25 }
 0x1e1   : > { %858 = vmatmul.mubr.f32.gmra.mrb[30].mxu0 %v708_v27  ;;  %v710_v33 = vmax.f32 %v648_v28, 0.0 }
 0x1e2   : > { %v711_v31 = vmax.f32 %v650_v30, 0.0  ;;  %v653_v32 = vpop.f32.mrb[18].mxu1 }
 0x1e3   : > { %v654_v34 = vadd.f32 %v653_v32, %v1545_v40  ;;  %v655_v1 = vpop.f32.mrb[19].mxu1 }
 0x1e4   : > { %v656_v35 = vadd.f32 %v655_v1, %v1547_v41  ;;  %862 = vmatprep.mubr.f32.mxu0 %v711_v31 }
 0x1e5   : > { %863 = vmatmul.mubr.f32.gmra.mrb[32].mxu0 %v710_v33  ;;  %v712_v38 = vmax.f32 %v654_v34, 0.0 }
 0x1e6   : > { %v713_v36 = vmax.f32 %v656_v35, 0.0  ;;  %v659_v37 = vpop.f32.mrb[20].mxu1 }
 0x1e7   : > { %v660_v39 = vadd.f32 %v659_v37, %v1545_v40  ;;  %v661_v42 = vpop.f32.mrb[21].mxu1 }
 0x1e8   : > { %v662_v43 = vadd.f32 %v661_v42, %v1547_v41  ;;  %867 = vmatprep.mubr.f32.mxu0 %v713_v36 }
 0x1e9   : > { %868 = vmatmul.mubr.f32.gmra.mrb[34].mxu0 %v712_v38  ;;  %v714_v46 = vmax.f32 %v660_v39, 0.0 }
 0x1ea   : > { %v715_v44 = vmax.f32 %v662_v43, 0.0  ;;  %v665_v45 = vpop.f32.mrb[22].mxu1 }
 0x1eb   : > { %v666_v47 = vadd.f32 %v665_v45, %v1545_v40  ;;  %v667_v48 = vpop.f32.mrb[23].mxu1 }
 0x1ec   : > { %v668_v49 = vadd.f32 %v667_v48, %v1547_v41  ;;  %872 = vmatprep.mubr.f32.mxu0 %v715_v44 }
 0x1ed   : > { %873 = vmatmul.mubr.f32.gmra.mrb[36].mxu0 %v714_v46  ;;  %v716_v52 = vmax.f32 %v666_v47, 0.0 }
 0x1ee   : > { %v717_v50 = vmax.f32 %v668_v49, 0.0  ;;  %v671_v51 = vpop.f32.mrb[24].mxu1 }
 0x1ef   : > { %v672_v53 = vadd.f32 %v671_v51, %v1545_v40  ;;  %v673_v54 = vpop.f32.mrb[25].mxu1 }
 0x1f0   : > { %v674_v55 = vadd.f32 %v673_v54, %v1547_v41  ;;  %877 = vmatprep.mubr.f32.mxu0 %v717_v50 }
 0x1f1   : > { %878 = vmatmul.mubr.f32.gmra.mrb[38].mxu0 %v716_v52  ;;  %v718_v58 = vmax.f32 %v672_v53, 0.0 }
 0x1f2   : > { %v719_v56 = vmax.f32 %v674_v55, 0.0  ;;  %v677_v57 = vpop.f32.mrb[26].mxu1 }
 0x1f3   : > { %v678_v59 = vadd.f32 %v677_v57, %v1545_v40  ;;  %v679_v60 = vpop.f32.mrb[27].mxu1 }
 0x1f4   : > { %v680_v61 = vadd.f32 %v679_v60, %v1547_v41  ;;  %882 = vmatprep.mubr.f32.mxu0 %v719_v56 }
 0x1f5   : > { %883 = vmatmul.mubr.f32.gmra.mrb[40].mxu0 %v718_v58  ;;  %v720_v0 = vmax.f32 %v678_v59, 0.0 }
 0x1f6   : > { %v721_v62 = vmax.f32 %v680_v61, 0.0  ;;  %v683_v63 = vpop.f32.mrb[28].mxu1 }
 0x1f7   : > { %v684_v2 = vadd.f32 %v683_v63, %v1545_v40  ;;  %v685_v3 = vpop.f32.mrb[29].mxu1 }
 0x1f8   : > { %v686_v4 = vadd.f32 %v685_v3, %v1547_v41  ;;  %887 = vmatprep.mubr.f32.mxu0 %v721_v62 }
 0x1f9   : > { %888 = vmatmul.mubr.f32.gmra.mrb[42].mxu0 %v720_v0  ;;  %v722_v7 = vmax.f32 %v684_v2, 0.0 }
 0x1fa   : > { %v723_v5 = vmax.f32 %v686_v4, 0.0  ;;  %v689_v6 = vpop.f32.mrb[30].mxu1 }
 0x1fb   : > { %v690_v8 = vadd.f32 %v689_v6, %v1545_v40  ;;  %v691_v9 = vpop.f32.mrb[31].mxu1 }
 0x1fc   : > { %v692_v10 = vadd.f32 %v691_v9, %v1547_v41  ;;  %892 = vmatprep.mubr.f32.mxu0 %v723_v5 }
 0x1fd   : > { %893 = vmatmul.mubr.f32.gmra.mrb[44].mxu0 %v722_v7  ;;  %v724_v12 = vmax.f32 %v690_v8, 0.0 }
 0x1fe   : > { %v725_v11 = vmax.f32 %v692_v10, 0.0 }
 0x200   : > { %897 = vmatprep.mubr.f32.mxu0 %v725_v11 }
 0x201   : > { %898 = vmatmul.mubr.f32.gmra.mrb[46].mxu0 %v724_v12 }
 0x298   : > { %v1069_v13 = vpop.f32.mrb[16].mxu0 }
 0x299   : > { %v1070_v14 = vpop.f32.mrb[17].mxu0 }
 0x29a   : > { %v1071_v15 = vadd.f32 %v1070_v14, %v1069_v13 }
 0x29c   : > { %v903_v40 = vmul.f32 0.125, %v1071_v15  ;;  %v1072_v41 = vpop.f32.mrb[18].mxu0 }
 0x29d   : > { %v1073_v16 = vpop.f32.mrb[19].mxu0 }
 0x29e   : > { %920 = vst.msk [vmem:[%s1586_s14] sm:$0xff] %vm919_vm1, %v903_v40  ;;  %v1074_v17 = vadd.f32 %v1073_v16, %v1072_v41 }
 0x2a0   : > { %v904_v18 = vmul.f32 0.125, %v1074_v17  ;;  %v1075_v19 = vpop.f32.mrb[20].mxu0 }
 0x2a1   : > { %v1076_v20 = vpop.f32.mrb[21].mxu0 }
 0x2a2   : > { %921 = vst.msk [vmem:[%s1586_s14 + $0x8] sm:$0xff] %vm919_vm1, %v904_v18  ;;  %v1077_v21 = vadd.f32 %v1076_v20, %v1075_v19 }
 0x2a4   : > { %v905_v22 = vmul.f32 0.125, %v1077_v21  ;;  %v1078_v23 = vpop.f32.mrb[22].mxu0 }
 0x2a5   : > { %v1079_v24 = vpop.f32.mrb[23].mxu0 }
 0x2a6   : > { %922 = vst.msk [vmem:[%s1586_s14 + $0x10] sm:$0xff] %vm919_vm1, %v905_v22  ;;  %v1080_v25 = vadd.f32 %v1079_v24, %v1078_v23 }
 0x2a8   : > { %v906_v26 = vmul.f32 0.125, %v1080_v25  ;;  %v1081_v27 = vpop.f32.mrb[24].mxu0 }
 0x2a9   : > { %v1082_v28 = vpop.f32.mrb[25].mxu0 }
 0x2aa   : > { %923 = vst.msk [vmem:[%s1586_s14 + $0x18] sm:$0xff] %vm919_vm1, %v906_v26  ;;  %v1083_v29 = vadd.f32 %v1082_v28, %v1081_v27 }
 0x2ac   : > { %v907_v30 = vmul.f32 0.125, %v1083_v29  ;;  %v1084_v31 = vpop.f32.mrb[26].mxu0 }
 0x2ad   : > { %v1085_v32 = vpop.f32.mrb[27].mxu0 }
 0x2ae   : > { %924 = vst.msk [vmem:[%s1586_s14 + $0x20] sm:$0xff] %vm919_vm1, %v907_v30  ;;  %v1086_v33 = vadd.f32 %v1085_v32, %v1084_v31 }
 0x2b0   : > { %v908_v34 = vmul.f32 0.125, %v1086_v33  ;;  %v1087_v1 = vpop.f32.mrb[28].mxu0 }
 0x2b1   : > { %v1088_v35 = vpop.f32.mrb[29].mxu0 }
 0x2b2   : > { %925 = vst.msk [vmem:[%s1586_s14 + $0x28] sm:$0xff] %vm919_vm1, %v908_v34  ;;  %v1089_v36 = vadd.f32 %v1088_v35, %v1087_v1 }
 0x2b4   : > { %v909_v37 = vmul.f32 0.125, %v1089_v36  ;;  %v1090_v38 = vpop.f32.mrb[30].mxu0 }
 0x2b5   : > { %v1091_v39 = vpop.f32.mrb[31].mxu0 }
 0x2b6   : > { %926 = vst.msk [vmem:[%s1586_s14 + $0x30] sm:$0xff] %vm919_vm1, %v909_v37  ;;  %v1092_v42 = vadd.f32 %v1091_v39, %v1090_v38 }
 0x2b8   : > { %v910_v43 = vmul.f32 0.125, %v1092_v42  ;;  %v1093_v44 = vpop.f32.mrb[32].mxu0 }
 0x2b9   : > { %v1094_v45 = vpop.f32.mrb[33].mxu0 }
 0x2ba   : > { %927 = vst.msk [vmem:[%s1586_s14 + $0x38] sm:$0xff] %vm919_vm1, %v910_v43  ;;  %v1095_v46 = vadd.f32 %v1094_v45, %v1093_v44 }
 0x2bc   : > { %v911_v47 = vmul.f32 0.125, %v1095_v46  ;;  %v1096_v48 = vpop.f32.mrb[34].mxu0 }
 0x2bd   : > { %v1097_v49 = vpop.f32.mrb[35].mxu0 }
 0x2be   : > { %928 = vst.msk [vmem:[%s1586_s14 + $0x40] sm:$0xff] %vm919_vm1, %v911_v47  ;;  %v1098_v50 = vadd.f32 %v1097_v49, %v1096_v48 }
 0x2c0   : > { %v912_v51 = vmul.f32 0.125, %v1098_v50  ;;  %v1099_v52 = vpop.f32.mrb[36].mxu0 }
 0x2c1   : > { %v1100_v53 = vpop.f32.mrb[37].mxu0 }
 0x2c2   : > { %929 = vst.msk [vmem:[%s1586_s14 + $0x48] sm:$0xff] %vm919_vm1, %v912_v51  ;;  %v1101_v54 = vadd.f32 %v1100_v53, %v1099_v52 }
 0x2c4   : > { %v913_v55 = vmul.f32 0.125, %v1101_v54  ;;  %v1102_v56 = vpop.f32.mrb[38].mxu0 }
 0x2c5   : > { %v1103_v57 = vpop.f32.mrb[39].mxu0 }
 0x2c6   : > { %930 = vst.msk [vmem:[%s1586_s14 + $0x50] sm:$0xff] %vm919_vm1, %v913_v55  ;;  %v1104_v58 = vadd.f32 %v1103_v57, %v1102_v56 }
 0x2c8   : > { %v914_v59 = vmul.f32 0.125, %v1104_v58  ;;  %v1105_v60 = vpop.f32.mrb[40].mxu0 }
 0x2c9   : > { %v1106_v61 = vpop.f32.mrb[41].mxu0 }
 0x2ca   : > { %931 = vst.msk [vmem:[%s1586_s14 + $0x58] sm:$0xff] %vm919_vm1, %v914_v59  ;;  %v1107_v62 = vadd.f32 %v1106_v61, %v1105_v60 }
 0x2cc   : > { %v915_v63 = vmul.f32 0.125, %v1107_v62  ;;  %v1108_v0 = vpop.f32.mrb[42].mxu0 }
 0x2cd   : > { %v1109_v2 = vpop.f32.mrb[43].mxu0 }
 0x2ce   : > { %932 = vst.msk [vmem:[%s1586_s14 + $0x60] sm:$0xff] %vm919_vm1, %v915_v63  ;;  %v1110_v3 = vadd.f32 %v1109_v2, %v1108_v0 }
 0x2d0   : > { %v916_v4 = vmul.f32 0.125, %v1110_v3  ;;  %v1111_v5 = vpop.f32.mrb[44].mxu0 }
 0x2d1   : > { %v1112_v6 = vpop.f32.mrb[45].mxu0 }
 0x2d2   : > { %933 = vst.msk [vmem:[%s1586_s14 + $0x68] sm:$0xff] %vm919_vm1, %v916_v4  ;;  %v1113_v7 = vadd.f32 %v1112_v6, %v1111_v5 }
 0x2d4   : > { %v917_v8 = vmul.f32 0.125, %v1113_v7  ;;  %v1114_v9 = vpop.f32.mrb[46].mxu0 }
 0x2d5   : > { %v1115_v10 = vpop.f32.mrb[47].mxu0 }
 0x2d6   : > { %934 = vst.msk [vmem:[%s1586_s14 + $0x70] sm:$0xff] %vm919_vm1, %v917_v8  ;;  %v1116_v11 = vadd.f32 %v1115_v10, %v1114_v9 }
 0x2d8   : > { %v918_v12 = vmul.f32 0.125, %v1116_v11 }
 0x2da   : > { %935 = vst.msk [vmem:[%s1586_s14 + $0x78] sm:$0xff] %vm919_vm1, %v918_v12 }
 0x2db PF: > { %s16_s21 = sadd.s32 1, %s1222_s21  }
 0x2dc   : > { %p13_p4 = scmp.ge.s32.totalorder %s16_s21, 4  }
 0x2de   :  { %15 = sbr.rel (!%p13_p4) target bundleno = 1 (0x1), region = 74 }

// kernel: fwd.5
= control target key start
LH: loop header
LB: loop body
LE: loop exit
PB: predicated region body
PF: predicated region fallthrough
CT: control target
= control target key end

     0   :  { %s1777_s0 = inlined_call_operand.vmem [shape: s8[256,256], index: 0, kind: input, shape index: {}]   ;;  %s1778_s1 = inlined_call_operand.vmem [shape: f32[256,64], index: 1, kind: input, shape index: {}]   ;;  %s1779_s2 = inlined_call_operand.vmem [shape: f32[256,1], index: 2, kind: input, shape index: {}]   ;;  %s1780_s3 = inlined_call_operand.vmem [shape: f32[1,128], index: 3, kind: input, shape index: {}]   ;;  %s1781_s4 = inlined_call_operand.<no memory space> [shape: f32[1,1], index: 4, kind: input, shape index: {}]   ;;  %s1782_s5 = inlined_call_operand.hbm [shape: f32[1,256], index: 5, kind: output, shape index: {}]  }
   0x1   :  { %v10_v0 = vstv %s1781_s4 }
   0x2   :  { %11 = vst [vmem:[#allocation3] sm:$0x1] %v10_v0 }
   0x3   :  { %12 = vsyncpa [#allocation5], 0 }
   0x4   :  { %14 = vsyncpa [#allocation5 + $0x1], 0  ;;  %s1433_s20 = smov 0   ;;  %s1435_s21 = smov 0  }
   0x5   :  { %s1437_s22 = smov 0   ;;  %s1439_s23 = smov 0  }
   0x6   :  { %s1441_s24 = smov 0   ;;  %s1443_s25 = smov 0  }
   0x7 LB: > { %s1009_s4 = sadd.s32 4294967295, %s1392_s25   ;;  %s1010_s26 = sadd.s32 4294967294, %s1392_s25   ;;  %s1392_s25 = sphi %s1443_s25, %s20_s25   ;;  %s1388_s24 = sphi %s1441_s24, %s1789_s24   ;;  %s1384_s23 = sphi %s1439_s23, %s1788_s23   ;;  %s1380_s22 = sphi %s1437_s22, %s1787_s22   ;;  %s1376_s21 = sphi %s1435_s21, %s1786_s21   ;;  %s1372_s20 = sphi %s1433_s20, %s1785_s20  }
   0x8   : > { %s32_s27 = sadd.s32 1, %s1388_s24  ;;  %s156_s28 = sadd.s32 1, %s1380_s22 }
   0x9   : > { %p34_p0 = scmp.ge.s32.totalorder %s32_s27, 2  ;;  %p166_p1 = scmp.ne.s32.totalorder %s1380_s22, %s1376_s21 }
   0xa   : > { %p167_p2 = scmp.eq.s32.totalorder %s1009_s4, 1  ;;  %p172_p3 = scmp.ne.s32.totalorder %s1376_s21, %s1372_s20 }
   0xb   : > { %s1791_s27 = smov (%p34_p0, %s32_s27), 0  ;;  %p173_p5 = scmp.eq.s32.totalorder %s1010_s26, 1 }
   0xc   : > { %p1473_p4 = por %p167_p2, %p166_p1  ;;  %s153_s30 = ssub.s32 %s1388_s24, %s1791_s27 }
   0xd   : > { %p1013_p6 = scmp.ge.s32.totalorder %s1392_s25, 1  ;;  %p154_p7 = scmp.eq.s32.totalorder %s153_s30, 0 }
   0xe   : > { %p1480_p8 = por %p173_p5, %p172_p3  ;;  %p224_p9 = scmp.lt.s32.totalorder %s1392_s25, 3 }
   0xf   : > { %s1486_s7 = scalar_select %p154_p7, %s1380_s22, %s156_s28  }
  0x10   : > { %p225_p10 = pnand %p1013_p6, %p224_p9 }
  0x11   : > { %v390_v1 = vld [vmem:[%s1778_s1 + $0x80] sm:$0xff] (!%p225_p10)  ;;  %v391_v2 = vld [vmem:[%s1778_s1 + $0x88] sm:$0xff] (!%p225_p10)  ;;  %s1014_s14 = sshll.u32 (!%p225_p10), %s1384_s23, 2  ;;  %s1499_s15 = sshll.u32 (!%p225_p10), %s1384_s23, 4  ;;  %v392_v6 = vld [vmem:[%s1778_s1 + $0x90] sm:$0xff] (!%p225_p10)  ;;  %v1394_v8 = vmov (!%p225_p10), 0  }
  0x12   : > { %228 = sbr.rel (%p225_p10) target bundleno = 577 (0x241), region = 40  ;;  %v374_v3 = vld [vmem:[%s1778_s1] sm:$0xff] (!%p225_p10)  ;;  %v1156_v4 = vpack.c.bf16 (!%p225_p10), %v391_v2, %v390_v1  ;;  %v375_v5 = vld [vmem:[%s1778_s1 + $0x8] sm:$0xff] (!%p225_p10)  ;;  %v393_v7 = vld [vmem:[%s1778_s1 + $0x98] sm:$0xff] (!%p225_p10)  ;;  %p263_p11 = scmp.lt.s32.totalorder (!%p225_p10), %s1014_s14, 7  ;;  %1272 = vset.pattern.permute.xlu0 (!%p225_p10), %v1394_v8  ;;  %1273 = vset.pattern.permute.xlu1 (!%p225_p10), %v1394_v8  ;;  %vm283_vm0 = vcmask (!%p225_p10), 523264  }
  0x13   : > { %p274_p12 = scmp.lt.s32.totalorder (!%p225_p10), %s1499_s15, 31  ;;  %v1158_v9 = vpack.c.bf16 (!%p225_p10), %v375_v5, %v374_v3  ;;  %v1160_v10 = vpack.c.bf16 (!%p225_p10), %v393_v7, %v392_v6  ;;  %v376_v11 = vld [vmem:[%s1778_s1 + $0x10] sm:$0xff] (!%p225_p10)  ;;  %v377_v12 = vld [vmem:[%s1778_s1 + $0x18] sm:$0xff] (!%p225_p10)  ;;  %v394_v13 = vld [vmem:[%s1778_s1 + $0xa0] sm:$0xff] (!%p225_p10)  ;;  %s1395_s17 = smov (!%p225_p10), 64   ;;  %vm1398_vm1 = vmmov (!%p225_p10), 0  }
  0x14   : > { %1157 = vmatprep.subr.bf16.mxu0 (!%p225_p10), %v1156_v4  ;;  %v395_v14 = vld [vmem:[%s1778_s1 + $0xa8] sm:$0xff] (!%p225_p10)  ;;  %v1162_v15 = vpack.c.bf16 (!%p225_p10), %v377_v12, %v376_v11  ;;  %v378_v17 = vld [vmem:[%s1778_s1 + $0x20] sm:$0xff] (!%p225_p10)  ;;  %v396_v19 = vld [vmem:[%s1778_s1 + $0xb0] sm:$0xff] (!%p225_p10) }
  0x15   : > { %1159 = vmatpush3.bf16.msra.mxu0 (!%p225_p10), %v1158_v9  ;;  %v1164_v16 = vpack.c.bf16 (!%p225_p10), %v395_v14, %v394_v13  ;;  %v379_v18 = vld [vmem:[%s1778_s1 + $0x28] sm:$0xff] (!%p225_p10)  ;;  %v397_v20 = vld [vmem:[%s1778_s1 + $0xb8] sm:$0xff] (!%p225_p10)  ;;  %v380_v23 = vld [vmem:[%s1778_s1 + $0x30] sm:$0xff] (!%p225_p10) }
  0x16   : > { %1161 = vmatprep.subr.bf16.mxu0 (!%p225_p10), %v1160_v10  ;;  %v1166_v21 = vpack.c.bf16 (!%p225_p10), %v379_v18, %v378_v17  ;;  %v1168_v22 = vpack.c.bf16 (!%p225_p10), %v397_v20, %v396_v19  ;;  %v381_v24 = vld [vmem:[%s1778_s1 + $0x38] sm:$0xff] (!%p225_p10)  ;;  %v398_v25 = vld [vmem:[%s1778_s1 + $0xc0] sm:$0xff] (!%p225_p10)  ;;  %v399_v26 = vld [vmem:[%s1778_s1 + $0xc8] sm:$0xff] (!%p225_p10) }
  0x17   : > { %v1170_v29 = vpack.c.bf16 (!%p225_p10), %v381_v24, %v380_v23  ;;  %v1172_v31 = vpack.c.bf16 (!%p225_p10), %v399_v26, %v398_v25  ;;  %v382_v32 = vld [vmem:[%s1778_s1 + $0x40] sm:$0xff] (!%p225_p10)  ;;  %v383_v33 = vld [vmem:[%s1778_s1 + $0x48] sm:$0xff] (!%p225_p10)  ;;  %v400_v34 = vld [vmem:[%s1778_s1 + $0xd0] sm:$0xff] (!%p225_p10) }
  0x18   : > { %v401_v36 = vld [vmem:[%s1778_s1 + $0xd8] sm:$0xff] (!%p225_p10)  ;;  %v1174_v39 = vpack.c.bf16 (!%p225_p10), %v383_v33, %v382_v32  ;;  %v384_v42 = vld [vmem:[%s1778_s1 + $0x50] sm:$0xff] (!%p225_p10)  ;;  %v402_v44 = vld [vmem:[%s1778_s1 + $0xe0] sm:$0xff] (!%p225_p10) }
  0x19   : > { %s1793_s14 = smov (!%p263_p11, %s1014_s14), 7  ;;  %1163 = vmatpush3.bf16.msra.mxu0 %v1162_v15  ;;  %v1176_v41 = vpack.c.bf16 %v401_v36, %v400_v34  ;;  %v385_v43 = vld [vmem:[%s1778_s1 + $0x58] sm:$0xff]  ;;  %v403_v45 = vld [vmem:[%s1778_s1 + $0xe8] sm:$0xff]  ;;  %v386_v47 = vld [vmem:[%s1778_s1 + $0x60] sm:$0xff] }
  0x1a   : > { %s275_s16 = scalar_select %p274_p12, %s1499_s15, 31  ;;  %1165 = vmatprep.subr.bf16.mxu0 %v1164_v16  ;;  %v1178_v46 = vpack.c.bf16 %v385_v43, %v384_v42  ;;  %v1180_v49 = vpack.c.bf16 %v403_v45, %v402_v44  ;;  %v387_v50 = vld [vmem:[%s1778_s1 + $0x68] sm:$0xff]  ;;  %v404_v53 = vld [vmem:[%s1778_s1 + $0xf0] sm:$0xff]  ;;  %v405_v54 = vld [vmem:[%s1778_s1 + $0xf8] sm:$0xff] }
  0x1b   : > { %s1023_s26 = sshll.u32 %s1793_s14, 4  ;;  %v1182_v55 = vpack.c.bf16 %v387_v50, %v386_v47  ;;  %v1184_v60 = vpack.c.bf16 %v405_v54, %v404_v53  ;;  %v388_v61 = vld [vmem:[%s1778_s1 + $0x70] sm:$0xff]  ;;  %v389_v62 = vld [vmem:[%s1778_s1 + $0x78] sm:$0xff] }
  0x1c   : > { %s1018_s10 = sshll.u32 %s275_s16, 3  ;;  %s1539_s13 = scalar_lea.vmem %s1777_s0, %s1023_s26  ;;  %v1186_v2 = vpack.c.bf16 %v389_v62, %v388_v61 }
  0x1d   : > { %s1550_s28 = scalar_lea.vmem %s1779_s2, %s1018_s10  ;;  %v1559_v27 = vld [vmem:[%s1539_s13 + $0x8] sm:$0xff]  ;;  %1167 = vmatpush3.bf16.msra.mxu0 %v1166_v21  ;;  %s1019_s16 = sshll.u32 %s1384_s23, 7  ;;  %v300_v56 = vld [vmem:[%s1539_s13] sm:$0xff]  ;;  %v303_v20 = vld [vmem:[%s1539_s13 + $0x18] sm:$0xff] }
  0x1e   : > { %v309_v28 = vunpack.c.0.s8 %v1559_v27  ;;  %v619_v30 = vld [vmem:[%s1550_s28] sm:$0xff]  ;;  %1169 = vmatprep.subr.bf16.mxu0 %v1168_v22  ;;  %v620_v37 = vld [vmem:[%s1550_s28 + $0x8] sm:$0xff]  ;;  %v621_v38 = vld [vmem:[%s1550_s28 + $0x10] sm:$0xff]  ;;  %s1594_s18 = scalar_lea.vmem %s1778_s1, %s1019_s16  ;;  %v308_v63 = vunpack.c.0.s8 %v300_v56  ;;  %v311_v3 = vunpack.c.1.s8 %v1559_v27  ;;  %v310_v6 = vunpack.c.1.s8 %v300_v56  ;;  %s1730_s16 = scalar_lea.hbm %s1782_s5, %s1499_s15 }
  0x1f   : > { %637 = vperm.xlu0 %1272, %v619_v30   ;;  %647 = vperm.xlu1 %1273, %v621_v38   ;;  %v622_v40 = vld [vmem:[%s1550_s28 + $0x18] sm:$0xff]  ;;  %v623_v48 = vld [vmem:[%s1550_s28 + $0x20] sm:$0xff]  ;;  %v734_v52 = vld [vmem:[%s1594_s18 + $0x8] sm:$0xff]  ;;  %v313_v11 = vunpack.c.2.s8 %v1559_v27  ;;  %v312_v17 = vunpack.c.2.s8 %v300_v56  ;;  %v315_v19 = vunpack.c.3.s8 %v1559_v27  ;;  %v314_v23 = vunpack.c.3.s8 %v300_v56  ;;  %s1399_s10 = smov [#allocation4]  }
  0x20   : > { %v341_v35 = vcvt.s32.f32 %v309_v28  ;;  %v733_v51 = vld [vmem:[%s1594_s18] sm:$0xff]  ;;  %v735_v58 = vld [vmem:[%s1594_s18 + $0x10] sm:$0xff]  ;;  %v736_v59 = vld [vmem:[%s1594_s18 + $0x18] sm:$0xff]  ;;  %v340_v5 = vcvt.s32.f32 %v308_v63  ;;  %v343_v10 = vcvt.s32.f32 %v311_v3  ;;  %v342_v16 = vcvt.s32.f32 %v310_v6  ;;  %s1318_s11 = sshll.u32 %s1399_s10, 4  ;;  %s1319_s11 = int_to_ptr.vmem [resolvable:$false] %s1318_s11 }
  0x21   : > { %1171 = vmatpush3.bf16.msra.mxu0 %v1170_v29  ;;  %v1274_v57 = vpack.i.bf16 %v734_v52, %v733_v51  ;;  %v624_v0 = vld [vmem:[%s1550_s28 + $0x28] sm:$0xff]  ;;  %v1279_v1 = vpack.i.bf16 %v736_v59, %v735_v58  ;;  %v626_v4 = vld [vmem:[%s1550_s28 + $0x38] sm:$0xff]  ;;  %v625_v7 = vld [vmem:[%s1550_s28 + $0x30] sm:$0xff]  ;;  %v345_v18 = vcvt.s32.f32 %v313_v11  ;;  %v344_v22 = vcvt.s32.f32 %v312_v17  ;;  %s1320_s23 = scalar_lea.vmem %s1319_s11, 32 }
  0x22   : > { %486 = vmatprep.mubr.f32.mxu0 %v341_v35  ;;  %1173 = vmatprep.subr.bf16.mxu0 %v1172_v31  ;;  %v737_v8 = vld [vmem:[%s1594_s18 + $0x20] sm:$0xff]  ;;  %v738_v9 = vld [vmem:[%s1594_s18 + $0x28] sm:$0xff]  ;;  %v739_v14 = vld [vmem:[%s1594_s18 + $0x30] sm:$0xff]  ;;  %v347_v25 = vcvt.s32.f32 %v315_v19  ;;  %v317_v26 = vunpack.c.0.s8 %v303_v20  ;;  %v346_v29 = vcvt.s32.f32 %v314_v23  ;;  %v319_v35 = vunpack.c.1.s8 %v303_v20 }
  0x23   : > { %642 = vperm.xlu0 %1272, %v620_v37   ;;  %652 = vperm.xlu1 %1273, %v622_v40   ;;  %v1284_v12 = vpack.i.bf16 %v738_v9, %v737_v8  ;;  %v627_v13 = vld [vmem:[%s1550_s28 + $0x40] sm:$0xff]  ;;  %v740_v15 = vld [vmem:[%s1594_s18 + $0x38] sm:$0xff]  ;;  %v628_v24 = vld [vmem:[%s1550_s28 + $0x48] sm:$0xff]  ;;  %v321_v43 = vunpack.c.2.s8 %v303_v20 }
  0x24   : > { %v1289_v21 = vpack.i.bf16 %v740_v15, %v739_v14  ;;  %v302_v28 = vld [vmem:[%s1539_s13 + $0x10] sm:$0xff]  ;;  %v630_v27 = vld [vmem:[%s1550_s28 + $0x58] sm:$0xff]  ;;  %v741_v32 = vld [vmem:[%s1594_s18 + $0x40] sm:$0xff]  ;;  %v349_v34 = vcvt.s32.f32 %v317_v26  ;;  %v351_v42 = vcvt.s32.f32 %v319_v35  ;;  %v1396_v35 = vmov 0.0  }
  0x25   : > { %1175 = vmatpush3.bf16.msra.mxu0 %v1174_v39  ;;  %v316_v30 = vunpack.c.0.s8 %v302_v28  ;;  %v629_v31 = vld [vmem:[%s1550_s28 + $0x50] sm:$0xff]  ;;  %v742_v33 = vld [vmem:[%s1594_s18 + $0x48] sm:$0xff]  ;;  %v631_v37 = vld [vmem:[%s1550_s28 + $0x60] sm:$0xff]  ;;  %284 = vst.msk [vmem:[#allocation2] sm:$0xff] %vm283_vm0, %v1396_v35  ;;  %1153 = vmatprep.mubr.msk.f32.mxu1 %vm1398_vm1, %v1396_v35 }
  0x26   : > { %1177 = vmatprep.subr.bf16.mxu0 %v1176_v41  ;;  %v1294_v36 = vpack.i.bf16 %v742_v33, %v741_v32  ;;  %v743_v38 = vld [vmem:[%s1594_s18 + $0x50] sm:$0xff]  ;;  %v744_v39 = vld [vmem:[%s1594_s18 + $0x58] sm:$0xff]  ;;  %v318_v41 = vunpack.c.1.s8 %v302_v28  ;;  %v632_v47 = vld [vmem:[%s1550_s28 + $0x68] sm:$0xff]  ;;  %285 = vst.msk [vmem:[#allocation2 + $0x8] sm:$0xff] %vm283_vm0, %v1396_v35 }
  0x27   : > { %657 = vperm.xlu1 %1273, %v623_v48   ;;  %1275 = vrot.lane.b32.xlu0 %v1274_v57, %s1395_s17  ;;  %v348_v40 = vcvt.s32.f32 %v316_v30  ;;  %v1299_v44 = vpack.i.bf16 %v744_v39, %v743_v38  ;;  %v353_v48 = vcvt.s32.f32 %v321_v43  ;;  %v305_v50 = vld [vmem:[%s1539_s13 + $0x28] sm:$0xff]  ;;  %v634_v51 = vld [vmem:[%s1550_s28 + $0x78] sm:$0xff]  ;;  %v747_v52 = vld [vmem:[%s1594_s18 + $0x70] sm:$0xff]  ;;  %286 = vst.msk [vmem:[#allocation2 + $0x10] sm:$0xff] %vm283_vm0, %v1396_v35 }
  0x28   : > { %v350_v45 = vcvt.s32.f32 %v318_v41  ;;  %v748_v53 = vld [vmem:[%s1594_s18 + $0x78] sm:$0xff]  ;;  %v633_v56 = vld [vmem:[%s1550_s28 + $0x70] sm:$0xff]  ;;  %v745_v57 = vld [vmem:[%s1594_s18 + $0x60] sm:$0xff]  ;;  %v327_v3 = vunpack.c.1.s8 %v305_v50  ;;  %v329_v8 = vunpack.c.2.s8 %v305_v50  ;;  %287 = vst.msk [vmem:[#allocation2 + $0x18] sm:$0xff] %vm283_vm0, %v1396_v35 }
  0x29   : > { %1179 = vmatpush3.bf16.msra.mxu0 %v1178_v46  ;;  %v320_v46 = vunpack.c.2.s8 %v302_v28  ;;  %v746_v58 = vld [vmem:[%s1594_s18 + $0x68] sm:$0xff]  ;;  %v304_v61 = vld [vmem:[%s1539_s13 + $0x20] sm:$0xff]  ;;  %v1309_v62 = vpack.i.bf16 %v748_v53, %v747_v52  ;;  %288 = vst.msk [vmem:[#allocation2 + $0x20] sm:$0xff] %vm283_vm0, %v1396_v35  ;;  %289 = vst.msk [vmem:[#allocation2 + $0x28] sm:$0xff] %vm283_vm0, %v1396_v35  ;;  %s259_s18 = sand.u32 1, %s1376_s21  }
  0x2a   : > { %1181 = vmatprep.subr.bf16.mxu0 %v1180_v49  ;;  %v323_v49 = vunpack.c.3.s8 %v303_v20  ;;  %v1304_v63 = vpack.i.bf16 %v746_v58, %v745_v57  ;;  %v830_v6 = vld [vmem:[#allocation3] sm:$0x1]  ;;  %v361_v11 = vcvt.s32.f32 %v329_v8  ;;  %v330_v15 = vunpack.c.3.s8 %v304_v61  ;;  %290 = vst.msk [vmem:[#allocation2 + $0x30] sm:$0xff] %vm283_vm0, %v1396_v35  ;;  %291 = vst.msk [vmem:[#allocation2 + $0x38] sm:$0xff] %vm283_vm0, %v1396_v35  ;;  %s260_s19 = scalar_lea.vmem [#allocation4], %s259_s18  ;;  %s912_s8 = scalar_lea.sflag [#allocation5], %s259_s18 }
  0x2b   : > { %1280 = vrot.lane.b32.xlu1 %v1279_v1, %s1395_s17  ;;  %662 = vperm.xlu0 %1272, %v624_v0   ;;  %v352_v54 = vcvt.s32.f32 %v320_v46  ;;  %v324_v1 = vunpack.c.0.s8 %v304_v61  ;;  %292 = vst.msk [vmem:[#allocation2 + $0x40] sm:$0xff] %vm283_vm0, %v1396_v35  ;;  %293 = vst.msk [vmem:[#allocation2 + $0x48] sm:$0xff] %vm283_vm0, %v1396_v35  ;;  %s924_s4 = sshll.u32 %s260_s19, 4  ;;  %s1732_s4 = int_to_ptr.vmem [resolvable:$true] %s924_s4 }
  0x2c   : > { %v355_v59 = vcvt.s32.f32 %v323_v49  ;;  %v362_v19 = vcvt.s32.f32 %v330_v15  ;;  %294 = vst.msk [vmem:[#allocation2 + $0x50] sm:$0xff] %vm283_vm0, %v1396_v35  ;;  %295 = vst.msk [vmem:[#allocation2 + $0x58] sm:$0xff] %vm283_vm0, %v1396_v35  ;;  %s1314_s9 = scalar_lea.vmem %s1732_s4, 16  ;;  %p1321_p2 = scmp.lt.s32.totalorder %s1732_s4, %s1319_s11 }
  0x2d   : > { %1183 = vmatpush3.bf16.msra.mxu0 %v1182_v55  ;;  %v322_v55 = vunpack.c.3.s8 %v302_v28  ;;  %296 = vst.msk [vmem:[#allocation2 + $0x60] sm:$0xff] %vm283_vm0, %v1396_v35  ;;  %297 = vst.msk [vmem:[#allocation2 + $0x68] sm:$0xff] %vm283_vm0, %v1396_v35  ;;  %v407_v46 = vld [vmem:[#allocation2 + $0x8] sm:$0xff]  ;;  %p1315_p13 = scmp.ne.s32.totalorder %s1732_s4, %s1314_s9  ;;  %p1322_p3 = scmp.lt.s32.totalorder %s1320_s23, %s1314_s9 }
  0x2e   : > { %1185 = vmatprep.subr.bf16.mxu0 %v1184_v60  ;;  %v325_v60 = vunpack.c.0.s8 %v305_v50  ;;  %298 = vst.msk [vmem:[#allocation2 + $0x70] sm:$0xff] %vm283_vm0, %v1396_v35  ;;  %299 = vst.msk [vmem:[#allocation2 + $0x78] sm:$0xff] %vm283_vm0, %v1396_v35  ;;  %v408_v53 = vld [vmem:[#allocation2 + $0x10] sm:$0xff] }
  0x2f   : > { %672 = vperm.xlu1 %1273, %v626_v4   ;;  %667 = vperm.xlu0 %1272, %v625_v7   ;;  %v354_v0 = vcvt.s32.f32 %v322_v55  ;;  %v356_v4 = vcvt.s32.f32 %v324_v1  ;;  %v359_v7 = vcvt.s32.f32 %v327_v3  ;;  %p1316_p0 = pnand %p1315_p13, %p1473_p4  ;;  %p1323_p5 = por %p1322_p3, %p1321_p2 }
  0x30   : > { %v410_v3 = vld [vmem:[#allocation2 + $0x20] sm:$0xff] }
  0x31   : > { %1187 = vmatpush3.bf16.msra.mxu0 %v1186_v2  ;;  %v357_v2 = vcvt.s32.f32 %v325_v60  ;;  %p1317_p1 = pneg %p1316_p0 }
  0x33   : > { %677 = vperm.xlu1 %1273, %v627_v13   ;;  %1285 = vrot.lane.b32.xlu0 %v1284_v12, %s1395_s17  ;;  %v331_v12 = vunpack.c.3.s8 %v305_v50  ;;  %v307_v13 = vld [vmem:[%s1539_s13 + $0x38] sm:$0xff]  ;;  %p1324_p6 = pnand %p1323_p5, %p1317_p1 }
  0x34   : > { %487 = vmatmul.mubr.f32.vlgmr.msra.gmra.mrb[0].mxu0 %v340_v5  ;;  %v326_v5 = vunpack.c.1.s8 %v304_v61  ;;  %v333_v17 = vunpack.c.0.s8 %v307_v13  ;;  %v337_v26 = vunpack.c.2.s8 %v307_v13  ;;  %v339_v30 = vunpack.c.3.s8 %v307_v13 }
  0x35   : > { %491 = vmatprep.mubr.f32.mxu0 %v343_v10  ;;  %v328_v10 = vunpack.c.2.s8 %v304_v61 }
  0x36   : > { %v358_v9 = vcvt.s32.f32 %v326_v5  ;;  %v371_v33 = vcvt.s32.f32 %v339_v30 }
  0x37   : > { %1290 = vrot.lane.b32.xlu1 %v1289_v21, %s1395_s17  ;;  %682 = vperm.xlu0 %1272, %v628_v24   ;;  %v360_v14 = vcvt.s32.f32 %v328_v10  ;;  %v365_v21 = vcvt.s32.f32 %v333_v17 }
  0x38   : > { %492 = vmatmul.mubr.f32.gmra.mrb[2].mxu0 %v342_v16  ;;  %v363_v16 = vcvt.s32.f32 %v331_v12 }
  0x39   : > { %496 = vmatprep.mubr.f32.mxu0 %v345_v18  ;;  %v306_v18 = vld [vmem:[%s1539_s13 + $0x30] sm:$0xff] }
  0x3a   : > { %v332_v20 = vunpack.c.0.s8 %v306_v18  ;;  %v334_v24 = vunpack.c.1.s8 %v306_v18  ;;  %v338_v32 = vunpack.c.3.s8 %v306_v18 }
  0x3b   : > { %692 = vperm.xlu1 %1273, %v630_v27   ;;  %687 = vperm.xlu0 %1272, %v629_v31   ;;  %v336_v27 = vunpack.c.2.s8 %v306_v18 }
  0x3c   : > { %497 = vmatmul.mubr.f32.gmra.mrb[4].mxu0 %v344_v22  ;;  %v335_v22 = vunpack.c.1.s8 %v307_v13  ;;  %v364_v23 = vcvt.s32.f32 %v332_v20  ;;  %v366_v28 = vcvt.s32.f32 %v334_v24 }
  0x3d   : > { %501 = vmatprep.mubr.f32.mxu0 %v347_v25  ;;  %v368_v31 = vcvt.s32.f32 %v336_v27 }
  0x3e   : > { %v367_v25 = vcvt.s32.f32 %v335_v22 }
  0x3f   : > { %697 = vperm.xlu1 %1273, %v631_v37   ;;  %1295 = vrot.lane.b32.xlu0 %v1294_v36, %s1395_s17  ;;  %v1397_v36 = vmov 0.0|0.0  }
  0x40   : > { %502 = vmatmul.mubr.f32.gmra.mrb[6].mxu0 %v346_v29  ;;  %v369_v29 = vcvt.s32.f32 %v337_v26  ;;  %1188 = vmatprep.subr.bf16.mxu1 %v1397_v36 }
  0x41   : > { %506 = vmatprep.mubr.f32.mxu0 %v349_v34  ;;  %v370_v34 = vcvt.s32.f32 %v338_v32 }
  0x43   : > { %1300 = vrot.lane.b32.xlu1 %v1299_v44, %s1395_s17  ;;  %702 = vperm.xlu0 %1272, %v632_v47  }
  0x44   : > { %507 = vmatmul.mubr.f32.gmra.mrb[8].mxu0 %v348_v40  ;;  %v406_v40 = vld [vmem:[#allocation2] sm:$0xff] }
  0x45   : > { %511 = vmatprep.mubr.f32.mxu0 %v351_v42 }
  0x47   : > { %712 = vperm.xlu1 %1273, %v634_v51   ;;  %707 = vperm.xlu0 %1272, %v633_v56  }
  0x48   : > { %512 = vmatmul.mubr.f32.gmra.mrb[10].mxu0 %v350_v45 }
  0x49   : > { %516 = vmatprep.mubr.f32.mxu0 %v353_v48 }
  0x4b   : > { %1310 = vrot.lane.b32.xlu1 %v1309_v62, %s1395_s17  ;;  %1305 = vrot.lane.b32.xlu0 %v1304_v63, %s1395_s17 }
  0x4c   : > { %517 = vmatmul.mubr.f32.gmra.mrb[12].mxu0 %v352_v54 }
  0x4d   : > { %521 = vmatprep.mubr.f32.mxu0 %v355_v59  ;;  %v409_v59 = vld [vmem:[#allocation2 + $0x18] sm:$0xff] }
  0x4f   : > { %833 = vperm.xlu0 %1272, %v830_v6  }
  0x50   : > { %522 = vmatmul.mubr.f32.gmra.mrb[14].mxu0 %v354_v0 }
  0x51   : > { %526 = vmatprep.mubr.f32.mxu0 %v357_v2 }
  0x54   : > { %527 = vmatmul.mubr.f32.gmra.mrb[16].mxu0 %v356_v4 }
  0x55   : > { %531 = vmatprep.mubr.f32.mxu0 %v359_v7 }
  0x58   : > { %532 = vmatmul.mubr.f32.gmra.mrb[18].mxu0 %v358_v9 }
  0x59   : > { %536 = vmatprep.mubr.f32.mxu0 %v361_v11 }
  0x5c   : > { %537 = vmatmul.mubr.f32.gmra.mrb[20].mxu0 %v360_v14 }
  0x5d   : > { %541 = vmatprep.mubr.f32.mxu0 %v363_v16  ;;  %v411_v16 = vld [vmem:[#allocation2 + $0x28] sm:$0xff] }
  0x60   : > { %542 = vmatmul.mubr.f32.gmra.mrb[22].mxu0 %v362_v19 }
  0x61   : > { %546 = vmatprep.mubr.f32.mxu0 %v365_v21 }
  0x64   : > { %547 = vmatmul.mubr.f32.gmra.mrb[24].mxu0 %v364_v23 }
  0x65   : > { %551 = vmatprep.mubr.f32.mxu0 %v367_v25  ;;  %v412_v25 = vld [vmem:[#allocation2 + $0x30] sm:$0xff] }
  0x68   : > { %552 = vmatmul.mubr.f32.gmra.mrb[26].mxu0 %v366_v28 }
  0x69   : > { %556 = vmatprep.mubr.f32.mxu0 %v369_v29 }
  0x6c   : > { %557 = vmatmul.mubr.f32.gmra.mrb[28].mxu0 %v368_v31 }
  0x6d   : > { %561 = vmatprep.mubr.f32.mxu0 %v371_v33 }
  0x70   : > { %562 = vmatmul.mubr.f32.gmra.mrb[30].mxu0 %v370_v34 }
  0x9e   : > { %v638_v37 = vpop.permute.xlu0 %637  ;;  %v648_v39 = vpop.permute.xlu1 %647 }
  0xa2   : > { %v643_v43 = vpop.permute.xlu0 %642  ;;  %v653_v49 = vpop.permute.xlu1 %652 }
  0xa6   : > { %v1276_v52 = vpop.permute.xlu0 %1275  ;;  %v658_v58 = vpop.permute.xlu1 %657 }
  0xa7   : > { %v1278_v6 = vunpack.i.h.bf16 %v1276_v52  ;;  %v1277_v7 = vunpack.i.l.bf16 %v1276_v52 }
  0xaa   : > { %v1680_v63 = vpop.permute.xlu0 %662  ;;  %v1281_v10 = vpop.permute.xlu1 %1280 }
  0xab   : > { %v1283_v27 = vunpack.i.h.bf16 %v1281_v10  ;;  %v1282_v29 = vunpack.i.l.bf16 %v1281_v10 }
  0xae   : > { %v1685_v15 = vpop.permute.xlu0 %667  ;;  %v673_v24 = vpop.permute.xlu1 %672 }
  0xb2   : > { %v1286_v32 = vpop.permute.xlu0 %1285 }
  0xb3   : > { %v1287_v52 = vunpack.i.l.bf16 %v1286_v32 }
 0x107   : > { %v1056_v38 = vpop.f32.mrb[0].mxu0 }
 0x108   : > { %v1057_v41 = vpop.f32.mrb[1].mxu0 }
 0x109   : > { %v1058_v42 = vadd.f32 %v1057_v41, %v1056_v38  ;;  %v413_v38 = vld [vmem:[#allocation2 + $0x38] sm:$0xff] }
 0x10b   : > { %v567_v44 = vadd.f32 %v1058_v42, %v406_v40  ;;  %v1059_v45 = vpop.f32.mrb[2].mxu0 }
 0x10c   : > { %v1060_v47 = vpop.f32.mrb[3].mxu0 }
 0x10d   : > { %584 = vst.msk [vmem:[#allocation2] sm:$0xff] %vm283_vm0, %v567_v44  ;;  %v1061_v48 = vadd.f32 %v1060_v47, %v1059_v45  ;;  %v683_v47 = vpop.permute.xlu0 %682 }
 0x10f   : > { %v568_v50 = vadd.f32 %v1061_v48, %v407_v46  ;;  %v1062_v51 = vpop.f32.mrb[4].mxu0  ;;  %v414_v48 = vld [vmem:[#allocation2 + $0x40] sm:$0xff] }
 0x110   : > { %v1063_v54 = vpop.f32.mrb[5].mxu0 }
 0x111   : > { %585 = vst.msk [vmem:[#allocation2 + $0x8] sm:$0xff] %vm283_vm0, %v568_v50  ;;  %v1064_v55 = vadd.f32 %v1063_v54, %v1062_v51  ;;  %v1288_v51 = vunpack.i.h.bf16 %v1286_v32 }
 0x113   : > { %v569_v56 = vadd.f32 %v1064_v55, %v408_v53  ;;  %v1065_v57 = vpop.f32.mrb[6].mxu0 }
 0x114   : > { %v1066_v60 = vpop.f32.mrb[7].mxu0  ;;  %v603_v61 = vld [vmem:[#allocation2] sm:$0xff] }
 0x115   : > { %586 = vst.msk [vmem:[#allocation2 + $0x10] sm:$0xff] %vm283_vm0, %v569_v56  ;;  %v1067_v62 = vadd.f32 %v1066_v60, %v1065_v57  ;;  %v715_v2 = vmul.f32 %v638_v37, %v603_v61  ;;  %v415_v61 = vld [vmem:[#allocation2 + $0x48] sm:$0xff] }
 0x117   : > { %v570_v0 = vadd.f32 %v1067_v62, %v409_v59  ;;  %v1068_v1 = vpop.f32.mrb[8].mxu0  ;;  %v813_v13 = vsel %vm283_vm0, %v715_v2, %v1277_v7  ;;  %v688_v2 = vpop.permute.xlu0 %687 }
 0x118   : > { %v1069_v4 = vpop.f32.mrb[9].mxu0  ;;  %v604_v5 = vld [vmem:[#allocation2 + $0x8] sm:$0xff] }
 0x119   : > { %587 = vst.msk [vmem:[#allocation2 + $0x18] sm:$0xff] %vm283_vm0, %v570_v0  ;;  %v1070_v8 = vadd.f32 %v1069_v4, %v1068_v1  ;;  %v716_v9 = vmul.f32 %v643_v43, %v604_v5  ;;  %v678_v43 = vpop.permute.xlu1 %677  ;;  %v416_v5 = vld [vmem:[#allocation2 + $0x50] sm:$0xff] }
 0x11b   : > { %v571_v11 = vadd.f32 %v1070_v8, %v410_v3  ;;  %v1071_v12 = vpop.f32.mrb[10].mxu0  ;;  %v814_v14 = vsel %vm283_vm0, %v716_v9, %v1278_v6 }
 0x11c   : > { %v1072_v17 = vpop.f32.mrb[11].mxu0  ;;  %v1189_v18 = vpack.c.bf16 %v814_v14, %v813_v13  ;;  %v605_v19 = vld [vmem:[#allocation2 + $0x10] sm:$0xff] }
 0x11d   : > { %588 = vst.msk [vmem:[#allocation2 + $0x20] sm:$0xff] %vm283_vm0, %v571_v11  ;;  %v1073_v20 = vadd.f32 %v1072_v17, %v1071_v12  ;;  %v717_v23 = vmul.f32 %v648_v39, %v605_v19  ;;  %v1291_v60 = vpop.permute.xlu1 %1290  ;;  %v417_v19 = vld [vmem:[#allocation2 + $0x58] sm:$0xff] }
 0x11e   : > { %1190 = vmatpush3.bf16.xpose.msra.mxu1 %v1189_v18  ;;  %v1293_v8 = vunpack.i.h.bf16 %v1291_v60  ;;  %v1292_v9 = vunpack.i.l.bf16 %v1291_v60  ;;  %v1296_v18 = vpop.permute.xlu0 %1295 }
 0x11f   : > { %v572_v21 = vadd.f32 %v1073_v20, %v411_v16  ;;  %v1074_v22 = vpop.f32.mrb[12].mxu0  ;;  %1191 = vmatprep.subr.bf16.mxu1 %v1397_v36  ;;  %v815_v35 = vsel %vm283_vm0, %v717_v23, %v1282_v29 }
 0x120   : > { %v1075_v26 = vpop.f32.mrb[13].mxu0  ;;  %v606_v28 = vld [vmem:[#allocation2 + $0x18] sm:$0xff] }
 0x121   : > { %589 = vst.msk [vmem:[#allocation2 + $0x28] sm:$0xff] %vm283_vm0, %v572_v21  ;;  %v1076_v30 = vadd.f32 %v1075_v26, %v1074_v22  ;;  %v718_v31 = vmul.f32 %v653_v49, %v606_v28  ;;  %v693_v12 = vpop.permute.xlu1 %692  ;;  %v418_v28 = vld [vmem:[#allocation2 + $0x60] sm:$0xff] }
 0x123   : > { %v573_v33 = vadd.f32 %v1076_v30, %v412_v25  ;;  %v1077_v34 = vpop.f32.mrb[14].mxu0  ;;  %v816_v37 = vsel %vm283_vm0, %v718_v31, %v1283_v27  ;;  %v1298_v30 = vunpack.i.h.bf16 %v1296_v18  ;;  %v1297_v31 = vunpack.i.l.bf16 %v1296_v18 }
 0x124   : > { %v1078_v40 = vpop.f32.mrb[15].mxu0  ;;  %v1192_v39 = vpack.c.bf16 %v816_v37, %v815_v35  ;;  %v607_v41 = vld [vmem:[#allocation2 + $0x20] sm:$0xff] }
 0x125   : > { %590 = vst.msk [vmem:[#allocation2 + $0x30] sm:$0xff] %vm283_vm0, %v573_v33  ;;  %v1079_v42 = vadd.f32 %v1078_v40, %v1077_v34  ;;  %v719_v46 = vmul.f32 %v658_v58, %v607_v41  ;;  %v698_v26 = vpop.permute.xlu1 %697  ;;  %v703_v34 = vpop.permute.xlu0 %702 }
 0x126   : > { %1193 = vmatpush3.bf16.xpose.msra.mxu1 %v1192_v39  ;;  %v419_v39 = vld [vmem:[#allocation2 + $0x68] sm:$0xff] }
 0x127   : > { %v574_v44 = vadd.f32 %v1079_v42, %v413_v38  ;;  %v1080_v45 = vpop.f32.mrb[16].mxu0  ;;  %1194 = vmatprep.subr.bf16.mxu1 %v1397_v36  ;;  %v817_v57 = vsel %vm283_vm0, %v719_v46, %v1287_v52 }
 0x128   : > { %v1081_v49 = vpop.f32.mrb[17].mxu0  ;;  %v608_v50 = vld [vmem:[#allocation2 + $0x28] sm:$0xff] }
 0x129   : > { %591 = vst.msk [vmem:[#allocation2 + $0x38] sm:$0xff] %vm283_vm0, %v574_v44  ;;  %v1082_v53 = vadd.f32 %v1081_v49, %v1080_v45  ;;  %v720_v54 = vmul.f32 %v1680_v63, %v608_v50  ;;  %v1301_v45 = vpop.permute.xlu1 %1300  ;;  %v708_v50 = vpop.permute.xlu0 %707 }
 0x12a   : > { %v1302_v46 = vunpack.i.l.bf16 %v1301_v45 }
 0x12b   : > { %v575_v55 = vadd.f32 %v1082_v53, %v414_v48  ;;  %v1083_v56 = vpop.f32.mrb[18].mxu0  ;;  %v818_v59 = vsel %vm283_vm0, %v720_v54, %v1288_v51  ;;  %v420_v51 = vld [vmem:[#allocation2 + $0x70] sm:$0xff]  ;;  %v1303_v54 = vunpack.i.h.bf16 %v1301_v45 }
 0x12c   : > { %v1084_v58 = vpop.f32.mrb[19].mxu0  ;;  %v1195_v62 = vpack.c.bf16 %v818_v59, %v817_v57  ;;  %v609_v0 = vld [vmem:[#allocation2 + $0x30] sm:$0xff] }
 0x12d   : > { %592 = vst.msk [vmem:[#allocation2 + $0x40] sm:$0xff] %vm283_vm0, %v575_v55  ;;  %v1085_v1 = vadd.f32 %v1084_v58, %v1083_v56  ;;  %v721_v63 = vmul.f32 %v1685_v15, %v609_v0  ;;  %v421_v58 = vld [vmem:[#allocation2 + $0x78] sm:$0xff] }
 0x12e   : > { %1196 = vmatpush3.bf16.xpose.msra.mxu1 %v1195_v62 }
 0x12f   : > { %v576_v3 = vadd.f32 %v1085_v1, %v415_v61  ;;  %v1086_v4 = vpop.f32.mrb[20].mxu0  ;;  %1197 = vmatprep.subr.bf16.mxu1 %v1397_v36  ;;  %v819_v16 = vsel %vm283_vm0, %v721_v63, %v1292_v9 }
 0x130   : > { %v1087_v6 = vpop.f32.mrb[21].mxu0  ;;  %v610_v7 = vld [vmem:[#allocation2 + $0x38] sm:$0xff] }
 0x131   : > { %593 = vst.msk [vmem:[#allocation2 + $0x48] sm:$0xff] %vm283_vm0, %v576_v3  ;;  %v1088_v10 = vadd.f32 %v1087_v6, %v1086_v4  ;;  %v722_v11 = vmul.f32 %v673_v24, %v610_v7  ;;  %v1306_v3 = vpop.permute.xlu0 %1305  ;;  %v713_v7 = vpop.permute.xlu1 %712 }
 0x132   : > { %v1308_v4 = vunpack.i.h.bf16 %v1306_v3  ;;  %v1307_v63 = vunpack.i.l.bf16 %v1306_v3 }
 0x133   : > { %v577_v13 = vadd.f32 %v1088_v10, %v416_v5  ;;  %v1089_v14 = vpop.f32.mrb[22].mxu0  ;;  %v820_v17 = vsel %vm283_vm0, %v722_v11, %v1293_v8 }
 0x134   : > { %v1090_v20 = vpop.f32.mrb[23].mxu0  ;;  %v1198_v15 = vpack.c.bf16 %v820_v17, %v819_v16  ;;  %v611_v21 = vld [vmem:[#allocation2 + $0x40] sm:$0xff] }
 0x135   : > { %594 = vst.msk [vmem:[#allocation2 + $0x50] sm:$0xff] %vm283_vm0, %v577_v13  ;;  %v1091_v22 = vadd.f32 %v1090_v20, %v1089_v14  ;;  %v723_v24 = vmul.f32 %v678_v43, %v611_v21 }
 0x136   : > { %1199 = vmatpush3.bf16.xpose.msra.mxu1 %v1198_v15 }
 0x137   : > { %v578_v23 = vadd.f32 %v1091_v22, %v417_v19  ;;  %v1092_v25 = vpop.f32.mrb[24].mxu0  ;;  %1200 = vmatprep.subr.bf16.mxu1 %v1397_v36  ;;  %v821_v38 = vsel %vm283_vm0, %v723_v24, %v1297_v31 }
 0x138   : > { %v1093_v27 = vpop.f32.mrb[25].mxu0  ;;  %v612_v29 = vld [vmem:[#allocation2 + $0x48] sm:$0xff] }
 0x139   : > { %595 = vst.msk [vmem:[#allocation2 + $0x58] sm:$0xff] %vm283_vm0, %v578_v23  ;;  %v1094_v32 = vadd.f32 %v1093_v27, %v1092_v25  ;;  %v724_v33 = vmul.f32 %v683_v47, %v612_v29  ;;  %v829_v23 = vld [vmem:[%s1780_s3] sm:$0x1]  ;;  %v836_v25 = vlaneseq }
 0x13b   : > { %v579_v35 = vadd.f32 %v1094_v32, %v418_v28  ;;  %v1095_v37 = vpop.f32.mrb[26].mxu0  ;;  %v822_v40 = vsel %vm283_vm0, %v724_v33, %v1298_v30  ;;  %v837_v24 = vshrl.u32 %v836_v25, 7 }
 0x13c   : > { %v1096_v41 = vpop.f32.mrb[27].mxu0  ;;  %v1201_v42 = vpack.c.bf16 %v822_v40, %v821_v38  ;;  %v613_v43 = vld [vmem:[#allocation2 + $0x50] sm:$0xff] }
 0x13d   : > { %596 = vst.msk [vmem:[#allocation2 + $0x60] sm:$0xff] %vm283_vm0, %v579_v35  ;;  %v1097_v44 = vadd.f32 %v1096_v41, %v1095_v37  ;;  %v725_v47 = vmul.f32 %v688_v2, %v613_v43 }
 0x13e   : > { %1202 = vmatpush3.bf16.xpose.msra.mxu1 %v1201_v42 }
 0x13f   : > { %v580_v48 = vadd.f32 %v1097_v44, %v419_v39  ;;  %v1098_v49 = vpop.f32.mrb[28].mxu0  ;;  %1203 = vmatprep.subr.bf16.mxu1 %v1397_v36  ;;  %v823_v60 = vsel %vm283_vm0, %v725_v47, %v1302_v46 }
 0x140   : > { %v1099_v52 = vpop.f32.mrb[29].mxu0  ;;  %v614_v53 = vld [vmem:[#allocation2 + $0x58] sm:$0xff] }
 0x141   : > { %597 = vst.msk [vmem:[#allocation2 + $0x68] sm:$0xff] %vm283_vm0, %v580_v48  ;;  %v1100_v55 = vadd.f32 %v1099_v52, %v1098_v49  ;;  %v726_v56 = vmul.f32 %v693_v12, %v614_v53  ;;  %v1311_v12 = vpop.permute.xlu1 %1310 }
 0x142   : > { %v1313_v16 = vunpack.i.h.bf16 %v1311_v12  ;;  %v1312_v17 = vunpack.i.l.bf16 %v1311_v12 }
 0x143   : > { %v581_v57 = vadd.f32 %v1100_v55, %v420_v51  ;;  %v1101_v59 = vpop.f32.mrb[30].mxu0  ;;  %v824_v61 = vsel %vm283_vm0, %v726_v56, %v1303_v54 }
 0x144   : > { %v1102_v62 = vpop.f32.mrb[31].mxu0  ;;  %v1204_v0 = vpack.c.bf16 %v824_v61, %v823_v60  ;;  %v615_v1 = vld [vmem:[#allocation2 + $0x60] sm:$0xff] }
 0x145   : > { %598 = vst.msk [vmem:[#allocation2 + $0x70] sm:$0xff] %vm283_vm0, %v581_v57  ;;  %v1103_v2 = vadd.f32 %v1102_v62, %v1101_v59  ;;  %v727_v6 = vmul.f32 %v698_v26, %v615_v1  ;;  %v834_v26 = vpop.permute.xlu0 %833 }
 0x146   : > { %1205 = vmatpush3.bf16.xpose.msra.mxu1 %v1204_v0 }
 0x147   : > { %v582_v5 = vadd.f32 %v1103_v2, %v421_v58  ;;  %1206 = vmatprep.subr.bf16.mxu1 %v1397_v36  ;;  %v825_v10 = vsel %vm283_vm0, %v727_v6, %v1307_v63 }
 0x148   : > { %v616_v8 = vld [vmem:[#allocation2 + $0x68] sm:$0xff] }
 0x149   : > { %599 = vst.msk [vmem:[#allocation2 + $0x78] sm:$0xff] %vm283_vm0, %v582_v5  ;;  %v728_v9 = vmul.f32 %v703_v34, %v616_v8 }
 0x14b   : > { %v826_v11 = vsel %vm283_vm0, %v728_v9, %v1308_v4 }
 0x14c   : > { %v1207_v13 = vpack.c.bf16 %v826_v11, %v825_v10  ;;  %v617_v14 = vld [vmem:[#allocation2 + $0x70] sm:$0xff] }
 0x14d   : > { %v729_v18 = vmul.f32 %v708_v50, %v617_v14 }
 0x14e   : > { %1208 = vmatpush3.bf16.xpose.msra.mxu1 %v1207_v13 }
 0x14f   : > { %1209 = vmatprep.subr.bf16.mxu1 %v1397_v36  ;;  %v827_v15 = vsel %vm283_vm0, %v729_v18, %v1312_v17  ;;  %v838_v36 = vsub.s32 0, %v837_v24 }
 0x150   : > { %v618_v19 = vld [vmem:[#allocation2 + $0x78] sm:$0xff] }
 0x151   : > { %v730_v20 = vmul.f32 %v713_v7, %v618_v19  ;;  %v839_v28 = vrot.slane %v834_v26, %v838_v36 }
 0x153   : > { %v828_v21 = vsel %vm283_vm0, %v730_v20, %v1313_v16 }
 0x154   : > { %v1210_v22 = vpack.c.bf16 %v828_v21, %v827_v15 }
 0x156   : > { %1211 = vmatpush3.bf16.xpose.msra.mxu1 %v1210_v22 }
 0x15d   : > { %1154 = vmatmul.mubr.f32.vlgmr.msra.gmra.mrb[0].mxu1 %v829_v23 }
 0x230   : > { %v906_v27 = vpop.f32.mrb[0].mxu1 }
 0x231   : > { %v907_v29 = vadd.f32 %v906_v27, %v839_v28  ;;  %v1155_v30 = vpop.f32.mrb[1].mxu1 }
 0x233   : > { %910 = vst [vmem:[%s260_s19] sm:$0x1] %v907_v29 }
 0x234   : > { %1327 = shalt.err (!%p1324_p6)
}
 0x235   : > { %s1328_s15 = scalar_lea.hbm %s1730_s16, 16  ;;  %s1332_s17 = scalar_lea.hbm %s1782_s5, 32 }
 0x236   : > { %p1329_p7 = scmp.ne.s32.totalorder %s1730_s16, %s1328_s15  ;;  %p1333_p11 = scmp.lt.u32.totalorder %s1730_s16, %s1782_s5 }
 0x237   : > { %p1334_p12 = scmp.lt.u32.totalorder %s1332_s17, %s1328_s15  ;;  %p1336_p0 = scmp.lt.u32.totalorder %s1328_s15, %s1730_s16 }
 0x238   : > { %p1330_p9 = pnand %p1329_p7, %p1473_p4 }
 0x239   : > { %p1335_p13 = por %p1334_p12, %p1333_p11 }
 0x23a   : > { %p1331_p10 = pneg %p1330_p9 }
 0x23b   : > { %p1337_p1 = por %p1336_p0, %p1335_p13 }
 0x23d   : > { %p1338_p2 = pnand %p1337_p1, %p1331_p10 }
 0x23f   : > { %1341 = shalt.err (!%p1338_p2)
}
 0x240   : > { %1212 = dma.vmem_to_hbm [thread:$0]  (%p1473_p4), %s1732_s4, 16, %s1730_s16, %s912_s8  }
 0x241 PF: > { %p1218_p3 = scmp.ge.s32.totalorder %s1392_s25, 2  ;;  %s936_s18 = sand.u32 1, %s1372_s20  }
 0x242   : > { %s937_s19 = scalar_lea.sflag [#allocation5], %s936_s18 }
 0x243   : > { %p1215_p5 = pnand %p1218_p3, %p1480_p8 }
 0x245   : > { %1367 = dma.done.wait (!%p1215_p5), %s937_s19, 16  }
 0x246   : > { %1369 = vsyncadd (!%p1215_p5), %s937_s19, 4294967280  ;;  %s20_s25 = sadd.s32 1, %s1392_s25   ;;  %s1785_s20 = smov %s1376_s21 }
 0x247   : > { %p17_p6 = scmp.ge.s32.totalorder %s20_s25, 4   ;;  %s1786_s21 = smov %s1380_s22 }
 0x248   : > { %s1787_s22 = smov %s1486_s7  ;;  %s1788_s23 = smov %s1388_s24 }
 0x249   : > { %s1789_s24 = smov %s1791_s27  ;;  %19 = sbr.rel (!%p17_p6) target bundleno = 7 (0x7), region = 88 }
 0x250   :  { %941 = vsyncpa [#allocation5], 1 }
 0x251   :  { %943 = vsyncpa [#allocation5 + $0x1], 1 }

// kernel: fwd.4
= control target key start
LH: loop header
LB: loop body
LE: loop exit
PB: predicated region body
PF: predicated region fallthrough
CT: control target
= control target key end

     0   :  { %s1486_s18 = smov 0   ;;  %s1488_s19 = smov 0   ;;  %s1886_s0 = inlined_call_operand.vmem [shape: s8[256,256], index: 0, kind: input, shape index: {}]   ;;  %s1887_s1 = inlined_call_operand.vmem [shape: f32[256,32], index: 1, kind: input, shape index: {}]   ;;  %s1888_s2 = inlined_call_operand.vmem [shape: f32[256,1], index: 2, kind: input, shape index: {}]   ;;  %s1889_s3 = inlined_call_operand.vmem [shape: f32[64,64], index: 3, kind: input, shape index: {}]   ;;  %s1890_s4 = inlined_call_operand.vmem [shape: f32[1,64], index: 4, kind: input, shape index: {}]   ;;  %s1891_s5 = inlined_call_operand.vmem [shape: f32[256,64], index: 5, kind: output, shape index: {}]  }
   0x1   :  { %s1490_s20 = smov 0  }
   0x2 LB: > { %s27_s21 = sadd.s32 1, %s1447_s19  ;;  %p1163_p0 = scmp.ge.s32.totalorder %s1451_s20, 1  ;;  %s1451_s20 = sphi %s1490_s20, %s15_s20   ;;  %s1447_s19 = sphi %s1488_s19, %s1893_s19   ;;  %s1443_s18 = sphi %s1486_s18, %s1892_s18  }
   0x3   : > { %p29_p1 = scmp.ge.s32.totalorder %s27_s21, 2  ;;  %p219_p2 = scmp.lt.s32.totalorder %s1451_s20, 3 }
   0x5   : > { %s1895_s21 = smov (%p29_p1, %s27_s21), 0  ;;  %p220_p3 = pnand %p1163_p0, %p219_p2 }
   0x6   : > { %v392_v0 = vld [vmem:[%s1887_s1 + $0x80] sm:$0xff] (!%p220_p3)  ;;  %v393_v1 = vld [vmem:[%s1887_s1 + $0x88] sm:$0xff] (!%p220_p3)  ;;  %s1164_s28 = sshll.u32 (!%p220_p3), %s1443_s18, 2  ;;  %s1167_s29 = sshll.u32 (!%p220_p3), %s1443_s18, 4  ;;  %v394_v5 = vld [vmem:[%s1887_s1 + $0x90] sm:$0xff] (!%p220_p3)  ;;  %v1453_v7 = vmov (!%p220_p3), 0  }
   0x7   : > { %223 = sbr.rel (%p220_p3) target bundleno = 539 (0x21b), region = 40  ;;  %v376_v2 = vld [vmem:[%s1887_s1] sm:$0xff] (!%p220_p3)  ;;  %v1336_v3 = vpack.c.bf16 (!%p220_p3), %v393_v1, %v392_v0  ;;  %v377_v4 = vld [vmem:[%s1887_s1 + $0x8] sm:$0xff] (!%p220_p3)  ;;  %v395_v6 = vld [vmem:[%s1887_s1 + $0x98] sm:$0xff] (!%p220_p3)  ;;  %p259_p4 = scmp.lt.s32.totalorder (!%p220_p3), %s1164_s28, 7  ;;  %1427 = vset.pattern.permute.xlu0 (!%p220_p3), %v1453_v7  ;;  %1428 = vset.pattern.permute.xlu1 (!%p220_p3), %v1453_v7  ;;  %vm285_vm0 = vcmask (!%p220_p3), 261120  }
   0x8   : > { %p270_p5 = scmp.lt.s32.totalorder (!%p220_p3), %s1167_s29, 31  ;;  %v1338_v8 = vpack.c.bf16 (!%p220_p3), %v377_v4, %v376_v2  ;;  %v1340_v9 = vpack.c.bf16 (!%p220_p3), %v395_v6, %v394_v5  ;;  %v378_v10 = vld [vmem:[%s1887_s1 + $0x10] sm:$0xff] (!%p220_p3)  ;;  %v379_v11 = vld [vmem:[%s1887_s1 + $0x18] sm:$0xff] (!%p220_p3)  ;;  %v396_v12 = vld [vmem:[%s1887_s1 + $0xa0] sm:$0xff] (!%p220_p3)  ;;  %s1171_s17 = sshll.u32 (!%p220_p3), %s1443_s18, 7  ;;  %vm846_vm1 = vcmask (!%p220_p3), 523264  }
   0x9   : > { %1337 = vmatprep.subr.bf16.mxu0 (!%p220_p3), %v1336_v3  ;;  %1384 = vmatprep.subr.bf16.mxu1 (!%p220_p3), %v1336_v3  ;;  %v397_v13 = vld [vmem:[%s1887_s1 + $0xa8] sm:$0xff] (!%p220_p3)  ;;  %v1342_v14 = vpack.c.bf16 (!%p220_p3), %v379_v11, %v378_v10  ;;  %v380_v16 = vld [vmem:[%s1887_s1 + $0x20] sm:$0xff] (!%p220_p3)  ;;  %v398_v18 = vld [vmem:[%s1887_s1 + $0xb0] sm:$0xff] (!%p220_p3)  ;;  %s1619_s18 = scalar_lea.vmem (!%p220_p3), %s1887_s1, %s1171_s17  ;;  %s1454_s23 = smov (!%p220_p3), 32  }
   0xa   : > { %1339 = vmatpush3.bf16.msra.mxu0 (!%p220_p3), %v1338_v8  ;;  %1392 = vmatpush3.bf16.msra.mxu1 (!%p220_p3), %v1338_v8  ;;  %v1344_v15 = vpack.c.bf16 (!%p220_p3), %v397_v13, %v396_v12  ;;  %v381_v17 = vld [vmem:[%s1887_s1 + $0x28] sm:$0xff] (!%p220_p3)  ;;  %v399_v19 = vld [vmem:[%s1887_s1 + $0xb8] sm:$0xff] (!%p220_p3)  ;;  %v382_v22 = vld [vmem:[%s1887_s1 + $0x30] sm:$0xff] (!%p220_p3) }
   0xb   : > { %1341 = vmatprep.subr.bf16.mxu0 (!%p220_p3), %v1340_v9  ;;  %1385 = vmatprep.subr.bf16.mxu1 (!%p220_p3), %v1340_v9  ;;  %v1346_v20 = vpack.c.bf16 (!%p220_p3), %v381_v17, %v380_v16  ;;  %v1348_v21 = vpack.c.bf16 (!%p220_p3), %v399_v19, %v398_v18  ;;  %v383_v23 = vld [vmem:[%s1887_s1 + $0x38] sm:$0xff] (!%p220_p3)  ;;  %v400_v24 = vld [vmem:[%s1887_s1 + $0xc0] sm:$0xff] (!%p220_p3)  ;;  %v401_v25 = vld [vmem:[%s1887_s1 + $0xc8] sm:$0xff] (!%p220_p3) }
   0xc   : > { %v1350_v29 = vpack.c.bf16 (!%p220_p3), %v383_v23, %v382_v22  ;;  %v384_v30 = vld [vmem:[%s1887_s1 + $0x40] sm:$0xff] (!%p220_p3)  ;;  %v1352_v32 = vpack.c.bf16 (!%p220_p3), %v401_v25, %v400_v24  ;;  %v385_v33 = vld [vmem:[%s1887_s1 + $0x48] sm:$0xff] (!%p220_p3)  ;;  %v402_v37 = vld [vmem:[%s1887_s1 + $0xd0] sm:$0xff] (!%p220_p3) }
   0xd   : > { %v403_v38 = vld [vmem:[%s1887_s1 + $0xd8] sm:$0xff] (!%p220_p3)  ;;  %v1354_v41 = vpack.c.bf16 (!%p220_p3), %v385_v33, %v384_v30  ;;  %v386_v44 = vld [vmem:[%s1887_s1 + $0x50] sm:$0xff] (!%p220_p3)  ;;  %v404_v46 = vld [vmem:[%s1887_s1 + $0xe0] sm:$0xff] (!%p220_p3) }
   0xe   : > { %s1897_s28 = smov (!%p259_p4, %s1164_s28), 7  ;;  %s1899_s29 = smov (!%p270_p5, %s1167_s29), 31  ;;  %1343 = vmatpush3.bf16.msra.mxu0 %v1342_v14  ;;  %1393 = vmatpush3.bf16.msra.mxu1 %v1342_v14  ;;  %v1356_v43 = vpack.c.bf16 %v403_v38, %v402_v37  ;;  %v387_v45 = vld [vmem:[%s1887_s1 + $0x58] sm:$0xff]  ;;  %v405_v47 = vld [vmem:[%s1887_s1 + $0xe8] sm:$0xff]  ;;  %v388_v52 = vld [vmem:[%s1887_s1 + $0x60] sm:$0xff] }
   0xf   : > { %s1191_s27 = sshll.u32 %s1897_s28, 4  ;;  %s1168_s12 = sshll.u32 %s1899_s29, 3  ;;  %1345 = vmatprep.subr.bf16.mxu0 %v1344_v15  ;;  %1386 = vmatprep.subr.bf16.mxu1 %v1344_v15  ;;  %v1358_v49 = vpack.c.bf16 %v387_v45, %v386_v44  ;;  %v1360_v51 = vpack.c.bf16 %v405_v47, %v404_v46  ;;  %v389_v53 = vld [vmem:[%s1887_s1 + $0x68] sm:$0xff]  ;;  %v406_v54 = vld [vmem:[%s1887_s1 + $0xf0] sm:$0xff]  ;;  %v407_v55 = vld [vmem:[%s1887_s1 + $0xf8] sm:$0xff] }
  0x10   : > { %s1555_s11 = scalar_lea.vmem %s1886_s0, %s1191_s27  ;;  %s1578_s26 = scalar_lea.vmem %s1888_s2, %s1168_s12  ;;  %v735_v56 = vld [vmem:[%s1619_s18] sm:$0xff]  ;;  %v1362_v57 = vpack.c.bf16 %v389_v53, %v388_v52  ;;  %v736_v60 = vld [vmem:[%s1619_s18 + $0x8] sm:$0xff]  ;;  %v1364_v61 = vpack.c.bf16 %v407_v55, %v406_v54  ;;  %v390_v62 = vld [vmem:[%s1887_s1 + $0x70] sm:$0xff] }
  0x11   : > { %v1571_v26 = vld [vmem:[%s1555_s11 + $0x8] sm:$0xff]  ;;  %v1582_v28 = vld [vmem:[%s1555_s11 + $0x38] sm:$0xff]  ;;  %v621_v35 = vld [vmem:[%s1578_s26] sm:$0xff] }
  0x12   : > { %v311_v27 = vunpack.c.0.s8 %v1571_v26  ;;  %1347 = vmatpush3.bf16.msra.mxu0 %v1346_v20  ;;  %1394 = vmatpush3.bf16.msra.mxu1 %v1346_v20  ;;  %v335_v31 = vunpack.c.0.s8 %v1582_v28  ;;  %v623_v36 = vld [vmem:[%s1578_s26 + $0x10] sm:$0xff]  ;;  %v622_v40 = vld [vmem:[%s1578_s26 + $0x8] sm:$0xff]  ;;  %v624_v42 = vld [vmem:[%s1578_s26 + $0x18] sm:$0xff]  ;;  %v313_v4 = vunpack.c.1.s8 %v1571_v26  ;;  %v337_v5 = vunpack.c.1.s8 %v1582_v28 }
  0x13   : > { %1349 = vmatprep.subr.bf16.mxu0 %v1348_v21  ;;  %1387 = vmatprep.subr.bf16.mxu1 %v1348_v21  ;;  %v625_v48 = vld [vmem:[%s1578_s26 + $0x20] sm:$0xff]  ;;  %v626_v50 = vld [vmem:[%s1578_s26 + $0x28] sm:$0xff]  ;;  %v1638_v59 = vld [vmem:[%s1555_s11 + $0x30] sm:$0xff]  ;;  %v315_v14 = vunpack.c.2.s8 %v1571_v26  ;;  %v339_v15 = vunpack.c.2.s8 %v1582_v28  ;;  %v317_v24 = vunpack.c.3.s8 %v1571_v26  ;;  %v341_v25 = vunpack.c.3.s8 %v1582_v28 }
  0x14   : > { %v343_v34 = vcvt.s32.f32 %v311_v27  ;;  %v367_v39 = vcvt.s32.f32 %v335_v31  ;;  %639 = vperm.xlu0 %1427, %v621_v35   ;;  %649 = vperm.xlu1 %1428, %v623_v36   ;;  %v1635_v58 = vld [vmem:[%s1555_s11] sm:$0xff]  ;;  %v391_v63 = vld [vmem:[%s1887_s1 + $0x78] sm:$0xff]  ;;  %v334_v1 = vunpack.c.0.s8 %v1638_v59  ;;  %v627_v2 = vld [vmem:[%s1578_s26 + $0x30] sm:$0xff]  ;;  %v336_v10 = vunpack.c.1.s8 %v1638_v59 }
  0x15   : > { %v310_v0 = vunpack.c.0.s8 %v1635_v58  ;;  %v1366_v3 = vpack.c.bf16 %v391_v63, %v390_v62  ;;  %v628_v6 = vld [vmem:[%s1578_s26 + $0x38] sm:$0xff]  ;;  %v312_v9 = vunpack.c.1.s8 %v1635_v58  ;;  %v737_v11 = vld [vmem:[%s1619_s18 + $0x10] sm:$0xff]  ;;  %v345_v12 = vcvt.s32.f32 %v313_v4  ;;  %v629_v21 = vld [vmem:[%s1578_s26 + $0x40] sm:$0xff] }
  0x16   : > { %488 = vmatprep.mubr.f32.mxu0 %v343_v34  ;;  %1351 = vmatpush3.bf16.msra.mxu0 %v1350_v29  ;;  %v366_v8 = vcvt.s32.f32 %v334_v1  ;;  %v369_v13 = vcvt.s32.f32 %v337_v5  ;;  %v738_v16 = vld [vmem:[%s1619_s18 + $0x18] sm:$0xff]  ;;  %v368_v18 = vcvt.s32.f32 %v336_v10  ;;  %v314_v19 = vunpack.c.2.s8 %v1635_v58  ;;  %v739_v34 = vld [vmem:[%s1619_s18 + $0x20] sm:$0xff]  ;;  %v304_v36 = vld [vmem:[%s1555_s11 + $0x10] sm:$0xff] }
  0x17   : > { %1395 = vmatpush3.bf16.msra.mxu1 %v1350_v29  ;;  %1353 = vmatprep.subr.bf16.mxu0 %v1352_v32  ;;  %v342_v7 = vcvt.s32.f32 %v310_v0  ;;  %v344_v17 = vcvt.s32.f32 %v312_v9  ;;  %v338_v20 = vunpack.c.2.s8 %v1638_v59  ;;  %v347_v22 = vcvt.s32.f32 %v315_v14  ;;  %v305_v27 = vld [vmem:[%s1555_s11 + $0x18] sm:$0xff]  ;;  %v630_v29 = vld [vmem:[%s1578_s26 + $0x48] sm:$0xff]  ;;  %v741_v47 = vld [vmem:[%s1619_s18 + $0x30] sm:$0xff] }
  0x18   : > { %1388 = vmatprep.subr.bf16.mxu1 %v1352_v32  ;;  %548 = vmatprep.mubr.f32.mxu1 %v367_v39  ;;  %v371_v23 = vcvt.s32.f32 %v339_v15  ;;  %v346_v30 = vcvt.s32.f32 %v314_v19  ;;  %v316_v32 = vunpack.c.3.s8 %v1635_v58  ;;  %v340_v33 = vunpack.c.3.s8 %v1638_v59  ;;  %v740_v37 = vld [vmem:[%s1619_s18 + $0x28] sm:$0xff]  ;;  %v632_v44 = vld [vmem:[%s1578_s26 + $0x58] sm:$0xff]  ;;  %v633_v53 = vld [vmem:[%s1578_s26 + $0x60] sm:$0xff] }
  0x19   : > { %644 = vperm.xlu0 %1427, %v622_v40   ;;  %654 = vperm.xlu1 %1428, %v624_v42   ;;  %v370_v31 = vcvt.s32.f32 %v338_v20  ;;  %v349_v26 = vcvt.s32.f32 %v317_v24  ;;  %v373_v28 = vcvt.s32.f32 %v341_v25  ;;  %v319_v35 = vunpack.c.0.s8 %v305_v27  ;;  %v306_v63 = vld [vmem:[%s1555_s11 + $0x20] sm:$0xff]  ;;  %v744_v0 = vld [vmem:[%s1619_s18 + $0x48] sm:$0xff]  ;;  %v745_v9 = vld [vmem:[%s1619_s18 + $0x50] sm:$0xff] }
  0x1a   : > { %1355 = vmatpush3.bf16.msra.mxu0 %v1354_v41  ;;  %v348_v38 = vcvt.s32.f32 %v316_v32  ;;  %v372_v39 = vcvt.s32.f32 %v340_v33  ;;  %v318_v40 = vunpack.c.0.s8 %v304_v36  ;;  %v320_v46 = vunpack.c.1.s8 %v304_v36  ;;  %v747_v15 = vld [vmem:[%s1619_s18 + $0x60] sm:$0xff]  ;;  %v834_v32 = vld [vmem:[%s1889_s3 + $0x18] sm:$0xff] }
  0x1b   : > { %1396 = vmatpush3.bf16.msra.mxu1 %v1354_v41  ;;  %1357 = vmatprep.subr.bf16.mxu0 %v1356_v43  ;;  %v631_v41 = vld [vmem:[%s1578_s26 + $0x50] sm:$0xff]  ;;  %v351_v42 = vcvt.s32.f32 %v319_v35  ;;  %v322_v52 = vunpack.c.2.s8 %v304_v36  ;;  %v325_v55 = vunpack.c.3.s8 %v305_v27  ;;  %v324_v59 = vunpack.c.3.s8 %v304_v36  ;;  %v838_v36 = vld [vmem:[%s1889_s3 + $0x38] sm:$0xff] }
  0x1c   : > { %1389 = vmatprep.subr.bf16.mxu1 %v1356_v43  ;;  %v321_v43 = vunpack.c.1.s8 %v305_v27  ;;  %v350_v45 = vcvt.s32.f32 %v318_v40  ;;  %v330_v14 = vunpack.c.2.s8 %v306_v63  ;;  %v332_v20 = vunpack.c.3.s8 %v306_v63  ;;  %v837_v35 = vld [vmem:[%s1889_s3 + $0x30] sm:$0xff] }
  0x1d   : > { %659 = vperm.xlu0 %1427, %v625_v48   ;;  %664 = vperm.xlu1 %1428, %v626_v50   ;;  %v742_v50 = vld [vmem:[%s1619_s18 + $0x38] sm:$0xff]  ;;  %v354_v58 = vcvt.s32.f32 %v322_v52  ;;  %v356_v1 = vcvt.s32.f32 %v324_v59  ;;  %v1455_v25 = vmov 0.0  }
  0x1e   : > { %1359 = vmatpush3.bf16.msra.mxu0 %v1358_v49  ;;  %v353_v48 = vcvt.s32.f32 %v321_v43  ;;  %v362_v19 = vcvt.s32.f32 %v330_v14  ;;  %v364_v24 = vcvt.s32.f32 %v332_v20  ;;  %286 = vst.msk [vmem:[#allocation2] sm:$0xff] %vm285_vm0, %v1455_v25  ;;  %287 = vst.msk [vmem:[#allocation2 + $0x8] sm:$0xff] %vm285_vm0, %v1455_v25 }
  0x1f   : > { %1397 = vmatpush3.bf16.msra.mxu1 %v1358_v49  ;;  %1361 = vmatprep.subr.bf16.mxu0 %v1360_v51  ;;  %v323_v49 = vunpack.c.2.s8 %v305_v27  ;;  %288 = vst.msk [vmem:[#allocation2 + $0x10] sm:$0xff] %vm285_vm0, %v1455_v25  ;;  %289 = vst.msk [vmem:[#allocation2 + $0x18] sm:$0xff] %vm285_vm0, %v1455_v25  ;;  %v831_v27 = vld [vmem:[%s1889_s3] sm:$0xff] }
  0x20   : > { %1390 = vmatprep.subr.bf16.mxu1 %v1360_v51  ;;  %v352_v51 = vcvt.s32.f32 %v320_v46  ;;  %290 = vst.msk [vmem:[#allocation2 + $0x20] sm:$0xff] %vm285_vm0, %v1455_v25  ;;  %291 = vst.msk [vmem:[#allocation2 + $0x28] sm:$0xff] %vm285_vm0, %v1455_v25 }
  0x21   : > { %767 = vrot.lane.b32.xlu0 %v735_v56, %s1454_s23  ;;  %769 = vrot.lane.b32.xlu1 %v736_v60, %s1454_s23  ;;  %v355_v54 = vcvt.s32.f32 %v323_v49  ;;  %v307_v56 = vld [vmem:[%s1555_s11 + $0x28] sm:$0xff]  ;;  %v743_v60 = vld [vmem:[%s1619_s18 + $0x40] sm:$0xff]  ;;  %292 = vst.msk [vmem:[#allocation2 + $0x30] sm:$0xff] %vm285_vm0, %v1455_v25  ;;  %293 = vst.msk [vmem:[#allocation2 + $0x38] sm:$0xff] %vm285_vm0, %v1455_v25  ;;  %s1843_s11 = scalar_lea.vmem %s1891_s5, %s1168_s12 }
  0x22   : > { %1363 = vmatpush3.bf16.msra.mxu0 %v1362_v57  ;;  %v327_v62 = vunpack.c.0.s8 %v307_v56  ;;  %v329_v5 = vunpack.c.1.s8 %v307_v56  ;;  %294 = vst.msk [vmem:[#allocation2 + $0x40] sm:$0xff] %vm285_vm0, %v1455_v25  ;;  %295 = vst.msk [vmem:[#allocation2 + $0x48] sm:$0xff] %vm285_vm0, %v1455_v25 }
  0x23   : > { %1398 = vmatpush3.bf16.msra.mxu1 %v1362_v57  ;;  %1365 = vmatprep.subr.bf16.mxu0 %v1364_v61  ;;  %v634_v57 = vld [vmem:[%s1578_s26 + $0x68] sm:$0xff]  ;;  %296 = vst.msk [vmem:[#allocation2 + $0x50] sm:$0xff] %vm285_vm0, %v1455_v25  ;;  %297 = vst.msk [vmem:[#allocation2 + $0x58] sm:$0xff] %vm285_vm0, %v1455_v25 }
  0x24   : > { %1391 = vmatprep.subr.bf16.mxu1 %v1364_v61  ;;  %v357_v61 = vcvt.s32.f32 %v325_v55  ;;  %v359_v4 = vcvt.s32.f32 %v327_v62  ;;  %v361_v10 = vcvt.s32.f32 %v329_v5  ;;  %298 = vst.msk [vmem:[#allocation2 + $0x60] sm:$0xff] %vm285_vm0, %v1455_v25  ;;  %299 = vst.msk [vmem:[#allocation2 + $0x68] sm:$0xff] %vm285_vm0, %v1455_v25 }
  0x25   : > { %669 = vperm.xlu0 %1427, %v627_v2   ;;  %674 = vperm.xlu1 %1428, %v628_v6   ;;  %v326_v2 = vunpack.c.0.s8 %v306_v63  ;;  %v636_v6 = vld [vmem:[%s1578_s26 + $0x78] sm:$0xff]  ;;  %300 = vst.msk [vmem:[#allocation2 + $0x70] sm:$0xff] %vm285_vm0, %v1455_v25  ;;  %301 = vst.msk [vmem:[#allocation2 + $0x78] sm:$0xff] %vm285_vm0, %v1455_v25 }
  0x26   : > { %1367 = vmatpush3.bf16.msra.mxu0 %v1366_v3 }
  0x27   : > { %1399 = vmatpush3.bf16.msra.mxu1 %v1366_v3  ;;  %v635_v3 = vld [vmem:[%s1578_s26 + $0x70] sm:$0xff] }
  0x29   : > { %771 = vrot.lane.b32.xlu0 %v737_v11, %s1454_s23  ;;  %489 = vmatmul.mubr.f32.vlgmr.msra.gmra.mrb[0].mxu0 %v342_v7  ;;  %v358_v7 = vcvt.s32.f32 %v326_v2  ;;  %v331_v11 = vunpack.c.2.s8 %v307_v56 }
  0x2a   : > { %549 = vmatmul.mubr.f32.vlgmr.msra.gmra.mrb[0].mxu1 %v366_v8  ;;  %493 = vmatprep.mubr.f32.mxu0 %v345_v12  ;;  %v328_v8 = vunpack.c.1.s8 %v306_v63  ;;  %v746_v12 = vld [vmem:[%s1619_s18 + $0x58] sm:$0xff] }
  0x2b   : > { %553 = vmatprep.mubr.f32.mxu1 %v369_v13  ;;  %773 = vrot.lane.b32.xlu1 %v738_v16, %s1454_s23  ;;  %v363_v16 = vcvt.s32.f32 %v331_v11  ;;  %v420_v52 = vld [vmem:[#allocation2 + $0x60] sm:$0xff]  ;;  %v421_v63 = vld [vmem:[#allocation2 + $0x68] sm:$0xff] }
  0x2c   : > { %v360_v13 = vcvt.s32.f32 %v328_v8  ;;  %v410_v8 = vld [vmem:[#allocation2 + $0x10] sm:$0xff] }
  0x2d   : > { %679 = vperm.xlu0 %1427, %v629_v21   ;;  %494 = vmatmul.mubr.f32.gmra.mrb[2].mxu0 %v344_v17  ;;  %v333_v17 = vunpack.c.3.s8 %v307_v56  ;;  %v749_v21 = vld [vmem:[%s1619_s18 + $0x70] sm:$0xff] }
  0x2e   : > { %554 = vmatmul.mubr.f32.gmra.mrb[2].mxu1 %v368_v18  ;;  %498 = vmatprep.mubr.f32.mxu0 %v347_v22  ;;  %v748_v18 = vld [vmem:[%s1619_s18 + $0x68] sm:$0xff] }
  0x2f   : > { %558 = vmatprep.mubr.f32.mxu1 %v371_v23  ;;  %684 = vperm.xlu1 %1428, %v630_v29   ;;  %v365_v22 = vcvt.s32.f32 %v333_v17  ;;  %v750_v23 = vld [vmem:[%s1619_s18 + $0x78] sm:$0xff]  ;;  %v832_v29 = vld [vmem:[%s1889_s3 + $0x8] sm:$0xff] }
  0x31   : > { %775 = vrot.lane.b32.xlu0 %v739_v34, %s1454_s23  ;;  %499 = vmatmul.mubr.f32.gmra.mrb[4].mxu0 %v346_v30  ;;  %v1368_v30 = vpack.c.bf16 %v832_v29, %v831_v27  ;;  %v835_v34 = vld [vmem:[%s1889_s3 + $0x20] sm:$0xff] }
  0x32   : > { %559 = vmatmul.mubr.f32.gmra.mrb[4].mxu1 %v370_v31  ;;  %503 = vmatprep.mubr.f32.mxu0 %v349_v26  ;;  %v833_v31 = vld [vmem:[%s1889_s3 + $0x10] sm:$0xff]  ;;  %v836_v26 = vld [vmem:[%s1889_s3 + $0x28] sm:$0xff] }
  0x33   : > { %563 = vmatprep.mubr.f32.mxu1 %v373_v28  ;;  %777 = vrot.lane.b32.xlu1 %v740_v37, %s1454_s23  ;;  %v1372_v33 = vpack.c.bf16 %v834_v32, %v833_v31  ;;  %v1376_v28 = vpack.c.bf16 %v836_v26, %v835_v34  ;;  %v1380_v37 = vpack.c.bf16 %v838_v36, %v837_v35  ;;  %v412_v26 = vld [vmem:[#allocation2 + $0x20] sm:$0xff] }
  0x34   : > { %1369 = vmatprep.subr.bf16.mxu1 %v1368_v30 }
  0x35   : > { %689 = vperm.xlu0 %1427, %v631_v41   ;;  %504 = vmatmul.mubr.f32.gmra.mrb[6].mxu0 %v348_v38 }
  0x36   : > { %564 = vmatmul.mubr.f32.gmra.mrb[6].mxu1 %v372_v39  ;;  %508 = vmatprep.mubr.f32.mxu0 %v351_v42 }
  0x37   : > { %694 = vperm.xlu1 %1428, %v632_v44   ;;  %1371 = vmatpush3.bf16.msra.mxu1 %v1368_v30 }
  0x38   : > { %1373 = vmatprep.subr.bf16.mxu1 %v1372_v33 }
  0x39   : > { %779 = vrot.lane.b32.xlu0 %v741_v47, %s1454_s23  ;;  %509 = vmatmul.mubr.f32.gmra.mrb[8].mxu0 %v350_v45 }
  0x3a   : > { %513 = vmatprep.mubr.f32.mxu0 %v353_v48 }
  0x3b   : > { %781 = vrot.lane.b32.xlu1 %v742_v50, %s1454_s23  ;;  %1375 = vmatpush3.bf16.msra.mxu1 %v1372_v33  ;;  %v408_v50 = vld [vmem:[#allocation2] sm:$0xff] }
  0x3c   : > { %1377 = vmatprep.subr.bf16.mxu1 %v1376_v28 }
  0x3d   : > { %699 = vperm.xlu0 %1427, %v633_v53   ;;  %514 = vmatmul.mubr.f32.gmra.mrb[10].mxu0 %v352_v51 }
  0x3e   : > { %518 = vmatprep.mubr.f32.mxu0 %v355_v54 }
  0x3f   : > { %704 = vperm.xlu1 %1428, %v634_v57   ;;  %1379 = vmatpush3.bf16.msra.mxu1 %v1376_v28 }
  0x40   : > { %1381 = vmatprep.subr.bf16.mxu1 %v1380_v37 }
  0x41   : > { %783 = vrot.lane.b32.xlu0 %v743_v60, %s1454_s23  ;;  %519 = vmatmul.mubr.f32.gmra.mrb[12].mxu0 %v354_v58 }
  0x42   : > { %523 = vmatprep.mubr.f32.mxu0 %v357_v61  ;;  %v409_v61 = vld [vmem:[#allocation2 + $0x8] sm:$0xff] }
  0x43   : > { %785 = vrot.lane.b32.xlu1 %v744_v0, %s1454_s23  ;;  %1383 = vmatpush3.bf16.msra.mxu1 %v1380_v37 }
  0x45   : > { %709 = vperm.xlu0 %1427, %v635_v3   ;;  %524 = vmatmul.mubr.f32.gmra.mrb[14].mxu0 %v356_v1 }
  0x46   : > { %528 = vmatprep.mubr.f32.mxu0 %v359_v4 }
  0x47   : > { %714 = vperm.xlu1 %1428, %v636_v6  }
  0x49   : > { %787 = vrot.lane.b32.xlu0 %v745_v9, %s1454_s23  ;;  %529 = vmatmul.mubr.f32.gmra.mrb[16].mxu0 %v358_v7 }
  0x4a   : > { %533 = vmatprep.mubr.f32.mxu0 %v361_v10  ;;  %v422_v10 = vld [vmem:[#allocation2 + $0x70] sm:$0xff] }
  0x4b   : > { %789 = vrot.lane.b32.xlu1 %v746_v12, %s1454_s23 }
  0x4d   : > { %791 = vrot.lane.b32.xlu0 %v747_v15, %s1454_s23  ;;  %534 = vmatmul.mubr.f32.gmra.mrb[18].mxu0 %v360_v13 }
  0x4e   : > { %538 = vmatprep.mubr.f32.mxu0 %v363_v16 }
  0x4f   : > { %793 = vrot.lane.b32.xlu1 %v748_v18, %s1454_s23 }
  0x51   : > { %795 = vrot.lane.b32.xlu0 %v749_v21, %s1454_s23  ;;  %539 = vmatmul.mubr.f32.gmra.mrb[20].mxu0 %v362_v19  ;;  %v411_v19 = vld [vmem:[#allocation2 + $0x18] sm:$0xff] }
  0x52   : > { %543 = vmatprep.mubr.f32.mxu0 %v365_v22  ;;  %v423_v21 = vld [vmem:[#allocation2 + $0x78] sm:$0xff] }
  0x53   : > { %797 = vrot.lane.b32.xlu1 %v750_v23, %s1454_s23 }
  0x55   : > { %544 = vmatmul.mubr.f32.gmra.mrb[22].mxu0 %v364_v24 }
  0x93   : > { %v640_v38 = vpop.permute.xlu0 %639  ;;  %v1745_v39 = vpop.permute.xlu1 %649 }
  0x98   : > { %v1747_v40 = vpop.permute.xlu0 %644  ;;  %v1749_v41 = vpop.permute.xlu1 %654 }
  0x9c   : > { %v1751_v42 = vpop.permute.xlu0 %659  ;;  %v1753_v43 = vpop.permute.xlu1 %664 }
  0xa0   : > { %v768_v44 = vpop.permute.xlu0 %767  ;;  %v1755_v45 = vpop.permute.xlu1 %769 }
  0xa4   : > { %v1757_v46 = vpop.permute.xlu0 %669  ;;  %v1759_v47 = vpop.permute.xlu1 %674 }
  0xa8   : > { %v1761_v56 = vpop.permute.xlu0 %771  ;;  %v1765_v3 = vpop.permute.xlu1 %773 }
  0xac   : > { %v1767_v12 = vpop.permute.xlu0 %679 }
  0xae   : > { %v1773_v29 = vpop.permute.xlu1 %684 }
  0xb0   : > { %v776_v30 = vpop.permute.xlu0 %775 }
  0xfc   : > { %v1224_v48 = vpop.f32.mrb[0].mxu0 }
  0xfd   : > { %v1260_v49 = vpop.f32.mrb[0].mxu1  ;;  %v1225_v51 = vpop.f32.mrb[1].mxu0 }
  0xfe   : > { %v1261_v53 = vpop.f32.mrb[1].mxu1  ;;  %v1226_v54 = vadd.f32 %v1225_v51, %v1224_v48  ;;  %v413_v51 = vld [vmem:[#allocation2 + $0x28] sm:$0xff] }
  0xff   : > { %v1262_v55 = vadd.f32 %v1261_v53, %v1260_v49  ;;  %v1783_v53 = vpop.permute.xlu0 %689 }
 0x100   : > { %v569_v57 = vadd.f32 %v1226_v54, %v408_v50  ;;  %v1227_v59 = vpop.f32.mrb[2].mxu0  ;;  %v778_v50 = vpop.permute.xlu1 %777 }
 0x101   : > { %v581_v58 = vadd.f32 %v1262_v55, %v420_v52  ;;  %v1263_v60 = vpop.f32.mrb[2].mxu1  ;;  %v1228_v62 = vpop.f32.mrb[3].mxu0 }
 0x102   : > { %v1264_v0 = vpop.f32.mrb[3].mxu1  ;;  %586 = vst.msk [vmem:[#allocation2] sm:$0xff] %vm285_vm0, %v569_v57  ;;  %v1229_v1 = vadd.f32 %v1228_v62, %v1227_v59  ;;  %v414_v59 = vld [vmem:[#allocation2 + $0x30] sm:$0xff] }
 0x103   : > { %598 = vst.msk [vmem:[#allocation2 + $0x60] sm:$0xff] %vm285_vm0, %v581_v58  ;;  %v1265_v2 = vadd.f32 %v1264_v0, %v1263_v60  ;;  %v780_v0 = vpop.permute.xlu0 %779 }
 0x104   : > { %v570_v4 = vadd.f32 %v1229_v1, %v409_v61  ;;  %v1230_v6 = vpop.f32.mrb[4].mxu0 }
 0x105   : > { %v582_v5 = vadd.f32 %v1265_v2, %v421_v63  ;;  %v1266_v7 = vpop.f32.mrb[4].mxu1  ;;  %v1231_v9 = vpop.f32.mrb[5].mxu0 }
 0x106   : > { %v1267_v11 = vpop.f32.mrb[5].mxu1  ;;  %587 = vst.msk [vmem:[#allocation2 + $0x8] sm:$0xff] %vm285_vm0, %v570_v4  ;;  %v1232_v13 = vadd.f32 %v1231_v9, %v1230_v6  ;;  %v1792_v63 = vpop.permute.xlu1 %694  ;;  %v415_v4 = vld [vmem:[#allocation2 + $0x38] sm:$0xff] }
 0x107   : > { %599 = vst.msk [vmem:[#allocation2 + $0x68] sm:$0xff] %vm285_vm0, %v582_v5  ;;  %v1268_v14 = vadd.f32 %v1267_v11, %v1266_v7  ;;  %v416_v11 = vld [vmem:[#allocation2 + $0x40] sm:$0xff] }
 0x108   : > { %v571_v15 = vadd.f32 %v1232_v13, %v410_v8  ;;  %v1233_v17 = vpop.f32.mrb[6].mxu0 }
 0x109   : > { %v583_v16 = vadd.f32 %v1268_v14, %v422_v10  ;;  %v1269_v18 = vpop.f32.mrb[6].mxu1  ;;  %v1234_v20 = vpop.f32.mrb[7].mxu0  ;;  %v605_v23 = vld [vmem:[#allocation2] sm:$0xff] }
 0x10a   : > { %v1270_v22 = vpop.f32.mrb[7].mxu1  ;;  %588 = vst.msk [vmem:[#allocation2 + $0x10] sm:$0xff] %vm285_vm0, %v571_v15  ;;  %v1235_v24 = vadd.f32 %v1234_v20, %v1233_v17  ;;  %v717_v27 = vmul.f32 %v640_v38, %v605_v23  ;;  %v782_v10 = vpop.permute.xlu1 %781 }
 0x10b   : > { %600 = vst.msk [vmem:[#allocation2 + $0x70] sm:$0xff] %vm285_vm0, %v583_v16  ;;  %v1271_v25 = vadd.f32 %v1270_v22, %v1269_v18  ;;  %v700_v14 = vpop.permute.xlu0 %699 }
 0x10c   : > { %v572_v31 = vadd.f32 %v1235_v24, %v411_v19  ;;  %v1236_v33 = vpop.f32.mrb[8].mxu0  ;;  %v815_v34 = vsel %vm285_vm0, %v717_v27, %v768_v44  ;;  %v417_v19 = vld [vmem:[#allocation2 + $0x48] sm:$0xff] }
 0x10d   : > { %v584_v32 = vadd.f32 %v1271_v25, %v423_v21  ;;  %v1237_v28 = vpop.f32.mrb[9].mxu0  ;;  %1312 = vmatprep.mubr.msk.f32.mxu1 %vm846_vm1, %v815_v34  ;;  %v606_v35 = vld [vmem:[#allocation2 + $0x8] sm:$0xff] }
 0x10e   : > { %589 = vst.msk [vmem:[#allocation2 + $0x18] sm:$0xff] %vm285_vm0, %v572_v31  ;;  %v1238_v36 = vadd.f32 %v1237_v28, %v1236_v33  ;;  %v718_v37 = vmul.f32 %v1747_v40, %v606_v35  ;;  %v705_v24 = vpop.permute.xlu1 %704  ;;  %v418_v31 = vld [vmem:[#allocation2 + $0x50] sm:$0xff] }
 0x10f   : > { %601 = vst.msk [vmem:[#allocation2 + $0x78] sm:$0xff] %vm285_vm0, %v584_v32  ;;  %v784_v25 = vpop.permute.xlu0 %783 }
 0x110   : > { %v573_v38 = vadd.f32 %v1238_v36, %v412_v26  ;;  %v1239_v48 = vpop.f32.mrb[10].mxu0  ;;  %v816_v49 = vsel %vm285_vm0, %v718_v37, %v1755_v45  ;;  %v419_v37 = vld [vmem:[#allocation2 + $0x58] sm:$0xff] }
 0x111   : > { %v1240_v44 = vpop.f32.mrb[11].mxu0  ;;  %1313 = vmatmul.mubr.msk.f32.vlgmr.msra.gmra.mrb[8].mxu1 %vm846_vm1, %v816_v49  ;;  %v607_v52 = vld [vmem:[#allocation2 + $0x10] sm:$0xff] }
 0x112   : > { %590 = vst.msk [vmem:[#allocation2 + $0x20] sm:$0xff] %vm285_vm0, %v573_v38  ;;  %v1241_v54 = vadd.f32 %v1240_v44, %v1239_v48  ;;  %v719_v55 = vmul.f32 %v1745_v39, %v607_v52  ;;  %v786_v36 = vpop.permute.xlu1 %785 }
 0x113   : > { %v710_v49 = vpop.permute.xlu0 %709 }
 0x114   : > { %v574_v57 = vadd.f32 %v1241_v54, %v413_v51  ;;  %v1242_v40 = vpop.f32.mrb[12].mxu0  ;;  %v817_v58 = vsel %vm285_vm0, %v719_v55, %v1761_v56 }
 0x115   : > { %v1243_v45 = vpop.f32.mrb[13].mxu0  ;;  %1315 = vmatprep.mubr.msk.f32.mxu1 %vm846_vm1, %v817_v58  ;;  %v608_v60 = vld [vmem:[#allocation2 + $0x18] sm:$0xff] }
 0x116   : > { %591 = vst.msk [vmem:[#allocation2 + $0x28] sm:$0xff] %vm285_vm0, %v574_v57  ;;  %v1244_v61 = vadd.f32 %v1243_v45, %v1242_v40  ;;  %v720_v62 = vmul.f32 %v1749_v41, %v608_v60  ;;  %v715_v55 = vpop.permute.xlu1 %714 }
 0x117   : > { %v788_v57 = vpop.permute.xlu0 %787 }
 0x118   : > { %v575_v1 = vadd.f32 %v1244_v61, %v414_v59  ;;  %v1245_v39 = vpop.f32.mrb[14].mxu0  ;;  %v818_v2 = vsel %vm285_vm0, %v720_v62, %v1765_v3  ;;  %v617_v59 = vld [vmem:[#allocation2 + $0x60] sm:$0xff]  ;;  %v618_v62 = vld [vmem:[#allocation2 + $0x68] sm:$0xff] }
 0x119   : > { %v1246_v56 = vpop.f32.mrb[15].mxu0  ;;  %1316 = vmatmul.mubr.msk.f32.gmra.mrb[10].mxu1 %vm846_vm1, %v818_v2  ;;  %v609_v5 = vld [vmem:[#allocation2 + $0x20] sm:$0xff]  ;;  %v729_v61 = vmul.f32 %v700_v14, %v617_v59  ;;  %v730_v2 = vmul.f32 %v705_v24, %v618_v62 }
 0x11a   : > { %592 = vst.msk [vmem:[#allocation2 + $0x30] sm:$0xff] %vm285_vm0, %v575_v1  ;;  %v1247_v6 = vadd.f32 %v1246_v56, %v1245_v39  ;;  %v721_v7 = vmul.f32 %v1751_v42, %v609_v5  ;;  %v790_v45 = vpop.permute.xlu1 %789 }
 0x11b   : > { %v792_v1 = vpop.permute.xlu0 %791 }
 0x11c   : > { %v576_v8 = vadd.f32 %v1247_v6, %v415_v4  ;;  %v1248_v41 = vpop.f32.mrb[16].mxu0  ;;  %v819_v9 = vsel %vm285_vm0, %v721_v7, %v776_v30  ;;  %v827_v56 = vsel %vm285_vm0, %v729_v61, %v792_v1 }
 0x11d   : > { %v1249_v13 = vpop.f32.mrb[17].mxu0  ;;  %1318 = vmatprep.mubr.msk.f32.mxu1 %vm846_vm1, %v819_v9  ;;  %v610_v3 = vld [vmem:[#allocation2 + $0x28] sm:$0xff] }
 0x11e   : > { %593 = vst.msk [vmem:[#allocation2 + $0x38] sm:$0xff] %vm285_vm0, %v576_v8  ;;  %v1250_v15 = vadd.f32 %v1249_v13, %v1248_v41  ;;  %v722_v16 = vmul.f32 %v1753_v43, %v610_v3  ;;  %v794_v5 = vpop.permute.xlu1 %793 }
 0x11f   : > { %v796_v7 = vpop.permute.xlu0 %795  ;;  %v828_v8 = vsel %vm285_vm0, %v730_v2, %v794_v5 }
 0x120   : > { %v577_v17 = vadd.f32 %v1250_v15, %v416_v11  ;;  %v1251_v18 = vpop.f32.mrb[18].mxu0  ;;  %v820_v42 = vsel %vm285_vm0, %v722_v16, %v778_v50  ;;  %v1172_v11 = vld [vmem:[%s1890_s4] ss:$0 sm:$0xff] }
 0x121   : > { %v1252_v20 = vpop.f32.mrb[19].mxu0  ;;  %1319 = vmatmul.mubr.msk.f32.gmra.mrb[12].mxu1 %vm846_vm1, %v820_v42  ;;  %v611_v21 = vld [vmem:[#allocation2 + $0x30] sm:$0xff] }
 0x122   : > { %594 = vst.msk [vmem:[#allocation2 + $0x40] sm:$0xff] %vm285_vm0, %v577_v17  ;;  %v1253_v22 = vadd.f32 %v1252_v20, %v1251_v18  ;;  %v723_v23 = vmul.f32 %v1757_v46, %v611_v21 }
 0x124   : > { %v578_v27 = vadd.f32 %v1253_v22, %v417_v19  ;;  %v1254_v30 = vpop.f32.mrb[20].mxu0  ;;  %v821_v43 = vsel %vm285_vm0, %v723_v23, %v780_v0 }
 0x125   : > { %v1255_v32 = vpop.f32.mrb[21].mxu0  ;;  %1321 = vmatprep.mubr.msk.f32.mxu1 %vm846_vm1, %v821_v43  ;;  %v612_v33 = vld [vmem:[#allocation2 + $0x38] sm:$0xff] }
 0x126   : > { %595 = vst.msk [vmem:[#allocation2 + $0x48] sm:$0xff] %vm285_vm0, %v578_v27  ;;  %v1256_v34 = vadd.f32 %v1255_v32, %v1254_v30  ;;  %v724_v26 = vmul.f32 %v1759_v47, %v612_v33 }
 0x128   : > { %v579_v28 = vadd.f32 %v1256_v34, %v418_v31  ;;  %v1257_v35 = vpop.f32.mrb[22].mxu0  ;;  %v822_v46 = vsel %vm285_vm0, %v724_v26, %v782_v10 }
 0x129   : > { %v1258_v38 = vpop.f32.mrb[23].mxu0  ;;  %1322 = vmatmul.mubr.msk.f32.gmra.mrb[14].mxu1 %vm846_vm1, %v822_v46  ;;  %v613_v48 = vld [vmem:[#allocation2 + $0x40] sm:$0xff] }
 0x12a   : > { %596 = vst.msk [vmem:[#allocation2 + $0x50] sm:$0xff] %vm285_vm0, %v579_v28  ;;  %v1259_v50 = vadd.f32 %v1258_v38, %v1257_v35  ;;  %v725_v51 = vmul.f32 %v1767_v12, %v613_v48 }
 0x12c   : > { %v580_v44 = vadd.f32 %v1259_v50, %v419_v37  ;;  %v823_v52 = vsel %vm285_vm0, %v725_v51, %v784_v25 }
 0x12d   : > { %1324 = vmatprep.mubr.msk.f32.mxu1 %vm846_vm1, %v823_v52  ;;  %v614_v47 = vld [vmem:[#allocation2 + $0x48] sm:$0xff] }
 0x12e   : > { %597 = vst.msk [vmem:[#allocation2 + $0x58] sm:$0xff] %vm285_vm0, %v580_v44  ;;  %v726_v54 = vmul.f32 %v1773_v29, %v614_v47  ;;  %v619_v29 = vld [vmem:[#allocation2 + $0x70] sm:$0xff] }
 0x12f   : > { %v731_v6 = vmul.f32 %v710_v49, %v619_v29 }
 0x130   : > { %v824_v40 = vsel %vm285_vm0, %v726_v54, %v786_v36 }
 0x131   : > { %1325 = vmatmul.mubr.msk.f32.gmra.mrb[16].mxu1 %vm846_vm1, %v824_v40  ;;  %v615_v58 = vld [vmem:[#allocation2 + $0x50] sm:$0xff]  ;;  %v829_v9 = vsel %vm285_vm0, %v731_v6, %v796_v7 }
 0x132   : > { %v727_v12 = vmul.f32 %v1783_v53, %v615_v58  ;;  %v620_v53 = vld [vmem:[#allocation2 + $0x78] sm:$0xff] }
 0x133   : > { %v732_v41 = vmul.f32 %v715_v55, %v620_v53 }
 0x134   : > { %v825_v60 = vsel %vm285_vm0, %v727_v12, %v788_v57 }
 0x135   : > { %1327 = vmatprep.mubr.msk.f32.mxu1 %vm846_vm1, %v825_v60  ;;  %v616_v0 = vld [vmem:[#allocation2 + $0x58] sm:$0xff] }
 0x136   : > { %v728_v39 = vmul.f32 %v1792_v63, %v616_v0  ;;  %v798_v63 = vpop.permute.xlu1 %797 }
 0x137   : > { %v830_v10 = vsel %vm285_vm0, %v732_v41, %v798_v63 }
 0x138   : > { %v826_v4 = vsel %vm285_vm0, %v728_v39, %v790_v45 }
 0x139   : > { %1328 = vmatmul.mubr.msk.f32.gmra.mrb[18].mxu1 %vm846_vm1, %v826_v4 }
 0x13a   : > { %1330 = vmatprep.mubr.msk.f32.mxu1 %vm846_vm1, %v827_v56 }
 0x13d   : > { %1331 = vmatmul.mubr.msk.f32.gmra.mrb[20].mxu1 %vm846_vm1, %v828_v8 }
 0x13e   : > { %1333 = vmatprep.mubr.msk.f32.mxu1 %vm846_vm1, %v829_v9 }
 0x141   : > { %1334 = vmatmul.mubr.msk.f32.gmra.mrb[22].mxu1 %vm846_vm1, %v830_v10 }
 0x1e4   : > { %v1314_v13 = vpop.f32.mrb[8].mxu1 }
 0x1e5   : > { %v967_v3 = vadd.f32 %v1314_v13, %v1172_v11  ;;  %v961_v14 = vpop.f32.mrb[9].mxu1 }
 0x1e6   : > { %v962_v15 = vadd.f32 %v1172_v11, %v961_v14 }
 0x1e7   : > { %v1041_v16 = vmax.f32 %v967_v3, 0.0 }
 0x1e8   : > { %v1040_v17 = vmax.f32 %v962_v15, 0.0 }
 0x1e9   : > { %1057 = vst.msk [vmem:[%s1843_s11 + $0x8] sm:$0xff] %vm846_vm1, %v1041_v16 }
 0x1ea   : > { %1056 = vst.msk [vmem:[%s1843_s11] sm:$0xff] %vm846_vm1, %v1040_v17 }
 0x1ec   : > { %v1317_v18 = vpop.f32.mrb[10].mxu1 }
 0x1ed   : > { %v977_v42 = vadd.f32 %v1317_v18, %v1172_v11  ;;  %v971_v19 = vpop.f32.mrb[11].mxu1 }
 0x1ee   : > { %v972_v20 = vadd.f32 %v1172_v11, %v971_v19 }
 0x1ef   : > { %v1043_v21 = vmax.f32 %v977_v42, 0.0 }
 0x1f0   : > { %v1042_v22 = vmax.f32 %v972_v20, 0.0 }
 0x1f1   : > { %1059 = vst.msk [vmem:[%s1843_s11 + $0x18] sm:$0xff] %vm846_vm1, %v1043_v21 }
 0x1f2   : > { %1058 = vst.msk [vmem:[%s1843_s11 + $0x10] sm:$0xff] %vm846_vm1, %v1042_v22 }
 0x1f4   : > { %v1320_v23 = vpop.f32.mrb[12].mxu1 }
 0x1f5   : > { %v987_v24 = vadd.f32 %v1320_v23, %v1172_v11  ;;  %v981_v25 = vpop.f32.mrb[13].mxu1 }
 0x1f6   : > { %v982_v27 = vadd.f32 %v1172_v11, %v981_v25 }
 0x1f7   : > { %v1045_v30 = vmax.f32 %v987_v24, 0.0 }
 0x1f8   : > { %v1044_v43 = vmax.f32 %v982_v27, 0.0 }
 0x1f9   : > { %1061 = vst.msk [vmem:[%s1843_s11 + $0x28] sm:$0xff] %vm846_vm1, %v1045_v30 }
 0x1fa   : > { %1060 = vst.msk [vmem:[%s1843_s11 + $0x20] sm:$0xff] %vm846_vm1, %v1044_v43 }
 0x1fc   : > { %v1323_v31 = vpop.f32.mrb[14].mxu1 }
 0x1fd   : > { %v997_v32 = vadd.f32 %v1323_v31, %v1172_v11  ;;  %v991_v33 = vpop.f32.mrb[15].mxu1 }
 0x1fe   : > { %v992_v34 = vadd.f32 %v1172_v11, %v991_v33 }
 0x1ff   : > { %v1047_v26 = vmax.f32 %v997_v32, 0.0 }
 0x200   : > { %v1046_v28 = vmax.f32 %v992_v34, 0.0 }
 0x201   : > { %1063 = vst.msk [vmem:[%s1843_s11 + $0x38] sm:$0xff] %vm846_vm1, %v1047_v26 }
 0x202   : > { %1062 = vst.msk [vmem:[%s1843_s11 + $0x30] sm:$0xff] %vm846_vm1, %v1046_v28 }
 0x204   : > { %v1326_v35 = vpop.f32.mrb[16].mxu1 }
 0x205   : > { %v1007_v46 = vadd.f32 %v1326_v35, %v1172_v11  ;;  %v1001_v36 = vpop.f32.mrb[17].mxu1 }
 0x206   : > { %v1002_v37 = vadd.f32 %v1172_v11, %v1001_v36 }
 0x207   : > { %v1049_v38 = vmax.f32 %v1007_v46, 0.0 }
 0x208   : > { %v1048_v48 = vmax.f32 %v1002_v37, 0.0 }
 0x209   : > { %1065 = vst.msk [vmem:[%s1843_s11 + $0x48] sm:$0xff] %vm846_vm1, %v1049_v38 }
 0x20a   : > { %1064 = vst.msk [vmem:[%s1843_s11 + $0x40] sm:$0xff] %vm846_vm1, %v1048_v48 }
 0x20c   : > { %v1329_v49 = vpop.f32.mrb[18].mxu1 }
 0x20d   : > { %v1017_v50 = vadd.f32 %v1329_v49, %v1172_v11  ;;  %v1011_v51 = vpop.f32.mrb[19].mxu1 }
 0x20e   : > { %v1012_v44 = vadd.f32 %v1172_v11, %v1011_v51 }
 0x20f   : > { %v1051_v52 = vmax.f32 %v1017_v50, 0.0 }
 0x210   : > { %v1050_v47 = vmax.f32 %v1012_v44, 0.0  ;;  %v1332_v54 = vpop.f32.mrb[20].mxu1 }
 0x211   : > { %1067 = vst.msk [vmem:[%s1843_s11 + $0x58] sm:$0xff] %vm846_vm1, %v1051_v52  ;;  %v1027_v55 = vadd.f32 %v1332_v54, %v1172_v11  ;;  %v1021_v57 = vpop.f32.mrb[21].mxu1 }
 0x212   : > { %1066 = vst.msk [vmem:[%s1843_s11 + $0x50] sm:$0xff] %vm846_vm1, %v1050_v47  ;;  %v1022_v40 = vadd.f32 %v1172_v11, %v1021_v57 }
 0x213   : > { %v1053_v58 = vmax.f32 %v1027_v55, 0.0 }
 0x214   : > { %v1052_v59 = vmax.f32 %v1022_v40, 0.0  ;;  %v1335_v12 = vpop.f32.mrb[22].mxu1 }
 0x215   : > { %1069 = vst.msk [vmem:[%s1843_s11 + $0x68] sm:$0xff] %vm846_vm1, %v1053_v58  ;;  %v1037_v45 = vadd.f32 %v1335_v12, %v1172_v11  ;;  %v1031_v60 = vpop.f32.mrb[23].mxu1 }
 0x216   : > { %1068 = vst.msk [vmem:[%s1843_s11 + $0x60] sm:$0xff] %vm846_vm1, %v1052_v59  ;;  %v1032_v61 = vadd.f32 %v1172_v11, %v1031_v60 }
 0x217   : > { %v1055_v62 = vmax.f32 %v1037_v45, 0.0 }
 0x218   : > { %v1054_v0 = vmax.f32 %v1032_v61, 0.0 }
 0x219   : > { %1071 = vst.msk [vmem:[%s1843_s11 + $0x78] sm:$0xff] %vm846_vm1, %v1055_v62 }
 0x21a   : > { %1070 = vst.msk [vmem:[%s1843_s11 + $0x70] sm:$0xff] %vm846_vm1, %v1054_v0 }
 0x21b PF: > { %s15_s20 = sadd.s32 1, %s1451_s20   ;;  %s1892_s18 = smov %s1447_s19 }
 0x21c   : > { %p12_p6 = scmp.ge.s32.totalorder %s15_s20, 4   ;;  %s1893_s19 = smov %s1895_s21 }
 0x21e   :  { %14 = sbr.rel (!%p12_p6) target bundleno = 2 (0x2), region = 83 }

</bundles_post_ra>
